<compile_context>
chip_gen: v7x
topology: tpu7x:2x2x1
jax: 0.10.0
libtpu: 0.0.40
codegen_flags: <defaults>
</compile_context>

<pallas_src>
import functools

import jax
import jax.numpy as jnp
from jax import lax
from jax.experimental import pallas as pl
from jax.experimental.pallas import tpu as pltpu


def _decoder_layer_kernel(
    # layer-invariant inputs
    x0_ref, enc_ref, smask_ref, cmask_ref, fln_ref, wout_ref, bout_ref,
    # per-layer (streamed) inputs
    lng_ref, lnb_ref,
    wqkv1_ref, bqkv1_ref, wo1_ref, bo1_ref, rel_ref,
    wq2_ref, bq2_ref, wkv2_ref, bkv2_ref, wo2_ref, bo2_ref,
    w1_ref, b1_ref, w2_ref, b2_ref,
    # outputs
    out_ref,
    # scratch
    x_scr,
    *, B, T, S, H, NH, DH, V, F):
    del V, F  # implicit in ref shapes
    f32 = jnp.float32
    l = pl.program_id(0)

    @pl.when(l == 0)
    def _init():
        x_scr[...] = x0_ref[...]

    def layer_norm(x2, g, b):
        # x2: (N, H); g, b: (1, H). PyTorch LayerNorm (biased var, eps inside sqrt).
        mu = jnp.mean(x2, axis=-1, keepdims=True)
        xc = x2 - mu
        var = jnp.mean(xc * xc, axis=-1, keepdims=True)
        return xc * lax.rsqrt(var + 1e-5) * g + b

    def mha(q3, k3, v3, mask3, rel):
        # q3: (B, Tq, H); k3/v3: (B, Tk, H); mask3: (B, Tq, Tk) additive;
        # rel: (Tq, Tk, DH) relative-position embeddings (self-attention) or None.
        scale = 1.0 / (DH ** 0.5)
        outs = []
        for h in range(NH):
            lo = h * DH
            qh = q3[:, :, lo:lo + DH] * scale               # (B, Tq, DH) (scaled query)
            kh = k3[:, :, lo:lo + DH]
            vh = v3[:, :, lo:lo + DH]
            att = jnp.einsum('bqd,bkd->bqk', qh, kh,
                             preferred_element_type=f32)     # (B, Tq, Tk)
            if rel is not None:
                # bias[b,q,k] = sum_d qh[b,q,d] * rel[q,k,d]  (tiny; VPU + lane reduce)
                att = att + jnp.sum(qh[:, :, None, :] * rel[None, :, :, :], axis=-1)
            att = att + mask3
            att = att - jnp.max(att, axis=-1, keepdims=True)
            e = jnp.exp(att)
            p = e * pl.reciprocal(jnp.sum(e, axis=-1, keepdims=True), approx=True)
            outs.append(jnp.einsum('bqk,bkd->bqd', p, vh,
                                   preferred_element_type=f32))   # (B, Tq, DH)
        return jnp.concatenate(outs, axis=-1)                     # (B, Tq, H)

    x = x_scr[...]                                               # (B*T, H)

    # ---------------- self-attention sublayer (masked, relposenc) ----------------
    xn = layer_norm(x, lng_ref[0, 0:1, :], lnb_ref[0, 0:1, :])
    qkv = jnp.dot(xn, wqkv1_ref[0], preferred_element_type=f32) + bqkv1_ref[0]
    qkv = qkv.reshape(B, T, 3 * H)
    ctx = mha(qkv[:, :, 0:H], qkv[:, :, H:2 * H], qkv[:, :, 2 * H:3 * H],
              smask_ref[...], rel_ref[0])
    a1 = jnp.dot(ctx.reshape(B * T, H), wo1_ref[0],
                 preferred_element_type=f32) + bo1_ref[0]
    x = x + a1

    # ---------------- cross-attention sublayer ----------------
    xn = layer_norm(x, lng_ref[0, 1:2, :], lnb_ref[0, 1:2, :])
    q2 = (jnp.dot(xn, wq2_ref[0], preferred_element_type=f32)
          + bq2_ref[0]).reshape(B, T, H)
    enc2 = enc_ref[...].reshape(B * S, H)
    kv2 = (jnp.dot(enc2, wkv2_ref[0], preferred_element_type=f32)
           + bkv2_ref[0]).reshape(B, S, 2 * H)
    ctx = mha(q2, kv2[:, :, 0:H], kv2[:, :, H:2 * H], cmask_ref[...], None)
    a2 = jnp.dot(ctx.reshape(B * T, H), wo2_ref[0],
                 preferred_element_type=f32) + bo2_ref[0]
    x = x + a2

    # ---------------- feed-forward sublayer ----------------
    xn = layer_norm(x, lng_ref[0, 2:3, :], lnb_ref[0, 2:3, :])
    hidden = jnp.maximum(jnp.dot(xn, w1_ref[0], preferred_element_type=f32)
                         + b1_ref[0], 0.0)
    ff = jnp.dot(hidden, w2_ref[0], preferred_element_type=f32) + b2_ref[0]
    x = x + ff

    x_scr[...] = x

    # ---------------- final layer-norm + output projection (last layer only) ----------------
    @pl.when(l == pl.num_programs(0) - 1)
    def _final():
        xf = layer_norm(x, fln_ref[0:1, :], fln_ref[1:2, :])
        out_ref[...] = jnp.dot(xf, wout_ref[...],
                               preferred_element_type=f32) + bout_ref[...]


def transformer_decoder_forward(encoder_outputs, encoder_hidden, decoder_input,
                                encoder_input, params, *, heads):
    """Matches TransformerDecoder.forward(); returns (logits, 0, 0)."""
    del encoder_hidden  # unused by the module as well
    B, S, H = encoder_outputs.shape
    T = decoder_input.shape[1]
    V = params["wout"].shape[1]
    L = params["wqkv1"].shape[0]
    NH = heads
    DH = H // NH
    F = params["w1"].shape[2]

    # embedding gather + sqrt(H) scale (dropout = identity in eval mode); hoisted.
    x0 = (params["emb"][decoder_input] * jnp.float32(H) ** 0.5).reshape(B * T, H)
    x0 = x0.astype(jnp.float32)

    # additive masks, hoisted (loop- and layer-invariant).
    NEG = jnp.float32(-1e30)
    pos = jnp.arange(T)
    causal = pos[None, :] > pos[:, None]                               # key > query
    self_mask = (jnp.where(causal, NEG, 0.0)[None, :, :]
                 + jnp.where(decoder_input == 2, NEG, 0.0)[:, None, :])  # (B,T,T)
    self_mask = self_mask.astype(jnp.float32)
    if encoder_input is not None:
        cross_mask = jnp.broadcast_to(
            jnp.where(encoder_input == 2, NEG, 0.0)[:, None, :], (B, T, S))
    else:
        cross_mask = jnp.zeros((B, T, S), jnp.float32)
    cross_mask = cross_mask.astype(jnp.float32)

    # relative-position embedding gather, hoisted: rel_full[l,q,k,:] = P_l[k-q+T-1,:]
    rel_idx = jnp.clip(pos[None, :] - pos[:, None], -(T - 1), T - 1) + (T - 1)
    rel_full = jnp.take(params["rel"], rel_idx, axis=1)                # (L,T,T,DH)

    kernel = functools.partial(_decoder_layer_kernel,
                               B=B, T=T, S=S, H=H, NH=NH, DH=DH, V=V, F=F)

    zero2 = lambda l: (0, 0)
    zero3 = lambda l: (0, 0, 0)
    lay3 = lambda l: (l, 0, 0)
    lay4 = lambda l: (l, 0, 0, 0)

    logits2d = pl.pallas_call(
        kernel,
        out_shape=jax.ShapeDtypeStruct((B * T, V), jnp.float32),
        grid_spec=pltpu.PrefetchScalarGridSpec(
            num_scalar_prefetch=0,
            grid=(L,),
            in_specs=[
                pl.BlockSpec((B * T, H), zero2),          # x0 (embedded tokens)
                pl.BlockSpec((B, S, H), zero3),           # encoder outputs
                pl.BlockSpec((B, T, T), zero3),           # self mask (causal+pad)
                pl.BlockSpec((B, T, S), zero3),           # cross mask (pad)
                pl.BlockSpec((2, H), zero2),              # final LN gamma/beta
                pl.BlockSpec((H, V), zero2),              # output proj weight
                pl.BlockSpec((1, V), zero2),              # output proj bias
                pl.BlockSpec((1, 3, H), lay3),            # LN1/2/3 gammas
                pl.BlockSpec((1, 3, H), lay3),            # LN1/2/3 betas
                pl.BlockSpec((1, H, 3 * H), lay3),        # self-attn Wqkv
                pl.BlockSpec((1, 1, 3 * H), lay3),        # self-attn bqkv
                pl.BlockSpec((1, H, H), lay3),            # self-attn Wo
                pl.BlockSpec((1, 1, H), lay3),            # self-attn bo
                pl.BlockSpec((1, T, T, DH), lay4),        # rel-pos embeddings
                pl.BlockSpec((1, H, H), lay3),            # cross-attn Wq
                pl.BlockSpec((1, 1, H), lay3),            # cross-attn bq
                pl.BlockSpec((1, H, 2 * H), lay3),        # cross-attn Wkv
                pl.BlockSpec((1, 1, 2 * H), lay3),        # cross-attn bkv
                pl.BlockSpec((1, H, H), lay3),            # cross-attn Wo
                pl.BlockSpec((1, 1, H), lay3),            # cross-attn bo
                pl.BlockSpec((1, H, F), lay3),            # FFN W1
                pl.BlockSpec((1, 1, F), lay3),            # FFN b1
                pl.BlockSpec((1, F, H), lay3),            # FFN W2
                pl.BlockSpec((1, 1, H), lay3),            # FFN b2
            ],
            out_specs=pl.BlockSpec((B * T, V), zero2),
            scratch_shapes=[pltpu.VMEM((B * T, H), jnp.float32)],
        ),
        compiler_params=pltpu.CompilerParams(dimension_semantics=("arbitrary",)),
    )(x0, encoder_outputs.astype(jnp.float32), self_mask, cross_mask,
      params["fin_ln"], params["wout"], params["bout"],
      params["ln_g"], params["ln_b"],
      params["wqkv1"], params["bqkv1"], params["wo1"], params["bo1"], rel_full,
      params["wq2"], params["bq2"], params["wkv2"], params["bkv2"],
      params["wo2"], params["bo2"],
      params["w1"], params["b1"], params["w2"], params["b2"])

    return logits2d.reshape(B, T, V), 0, 0


# ----------------------- pure-JAX reference (for validation) -----------------------
def reference_forward(encoder_outputs, decoder_input, encoder_input, params, *, heads):
    B, S, H = encoder_outputs.shape
    T = decoder_input.shape[1]
    NH = heads
    DH = H // NH
    L = params["wqkv1"].shape[0]
    hp = lax.Precision.HIGHEST

    x = params["emb"][decoder_input] * jnp.float32(H) ** 0.5
    NEG = jnp.float32(-1e30)
    pos = jnp.arange(T)
    causal = pos[None, :] > pos[:, None]
    self_mask = (jnp.where(causal, NEG, 0.0)[None]
                 + jnp.where(decoder_input == 2, NEG, 0.0)[:, None, :])
    if encoder_input is not None:
        cross_mask = jnp.broadcast_to(
            jnp.where(encoder_input == 2, NEG, 0.0)[:, None, :], (B, T, S))
    else:
        cross_mask = jnp.zeros((B, T, S), jnp.float32)
    rel_idx = jnp.clip(pos[None, :] - pos[:, None], -(T - 1), T - 1) + (T - 1)

    def ln(z, g, b):
        mu = jnp.mean(z, axis=-1, keepdims=True)
        zc = z - mu
        var = jnp.mean(zc * zc, axis=-1, keepdims=True)
        return zc / jnp.sqrt(var + 1e-5) * g + b

    def split_heads(z):
        Bz, Lz, _ = z.shape
        return z.reshape(Bz, Lz, NH, DH).transpose(0, 2, 1, 3)

    def mha(xq, xk, xv, Wq, bq, Wk, bk, Wv, bv, Wo, bo, mask, rel):
        q = jnp.einsum('blh,hk->blk', xq, Wq, precision=hp) + bq
        k = jnp.einsum('blh,hk->blk', xk, Wk, precision=hp) + bk
        v = jnp.einsum('blh,hk->blk', xv, Wv, precision=hp) + bv
        q = split_heads(q) / (DH ** 0.5)
        k = split_heads(k)
        v = split_heads(v)
        att = jnp.einsum('bhqd,bhkd->bhqk', q, k, precision=hp)
        if rel is not None:
            att = att + jnp.einsum('bhqd,qkd->bhqk', q, rel, precision=hp)
        att = att + mask[:, None, :, :]
        p = jax.nn.softmax(att, axis=-1)
        o = jnp.einsum('bhqk,bhkd->bhqd', p, v, precision=hp)
        o = o.transpose(0, 2, 1, 3).reshape(xq.shape[0], xq.shape[1], H)
        return jnp.einsum('blh,hk->blk', o, Wo, precision=hp) + bo

    for l in range(L):
        g1, g2, g3 = params["ln_g"][l]
        bb1, bb2, bb3 = params["ln_b"][l]
        Wqkv = params["wqkv1"][l]
        bqkv = params["bqkv1"][l][0]
        rel = jnp.take(params["rel"][l], rel_idx, axis=0)
        xn = ln(x, g1, bb1)
        a1 = mha(xn, xn, xn,
                 Wqkv[:, 0:H], bqkv[0:H], Wqkv[:, H:2 * H], bqkv[H:2 * H],
                 Wqkv[:, 2 * H:3 * H], bqkv[2 * H:3 * H],
                 params["wo1"][l], params["bo1"][l][0], self_mask, rel)
        x = x + a1
        xn = ln(x, g2, bb2)
        Wkv = params["wkv2"][l]
        bkv = params["bkv2"][l][0]
        a2 = mha(xn, encoder_outputs, encoder_outputs,
                 params["wq2"][l], params["bq2"][l][0],
                 Wkv[:, 0:H], bkv[0:H], Wkv[:, H:2 * H], bkv[H:2 * H],
                 params["wo2"][l], params["bo2"][l][0], cross_mask, None)
        x = x + a2
        xn = ln(x, g3, bb3)
        h1 = jax.nn.relu(jnp.einsum('blh,hf->blf', xn, params["w1"][l],
                                    precision=hp) + params["b1"][l][0])
        ff = jnp.einsum('blf,fh->blh', h1, params["w2"][l],
                        precision=hp) + params["b2"][l][0]
        x = x + ff

    x = ln(x, params["fin_ln"][0], params["fin_ln"][1])
    return jnp.einsum('blh,hv->blv', x, params["wout"],
                      precision=hp) + params["bout"][0]


def init_params(key, *, L, H, NH, T, V, F):
    DH = H // NH
    R = 2 * T - 1
    keys = iter(jax.random.split(key, 32))

    def xavier(k, shape):
        fan_in, fan_out = shape[-2], shape[-1]
        bound = (6.0 / (fan_in + fan_out)) ** 0.5
        return jax.random.uniform(k, shape, jnp.float32, -bound, bound)

    def small(k, shape):
        return jax.random.uniform(k, shape, jnp.float32, -0.05, 0.05)

    p = dict(
        emb=xavier(next(keys), (V, H)),
        wqkv1=xavier(next(keys), (L, H, 3 * H)), bqkv1=small(next(keys), (L, 1, 3 * H)),
        wo1=xavier(next(keys), (L, H, H)), bo1=small(next(keys), (L, 1, H)),
        rel=xavier(next(keys), (L, R, DH)),
        wq2=xavier(next(keys), (L, H, H)), bq2=small(next(keys), (L, 1, H)),
        wkv2=xavier(next(keys), (L, H, 2 * H)), bkv2=small(next(keys), (L, 1, 2 * H)),
        wo2=xavier(next(keys), (L, H, H)), bo2=small(next(keys), (L, 1, H)),
        ln_g=1.0 + 0.1 * jax.random.normal(next(keys), (L, 3, H), jnp.float32),
        ln_b=0.1 * jax.random.normal(next(keys), (L, 3, H), jnp.float32),
        w1=xavier(next(keys), (L, H, F)), b1=small(next(keys), (L, 1, F)),
        w2=xavier(next(keys), (L, F, H)), b2=small(next(keys), (L, 1, H)),
        fin_ln=jnp.stack([1.0 + 0.1 * jax.random.normal(next(keys), (H,), jnp.float32),
                          0.1 * jax.random.normal(next(keys), (H,), jnp.float32)], axis=0),
        wout=xavier(next(keys), (H, V)),
        bout=jnp.zeros((1, V), jnp.float32),
    )
    return p


if __name__ == "__main__":
    # small but hardware-friendly shapes: H, V, 4H multiples of 128; B*T, B*S multiples of 8
    B, T, S, H, NH, V, L = 2, 8, 8, 128, 4, 128, 2
    F = 4 * H

    key = jax.random.PRNGKey(0)
    kp, ke, kd, kx = jax.random.split(key, 4)
    params = init_params(kp, L=L, H=H, NH=NH, T=T, V=V, F=F)

    encoder_outputs = jax.random.normal(ke, (B, S, H), jnp.float32)
    decoder_input = jax.random.randint(kd, (B, T), 0, V)
    decoder_input = decoder_input.at[:, 0].set(0)          # SOS, never padding at pos 0
    decoder_input = decoder_input.at[0, T - 1].set(2)      # exercise self padding mask
    encoder_input = jax.random.randint(kx, (B, S), 3, V)
    encoder_input = encoder_input.at[:, S - 1].set(2)      # exercise cross padding mask

    out, _, _ = transformer_decoder_forward(encoder_outputs, 0, decoder_input,
                                            encoder_input, params, heads=NH)
    out = jax.block_until_ready(out)
    assert out.shape == (B, T, V)

    ref = reference_forward(encoder_outputs, decoder_input, encoder_input,
                            params, heads=NH)
    err = float(jnp.max(jnp.abs(out - ref)))
    assert jnp.allclose(out, ref, atol=2e-2, rtol=2e-2), f"logits mismatch, max abs err={err}"

    print("KERNEL_OK")
</pallas_src>

<mosaic_0001>
module attributes {stable_mosaic.version = 11 : i64} {
  func.func @_decoder_layer_kernel(%arg0: i32, %arg1: memref<16x128xf32, #tpu.memory_space<vmem>>, %arg2: memref<2x8x128xf32, #tpu.memory_space<vmem>>, %arg3: memref<2x8x8xf32, #tpu.memory_space<vmem>>, %arg4: memref<2x8x8xf32, #tpu.memory_space<vmem>>, %arg5: memref<2x128xf32, #tpu.memory_space<vmem>>, %arg6: memref<128x128xf32, #tpu.memory_space<vmem>>, %arg7: memref<1x128xf32, #tpu.memory_space<vmem>>, %arg8: memref<1x3x128xf32, #tpu.memory_space<vmem>>, %arg9: memref<1x3x128xf32, #tpu.memory_space<vmem>>, %arg10: memref<1x128x384xf32, #tpu.memory_space<vmem>>, %arg11: memref<1x1x384xf32, #tpu.memory_space<vmem>>, %arg12: memref<1x128x128xf32, #tpu.memory_space<vmem>>, %arg13: memref<1x1x128xf32, #tpu.memory_space<vmem>>, %arg14: memref<1x8x8x32xf32, #tpu.memory_space<vmem>>, %arg15: memref<1x128x128xf32, #tpu.memory_space<vmem>>, %arg16: memref<1x1x128xf32, #tpu.memory_space<vmem>>, %arg17: memref<1x128x256xf32, #tpu.memory_space<vmem>>, %arg18: memref<1x1x256xf32, #tpu.memory_space<vmem>>, %arg19: memref<1x128x128xf32, #tpu.memory_space<vmem>>, %arg20: memref<1x1x128xf32, #tpu.memory_space<vmem>>, %arg21: memref<1x128x512xf32, #tpu.memory_space<vmem>>, %arg22: memref<1x1x512xf32, #tpu.memory_space<vmem>>, %arg23: memref<1x512x128xf32, #tpu.memory_space<vmem>>, %arg24: memref<1x1x128xf32, #tpu.memory_space<vmem>>, %arg25: memref<16x128xf32, #tpu.memory_space<vmem>>, %arg26: memref<16x128xf32, #tpu.memory_space<vmem>>) attributes {dimension_semantics = [#tpu.dimension_semantics<arbitrary>], iteration_bounds = array<i64: 2>, scalar_prefetch = 0 : i64, scratch_operands = 1 : i64, tpu.core_type = #tpu.core_type<tc>, window_params = [{pipeline_mode = #tpu.pipeline_mode<synchronous>, transform_indices = @transform_0, window_bounds = array<i64: 16, 128>}, {pipeline_mode = #tpu.pipeline_mode<synchronous>, transform_indices = @transform_1, window_bounds = array<i64: 2, 8, 128>}, {pipeline_mode = #tpu.pipeline_mode<synchronous>, transform_indices = @transform_2, window_bounds = array<i64: 2, 8, 8>}, {pipeline_mode = #tpu.pipeline_mode<synchronous>, transform_indices = @transform_3, window_bounds = array<i64: 2, 8, 8>}, {pipeline_mode = #tpu.pipeline_mode<synchronous>, transform_indices = @transform_4, window_bounds = array<i64: 2, 128>}, {pipeline_mode = #tpu.pipeline_mode<synchronous>, transform_indices = @transform_5, window_bounds = array<i64: 128, 128>}, {pipeline_mode = #tpu.pipeline_mode<synchronous>, transform_indices = @transform_6, window_bounds = array<i64: 1, 128>}, {transform_indices = @transform_7, window_bounds = array<i64: 1, 3, 128>}, {transform_indices = @transform_8, window_bounds = array<i64: 1, 3, 128>}, {transform_indices = @transform_9, window_bounds = array<i64: 1, 128, 384>}, {transform_indices = @transform_10, window_bounds = array<i64: 1, 1, 384>}, {transform_indices = @transform_11, window_bounds = array<i64: 1, 128, 128>}, {transform_indices = @transform_12, window_bounds = array<i64: 1, 1, 128>}, {transform_indices = @transform_13, window_bounds = array<i64: 1, 8, 8, 32>}, {transform_indices = @transform_14, window_bounds = array<i64: 1, 128, 128>}, {transform_indices = @transform_15, window_bounds = array<i64: 1, 1, 128>}, {transform_indices = @transform_16, window_bounds = array<i64: 1, 128, 256>}, {transform_indices = @transform_17, window_bounds = array<i64: 1, 1, 256>}, {transform_indices = @transform_18, window_bounds = array<i64: 1, 128, 128>}, {transform_indices = @transform_19, window_bounds = array<i64: 1, 1, 128>}, {transform_indices = @transform_20, window_bounds = array<i64: 1, 128, 512>}, {transform_indices = @transform_21, window_bounds = array<i64: 1, 1, 512>}, {transform_indices = @transform_22, window_bounds = array<i64: 1, 512, 128>}, {transform_indices = @transform_23, window_bounds = array<i64: 1, 1, 128>}, {pipeline_mode = #tpu.pipeline_mode<synchronous>, transform_indices = @transform_24, window_bounds = array<i64: 16, 128>}]} {
    %c0_i32 = arith.constant 0 : i32
    %0 = arith.cmpi eq, %arg0, %c0_i32 : i32
    %1 = arith.extui %0 : i1 to i32
    %c0_i32_0 = arith.constant 0 : i32
    %2 = arith.cmpi ne, %1, %c0_i32_0 : i32
    scf.if %2 {
      %c0_142 = arith.constant 0 : index
      %c0_143 = arith.constant 0 : index
      %324 = vector.load %arg1[%c0_142, %c0_143] : memref<16x128xf32, #tpu.memory_space<vmem>>, vector<16x128xf32>
      %c0_144 = arith.constant 0 : index
      %c0_145 = arith.constant 0 : index
      %325 = vector.load %arg26[%c0_144, %c0_145] : memref<16x128xf32, #tpu.memory_space<vmem>>, vector<16x128xf32>
      tpu.vector_store %arg26[%c0_144, %c0_145], %324 {strides = array<i32>} : memref<16x128xf32, #tpu.memory_space<vmem>>, vector<16x128xf32>,
    } else {
    }
    %c0 = arith.constant 0 : index
    %c0_1 = arith.constant 0 : index
    %3 = vector.load %arg26[%c0, %c0_1] : memref<16x128xf32, #tpu.memory_space<vmem>>, vector<16x128xf32>
    %c0_2 = arith.constant 0 : index
    %c0_3 = arith.constant 0 : index
    %c0_4 = arith.constant 0 : index
    %4 = vector.load %arg8[%c0_2, %c0_3, %c0_4] : memref<1x3x128xf32, #tpu.memory_space<vmem>>, vector<1x1x128xf32>
    %5 = vector.shape_cast %4 : vector<1x1x128xf32> to vector<1x128xf32>
    %c0_5 = arith.constant 0 : index
    %c0_6 = arith.constant 0 : index
    %c0_7 = arith.constant 0 : index
    %6 = vector.load %arg9[%c0_5, %c0_6, %c0_7] : memref<1x3x128xf32, #tpu.memory_space<vmem>>, vector<1x1x128xf32>
    %7 = vector.shape_cast %6 : vector<1x1x128xf32> to vector<1x128xf32>
    %cst = arith.constant dense<0.000000e+00> : vector<16xf32>
    %8 = vector.multi_reduction <add>, %3, %cst [1] : vector<16x128xf32> to vector<16xf32>
    %9 = vector.shape_cast %8 : vector<16xf32> to vector<16x1xf32>
    %cst_8 = arith.constant 1.280000e+02 : f32
    %10 = vector.broadcast %cst_8 : f32 to vector<16x1xf32>
    %11 = arith.divf %9, %10 : vector<16x1xf32>
    %12 = vector.broadcast %11 : vector<16x1xf32> to vector<16x128xf32>
    %13 = arith.subf %3, %12 : vector<16x128xf32>
    %14 = arith.mulf %13, %13 : vector<16x128xf32>
    %cst_9 = arith.constant dense<0.000000e+00> : vector<16xf32>
    %15 = vector.multi_reduction <add>, %14, %cst_9 [1] : vector<16x128xf32> to vector<16xf32>
    %16 = vector.shape_cast %15 : vector<16xf32> to vector<16x1xf32>
    %cst_10 = arith.constant 1.280000e+02 : f32
    %17 = vector.broadcast %cst_10 : f32 to vector<16x1xf32>
    %18 = arith.divf %16, %17 : vector<16x1xf32>
    %cst_11 = arith.constant 9.99999974E-6 : f32
    %19 = vector.broadcast %cst_11 : f32 to vector<16x1xf32>
    %20 = arith.addf %18, %19 : vector<16x1xf32>
    %21 = math.rsqrt %20 : vector<16x1xf32>
    %22 = vector.broadcast %21 : vector<16x1xf32> to vector<16x128xf32>
    %23 = arith.mulf %13, %22 : vector<16x128xf32>
    %24 = vector.broadcast %5 : vector<1x128xf32> to vector<16x128xf32>
    %25 = arith.mulf %23, %24 : vector<16x128xf32>
    %26 = vector.broadcast %7 : vector<1x128xf32> to vector<16x128xf32>
    %27 = arith.addf %25, %26 : vector<16x128xf32>
    %c0_12 = arith.constant 0 : index
    %c0_13 = arith.constant 0 : index
    %c0_14 = arith.constant 0 : index
    %28 = vector.load %arg10[%c0_12, %c0_13, %c0_14] : memref<1x128x384xf32, #tpu.memory_space<vmem>>, vector<1x128x384xf32>
    %29 = vector.shape_cast %28 : vector<1x128x384xf32> to vector<128x384xf32>
    %cst_15 = arith.constant dense<0.000000e+00> : vector<16x384xf32>
    %30 = tpu.matmul %27, %29, %cst_15 {dimension_numbers = #tpu.dot_dimension_numbers<[1], [0], [0], [1], [0, 0, 1, 1], [], []>} : vector<16x128xf32>, vector<128x384xf32>, vector<16x384xf32> -> vector<16x384xf32>
    %c0_16 = arith.constant 0 : index
    %c0_17 = arith.constant 0 : index
    %c0_18 = arith.constant 0 : index
    %31 = vector.load %arg11[%c0_16, %c0_17, %c0_18] : memref<1x1x384xf32, #tpu.memory_space<vmem>>, vector<1x1x384xf32>
    %32 = vector.shape_cast %31 : vector<1x1x384xf32> to vector<1x384xf32>
    %33 = vector.broadcast %32 : vector<1x384xf32> to vector<16x384xf32>
    %34 = arith.addf %30, %33 : vector<16x384xf32>
    %35 = vector.shape_cast %34 : vector<16x384xf32> to vector<2x8x384xf32>
    %36 = vector.extract_strided_slice %35 {offsets = [0, 0, 0], sizes = [2, 8, 128], strides = [1, 1, 1]} : vector<2x8x384xf32> to vector<2x8x128xf32>
    %37 = vector.extract_strided_slice %35 {offsets = [0, 0, 128], sizes = [2, 8, 128], strides = [1, 1, 1]} : vector<2x8x384xf32> to vector<2x8x128xf32>
    %38 = vector.extract_strided_slice %35 {offsets = [0, 0, 256], sizes = [2, 8, 128], strides = [1, 1, 1]} : vector<2x8x384xf32> to vector<2x8x128xf32>
    %c0_19 = arith.constant 0 : index
    %c0_20 = arith.constant 0 : index
    %c0_21 = arith.constant 0 : index
    %39 = vector.load %arg3[%c0_19, %c0_20, %c0_21] : memref<2x8x8xf32, #tpu.memory_space<vmem>>, vector<2x8x8xf32>
    %c0_22 = arith.constant 0 : index
    %c0_23 = arith.constant 0 : index
    %c0_24 = arith.constant 0 : index
    %c0_25 = arith.constant 0 : index
    %40 = vector.load %arg14[%c0_22, %c0_23, %c0_24, %c0_25] : memref<1x8x8x32xf32, #tpu.memory_space<vmem>>, vector<1x8x8x32xf32>
    %41 = vector.shape_cast %40 : vector<1x8x8x32xf32> to vector<8x8x32xf32>
    %42 = vector.extract_strided_slice %36 {offsets = [0, 0, 0], sizes = [2, 8, 32], strides = [1, 1, 1]} : vector<2x8x128xf32> to vector<2x8x32xf32>
    %cst_26 = arith.constant 0.176776692 : f32
    %43 = vector.broadcast %cst_26 : f32 to vector<2x8x32xf32>
    %44 = arith.mulf %42, %43 : vector<2x8x32xf32>
    %45 = vector.extract_strided_slice %37 {offsets = [0, 0, 0], sizes = [2, 8, 32], strides = [1, 1, 1]} : vector<2x8x128xf32> to vector<2x8x32xf32>
    %46 = vector.extract_strided_slice %38 {offsets = [0, 0, 0], sizes = [2, 8, 32], strides = [1, 1, 1]} : vector<2x8x128xf32> to vector<2x8x32xf32>
    "tpu.trace_start"() <{level = 10 : i32, message = "bqd,bkd->bqk"}> : () -> ()
    %cst_27 = arith.constant dense<0.000000e+00> : vector<2x8x8xf32>
    %47 = tpu.matmul %44, %45, %cst_27 {dimension_numbers = #tpu.dot_dimension_numbers<[2], [2], [1], [1], [0, 0, 0, 1, 1, 1], [0], [0]>} : vector<2x8x32xf32>, vector<2x8x32xf32>, vector<2x8x8xf32> -> vector<2x8x8xf32>
    "tpu.trace_stop"() : () -> ()
    %48 = vector.shape_cast %44 : vector<2x8x32xf32> to vector<2x8x1x32xf32>
    %49 = vector.shape_cast %41 : vector<8x8x32xf32> to vector<1x8x8x32xf32>
    %50 = vector.broadcast %48 : vector<2x8x1x32xf32> to vector<2x8x8x32xf32>
    %51 = vector.broadcast %49 : vector<1x8x8x32xf32> to vector<2x8x8x32xf32>
    %52 = arith.mulf %50, %51 : vector<2x8x8x32xf32>
    %cst_28 = arith.constant dense<0.000000e+00> : vector<2x8x8xf32>
    %53 = vector.multi_reduction <add>, %52, %cst_28 [3] : vector<2x8x8x32xf32> to vector<2x8x8xf32>
    %54 = arith.addf %47, %53 : vector<2x8x8xf32>
    %55 = arith.addf %54, %39 : vector<2x8x8xf32>
    %cst_29 = arith.constant dense<0xFF800000> : vector<2x8xf32>
    %56 = vector.multi_reduction <maximumf>, %55, %cst_29 [2] : vector<2x8x8xf32> to vector<2x8xf32>
    %57 = vector.shape_cast %56 : vector<2x8xf32> to vector<2x8x1xf32>
    %58 = vector.broadcast %57 : vector<2x8x1xf32> to vector<2x8x8xf32>
    %59 = arith.subf %55, %58 : vector<2x8x8xf32>
    %60 = math.exp %59 : vector<2x8x8xf32>
    %cst_30 = arith.constant dense<0.000000e+00> : vector<2x8xf32>
    %61 = vector.multi_reduction <add>, %60, %cst_30 [2] : vector<2x8x8xf32> to vector<2x8xf32>
    %62 = vector.shape_cast %61 : vector<2x8xf32> to vector<2x8x1xf32>
    %63 = tpu.reciprocal %62 {approx = true} : vector<2x8x1xf32> -> vector<2x8x1xf32>
    %64 = vector.broadcast %63 : vector<2x8x1xf32> to vector<2x8x8xf32>
    %65 = arith.mulf %60, %64 : vector<2x8x8xf32>
    "tpu.trace_start"() <{level = 10 : i32, message = "bqk,bkd->bqd"}> : () -> ()
    %cst_31 = arith.constant dense<0.000000e+00> : vector<2x8x32xf32>
    %66 = tpu.matmul %65, %46, %cst_31 {dimension_numbers = #tpu.dot_dimension_numbers<[2], [1], [1], [2], [0, 0, 0, 1, 1, 2], [0], [0]>} : vector<2x8x8xf32>, vector<2x8x32xf32>, vector<2x8x32xf32> -> vector<2x8x32xf32>
    "tpu.trace_stop"() : () -> ()
    %67 = vector.extract_strided_slice %36 {offsets = [0, 0, 32], sizes = [2, 8, 32], strides = [1, 1, 1]} : vector<2x8x128xf32> to vector<2x8x32xf32>
    %cst_32 = arith.constant 0.176776692 : f32
    %68 = vector.broadcast %cst_32 : f32 to vector<2x8x32xf32>
    %69 = arith.mulf %67, %68 : vector<2x8x32xf32>
    %70 = vector.extract_strided_slice %37 {offsets = [0, 0, 32], sizes = [2, 8, 32], strides = [1, 1, 1]} : vector<2x8x128xf32> to vector<2x8x32xf32>
    %71 = vector.extract_strided_slice %38 {offsets = [0, 0, 32], sizes = [2, 8, 32], strides = [1, 1, 1]} : vector<2x8x128xf32> to vector<2x8x32xf32>
    "tpu.trace_start"() <{level = 10 : i32, message = "bqd,bkd->bqk"}> : () -> ()
    %cst_33 = arith.constant dense<0.000000e+00> : vector<2x8x8xf32>
    %72 = tpu.matmul %69, %70, %cst_33 {dimension_numbers = #tpu.dot_dimension_numbers<[2], [2], [1], [1], [0, 0, 0, 1, 1, 1], [0], [0]>} : vector<2x8x32xf32>, vector<2x8x32xf32>, vector<2x8x8xf32> -> vector<2x8x8xf32>
    "tpu.trace_stop"() : () -> ()
    %73 = vector.shape_cast %69 : vector<2x8x32xf32> to vector<2x8x1x32xf32>
    %74 = vector.shape_cast %41 : vector<8x8x32xf32> to vector<1x8x8x32xf32>
    %75 = vector.broadcast %73 : vector<2x8x1x32xf32> to vector<2x8x8x32xf32>
    %76 = vector.broadcast %74 : vector<1x8x8x32xf32> to vector<2x8x8x32xf32>
    %77 = arith.mulf %75, %76 : vector<2x8x8x32xf32>
    %cst_34 = arith.constant dense<0.000000e+00> : vector<2x8x8xf32>
    %78 = vector.multi_reduction <add>, %77, %cst_34 [3] : vector<2x8x8x32xf32> to vector<2x8x8xf32>
    %79 = arith.addf %72, %78 : vector<2x8x8xf32>
    %80 = arith.addf %79, %39 : vector<2x8x8xf32>
    %cst_35 = arith.constant dense<0xFF800000> : vector<2x8xf32>
    %81 = vector.multi_reduction <maximumf>, %80, %cst_35 [2] : vector<2x8x8xf32> to vector<2x8xf32>
    %82 = vector.shape_cast %81 : vector<2x8xf32> to vector<2x8x1xf32>
    %83 = vector.broadcast %82 : vector<2x8x1xf32> to vector<2x8x8xf32>
    %84 = arith.subf %80, %83 : vector<2x8x8xf32>
    %85 = math.exp %84 : vector<2x8x8xf32>
    %cst_36 = arith.constant dense<0.000000e+00> : vector<2x8xf32>
    %86 = vector.multi_reduction <add>, %85, %cst_36 [2] : vector<2x8x8xf32> to vector<2x8xf32>
    %87 = vector.shape_cast %86 : vector<2x8xf32> to vector<2x8x1xf32>
    %88 = tpu.reciprocal %87 {approx = true} : vector<2x8x1xf32> -> vector<2x8x1xf32>
    %89 = vector.broadcast %88 : vector<2x8x1xf32> to vector<2x8x8xf32>
    %90 = arith.mulf %85, %89 : vector<2x8x8xf32>
    "tpu.trace_start"() <{level = 10 : i32, message = "bqk,bkd->bqd"}> : () -> ()
    %cst_37 = arith.constant dense<0.000000e+00> : vector<2x8x32xf32>
    %91 = tpu.matmul %90, %71, %cst_37 {dimension_numbers = #tpu.dot_dimension_numbers<[2], [1], [1], [2], [0, 0, 0, 1, 1, 2], [0], [0]>} : vector<2x8x8xf32>, vector<2x8x32xf32>, vector<2x8x32xf32> -> vector<2x8x32xf32>
    "tpu.trace_stop"() : () -> ()
    %92 = vector.extract_strided_slice %36 {offsets = [0, 0, 64], sizes = [2, 8, 32], strides = [1, 1, 1]} : vector<2x8x128xf32> to vector<2x8x32xf32>
    %cst_38 = arith.constant 0.176776692 : f32
    %93 = vector.broadcast %cst_38 : f32 to vector<2x8x32xf32>
    %94 = arith.mulf %92, %93 : vector<2x8x32xf32>
    %95 = vector.extract_strided_slice %37 {offsets = [0, 0, 64], sizes = [2, 8, 32], strides = [1, 1, 1]} : vector<2x8x128xf32> to vector<2x8x32xf32>
    %96 = vector.extract_strided_slice %38 {offsets = [0, 0, 64], sizes = [2, 8, 32], strides = [1, 1, 1]} : vector<2x8x128xf32> to vector<2x8x32xf32>
    "tpu.trace_start"() <{level = 10 : i32, message = "bqd,bkd->bqk"}> : () -> ()
    %cst_39 = arith.constant dense<0.000000e+00> : vector<2x8x8xf32>
    %97 = tpu.matmul %94, %95, %cst_39 {dimension_numbers = #tpu.dot_dimension_numbers<[2], [2], [1], [1], [0, 0, 0, 1, 1, 1], [0], [0]>} : vector<2x8x32xf32>, vector<2x8x32xf32>, vector<2x8x8xf32> -> vector<2x8x8xf32>
    "tpu.trace_stop"() : () -> ()
    %98 = vector.shape_cast %94 : vector<2x8x32xf32> to vector<2x8x1x32xf32>
    %99 = vector.shape_cast %41 : vector<8x8x32xf32> to vector<1x8x8x32xf32>
    %100 = vector.broadcast %98 : vector<2x8x1x32xf32> to vector<2x8x8x32xf32>
    %101 = vector.broadcast %99 : vector<1x8x8x32xf32> to vector<2x8x8x32xf32>
    %102 = arith.mulf %100, %101 : vector<2x8x8x32xf32>
    %cst_40 = arith.constant dense<0.000000e+00> : vector<2x8x8xf32>
    %103 = vector.multi_reduction <add>, %102, %cst_40 [3] : vector<2x8x8x32xf32> to vector<2x8x8xf32>
    %104 = arith.addf %97, %103 : vector<2x8x8xf32>
    %105 = arith.addf %104, %39 : vector<2x8x8xf32>
    %cst_41 = arith.constant dense<0xFF800000> : vector<2x8xf32>
    %106 = vector.multi_reduction <maximumf>, %105, %cst_41 [2] : vector<2x8x8xf32> to vector<2x8xf32>
    %107 = vector.shape_cast %106 : vector<2x8xf32> to vector<2x8x1xf32>
    %108 = vector.broadcast %107 : vector<2x8x1xf32> to vector<2x8x8xf32>
    %109 = arith.subf %105, %108 : vector<2x8x8xf32>
    %110 = math.exp %109 : vector<2x8x8xf32>
    %cst_42 = arith.constant dense<0.000000e+00> : vector<2x8xf32>
    %111 = vector.multi_reduction <add>, %110, %cst_42 [2] : vector<2x8x8xf32> to vector<2x8xf32>
    %112 = vector.shape_cast %111 : vector<2x8xf32> to vector<2x8x1xf32>
    %113 = tpu.reciprocal %112 {approx = true} : vector<2x8x1xf32> -> vector<2x8x1xf32>
    %114 = vector.broadcast %113 : vector<2x8x1xf32> to vector<2x8x8xf32>
    %115 = arith.mulf %110, %114 : vector<2x8x8xf32>
    "tpu.trace_start"() <{level = 10 : i32, message = "bqk,bkd->bqd"}> : () -> ()
    %cst_43 = arith.constant dense<0.000000e+00> : vector<2x8x32xf32>
    %116 = tpu.matmul %115, %96, %cst_43 {dimension_numbers = #tpu.dot_dimension_numbers<[2], [1], [1], [2], [0, 0, 0, 1, 1, 2], [0], [0]>} : vector<2x8x8xf32>, vector<2x8x32xf32>, vector<2x8x32xf32> -> vector<2x8x32xf32>
    "tpu.trace_stop"() : () -> ()
    %117 = vector.extract_strided_slice %36 {offsets = [0, 0, 96], sizes = [2, 8, 32], strides = [1, 1, 1]} : vector<2x8x128xf32> to vector<2x8x32xf32>
    %cst_44 = arith.constant 0.176776692 : f32
    %118 = vector.broadcast %cst_44 : f32 to vector<2x8x32xf32>
    %119 = arith.mulf %117, %118 : vector<2x8x32xf32>
    %120 = vector.extract_strided_slice %37 {offsets = [0, 0, 96], sizes = [2, 8, 32], strides = [1, 1, 1]} : vector<2x8x128xf32> to vector<2x8x32xf32>
    %121 = vector.extract_strided_slice %38 {offsets = [0, 0, 96], sizes = [2, 8, 32], strides = [1, 1, 1]} : vector<2x8x128xf32> to vector<2x8x32xf32>
    "tpu.trace_start"() <{level = 10 : i32, message = "bqd,bkd->bqk"}> : () -> ()
    %cst_45 = arith.constant dense<0.000000e+00> : vector<2x8x8xf32>
    %122 = tpu.matmul %119, %120, %cst_45 {dimension_numbers = #tpu.dot_dimension_numbers<[2], [2], [1], [1], [0, 0, 0, 1, 1, 1], [0], [0]>} : vector<2x8x32xf32>, vector<2x8x32xf32>, vector<2x8x8xf32> -> vector<2x8x8xf32>
    "tpu.trace_stop"() : () -> ()
    %123 = vector.shape_cast %119 : vector<2x8x32xf32> to vector<2x8x1x32xf32>
    %124 = vector.shape_cast %41 : vector<8x8x32xf32> to vector<1x8x8x32xf32>
    %125 = vector.broadcast %123 : vector<2x8x1x32xf32> to vector<2x8x8x32xf32>
    %126 = vector.broadcast %124 : vector<1x8x8x32xf32> to vector<2x8x8x32xf32>
    %127 = arith.mulf %125, %126 : vector<2x8x8x32xf32>
    %cst_46 = arith.constant dense<0.000000e+00> : vector<2x8x8xf32>
    %128 = vector.multi_reduction <add>, %127, %cst_46 [3] : vector<2x8x8x32xf32> to vector<2x8x8xf32>
    %129 = arith.addf %122, %128 : vector<2x8x8xf32>
    %130 = arith.addf %129, %39 : vector<2x8x8xf32>
    %cst_47 = arith.constant dense<0xFF800000> : vector<2x8xf32>
    %131 = vector.multi_reduction <maximumf>, %130, %cst_47 [2] : vector<2x8x8xf32> to vector<2x8xf32>
    %132 = vector.shape_cast %131 : vector<2x8xf32> to vector<2x8x1xf32>
    %133 = vector.broadcast %132 : vector<2x8x1xf32> to vector<2x8x8xf32>
    %134 = arith.subf %130, %133 : vector<2x8x8xf32>
    %135 = math.exp %134 : vector<2x8x8xf32>
    %cst_48 = arith.constant dense<0.000000e+00> : vector<2x8xf32>
    %136 = vector.multi_reduction <add>, %135, %cst_48 [2] : vector<2x8x8xf32> to vector<2x8xf32>
    %137 = vector.shape_cast %136 : vector<2x8xf32> to vector<2x8x1xf32>
    %138 = tpu.reciprocal %137 {approx = true} : vector<2x8x1xf32> -> vector<2x8x1xf32>
    %139 = vector.broadcast %138 : vector<2x8x1xf32> to vector<2x8x8xf32>
    %140 = arith.mulf %135, %139 : vector<2x8x8xf32>
    "tpu.trace_start"() <{level = 10 : i32, message = "bqk,bkd->bqd"}> : () -> ()
    %cst_49 = arith.constant dense<0.000000e+00> : vector<2x8x32xf32>
    %141 = tpu.matmul %140, %121, %cst_49 {dimension_numbers = #tpu.dot_dimension_numbers<[2], [1], [1], [2], [0, 0, 0, 1, 1, 2], [0], [0]>} : vector<2x8x8xf32>, vector<2x8x32xf32>, vector<2x8x32xf32> -> vector<2x8x32xf32>
    "tpu.trace_stop"() : () -> ()
    %142 = tpu.concatenate %66, %91, %116, %141 in 2 : vector<2x8x32xf32>, vector<2x8x32xf32>, vector<2x8x32xf32>, vector<2x8x32xf32> -> vector<2x8x128xf32>
    %143 = vector.shape_cast %142 : vector<2x8x128xf32> to vector<16x128xf32>
    %c0_50 = arith.constant 0 : index
    %c0_51 = arith.constant 0 : index
    %c0_52 = arith.constant 0 : index
    %144 = vector.load %arg12[%c0_50, %c0_51, %c0_52] : memref<1x128x128xf32, #tpu.memory_space<vmem>>, vector<1x128x128xf32>
    %145 = vector.shape_cast %144 : vector<1x128x128xf32> to vector<128x128xf32>
    %cst_53 = arith.constant dense<0.000000e+00> : vector<16x128xf32>
    %146 = tpu.matmul %143, %145, %cst_53 {dimension_numbers = #tpu.dot_dimension_numbers<[1], [0], [0], [1], [0, 0, 1, 1], [], []>} : vector<16x128xf32>, vector<128x128xf32>, vector<16x128xf32> -> vector<16x128xf32>
    %c0_54 = arith.constant 0 : index
    %c0_55 = arith.constant 0 : index
    %c0_56 = arith.constant 0 : index
    %147 = vector.load %arg13[%c0_54, %c0_55, %c0_56] : memref<1x1x128xf32, #tpu.memory_space<vmem>>, vector<1x1x128xf32>
    %148 = vector.shape_cast %147 : vector<1x1x128xf32> to vector<1x128xf32>
    %149 = vector.broadcast %148 : vector<1x128xf32> to vector<16x128xf32>
    %150 = arith.addf %146, %149 : vector<16x128xf32>
    %151 = arith.addf %3, %150 : vector<16x128xf32>
    %c0_57 = arith.constant 0 : index
    %c1 = arith.constant 1 : index
    %c0_58 = arith.constant 0 : index
    %152 = vector.load %arg8[%c0_57, %c1, %c0_58] : memref<1x3x128xf32, #tpu.memory_space<vmem>>, vector<1x1x128xf32>
    %153 = vector.shape_cast %152 : vector<1x1x128xf32> to vector<1x128xf32>
    %c0_59 = arith.constant 0 : index
    %c1_60 = arith.constant 1 : index
    %c0_61 = arith.constant 0 : index
    %154 = vector.load %arg9[%c0_59, %c1_60, %c0_61] : memref<1x3x128xf32, #tpu.memory_space<vmem>>, vector<1x1x128xf32>
    %155 = vector.shape_cast %154 : vector<1x1x128xf32> to vector<1x128xf32>
    %cst_62 = arith.constant dense<0.000000e+00> : vector<16xf32>
    %156 = vector.multi_reduction <add>, %151, %cst_62 [1] : vector<16x128xf32> to vector<16xf32>
    %157 = vector.shape_cast %156 : vector<16xf32> to vector<16x1xf32>
    %cst_63 = arith.constant 1.280000e+02 : f32
    %158 = vector.broadcast %cst_63 : f32 to vector<16x1xf32>
    %159 = arith.divf %157, %158 : vector<16x1xf32>
    %160 = vector.broadcast %159 : vector<16x1xf32> to vector<16x128xf32>
    %161 = arith.subf %151, %160 : vector<16x128xf32>
    %162 = arith.mulf %161, %161 : vector<16x128xf32>
    %cst_64 = arith.constant dense<0.000000e+00> : vector<16xf32>
    %163 = vector.multi_reduction <add>, %162, %cst_64 [1] : vector<16x128xf32> to vector<16xf32>
    %164 = vector.shape_cast %163 : vector<16xf32> to vector<16x1xf32>
    %cst_65 = arith.constant 1.280000e+02 : f32
    %165 = vector.broadcast %cst_65 : f32 to vector<16x1xf32>
    %166 = arith.divf %164, %165 : vector<16x1xf32>
    %cst_66 = arith.constant 9.99999974E-6 : f32
    %167 = vector.broadcast %cst_66 : f32 to vector<16x1xf32>
    %168 = arith.addf %166, %167 : vector<16x1xf32>
    %169 = math.rsqrt %168 : vector<16x1xf32>
    %170 = vector.broadcast %169 : vector<16x1xf32> to vector<16x128xf32>
    %171 = arith.mulf %161, %170 : vector<16x128xf32>
    %172 = vector.broadcast %153 : vector<1x128xf32> to vector<16x128xf32>
    %173 = arith.mulf %171, %172 : vector<16x128xf32>
    %174 = vector.broadcast %155 : vector<1x128xf32> to vector<16x128xf32>
    %175 = arith.addf %173, %174 : vector<16x128xf32>
    %c0_67 = arith.constant 0 : index
    %c0_68 = arith.constant 0 : index
    %c0_69 = arith.constant 0 : index
    %176 = vector.load %arg15[%c0_67, %c0_68, %c0_69] : memref<1x128x128xf32, #tpu.memory_space<vmem>>, vector<1x128x128xf32>
    %177 = vector.shape_cast %176 : vector<1x128x128xf32> to vector<128x128xf32>
    %cst_70 = arith.constant dense<0.000000e+00> : vector<16x128xf32>
    %178 = tpu.matmul %175, %177, %cst_70 {dimension_numbers = #tpu.dot_dimension_numbers<[1], [0], [0], [1], [0, 0, 1, 1], [], []>} : vector<16x128xf32>, vector<128x128xf32>, vector<16x128xf32> -> vector<16x128xf32>
    %c0_71 = arith.constant 0 : index
    %c0_72 = arith.constant 0 : index
    %c0_73 = arith.constant 0 : index
    %179 = vector.load %arg16[%c0_71, %c0_72, %c0_73] : memref<1x1x128xf32, #tpu.memory_space<vmem>>, vector<1x1x128xf32>
    %180 = vector.shape_cast %179 : vector<1x1x128xf32> to vector<1x128xf32>
    %181 = vector.broadcast %180 : vector<1x128xf32> to vector<16x128xf32>
    %182 = arith.addf %178, %181 : vector<16x128xf32>
    %183 = vector.shape_cast %182 : vector<16x128xf32> to vector<2x8x128xf32>
    %c0_74 = arith.constant 0 : index
    %c0_75 = arith.constant 0 : index
    %c0_76 = arith.constant 0 : index
    %184 = vector.load %arg2[%c0_74, %c0_75, %c0_76] : memref<2x8x128xf32, #tpu.memory_space<vmem>>, vector<2x8x128xf32>
    %185 = vector.shape_cast %184 : vector<2x8x128xf32> to vector<16x128xf32>
    %c0_77 = arith.constant 0 : index
    %c0_78 = arith.constant 0 : index
    %c0_79 = arith.constant 0 : index
    %186 = vector.load %arg17[%c0_77, %c0_78, %c0_79] : memref<1x128x256xf32, #tpu.memory_space<vmem>>, vector<1x128x256xf32>
    %187 = vector.shape_cast %186 : vector<1x128x256xf32> to vector<128x256xf32>
    %cst_80 = arith.constant dense<0.000000e+00> : vector<16x256xf32>
    %188 = tpu.matmul %185, %187, %cst_80 {dimension_numbers = #tpu.dot_dimension_numbers<[1], [0], [0], [1], [0, 0, 1, 1], [], []>} : vector<16x128xf32>, vector<128x256xf32>, vector<16x256xf32> -> vector<16x256xf32>
    %c0_81 = arith.constant 0 : index
    %c0_82 = arith.constant 0 : index
    %c0_83 = arith.constant 0 : index
    %189 = vector.load %arg18[%c0_81, %c0_82, %c0_83] : memref<1x1x256xf32, #tpu.memory_space<vmem>>, vector<1x1x256xf32>
    %190 = vector.shape_cast %189 : vector<1x1x256xf32> to vector<1x256xf32>
    %191 = vector.broadcast %190 : vector<1x256xf32> to vector<16x256xf32>
    %192 = arith.addf %188, %191 : vector<16x256xf32>
    %193 = vector.shape_cast %192 : vector<16x256xf32> to vector<2x8x256xf32>
    %194 = vector.extract_strided_slice %193 {offsets = [0, 0, 0], sizes = [2, 8, 128], strides = [1, 1, 1]} : vector<2x8x256xf32> to vector<2x8x128xf32>
    %195 = vector.extract_strided_slice %193 {offsets = [0, 0, 128], sizes = [2, 8, 128], strides = [1, 1, 1]} : vector<2x8x256xf32> to vector<2x8x128xf32>
    %c0_84 = arith.constant 0 : index
    %c0_85 = arith.constant 0 : index
    %c0_86 = arith.constant 0 : index
    %196 = vector.load %arg4[%c0_84, %c0_85, %c0_86] : memref<2x8x8xf32, #tpu.memory_space<vmem>>, vector<2x8x8xf32>
    %197 = vector.extract_strided_slice %183 {offsets = [0, 0, 0], sizes = [2, 8, 32], strides = [1, 1, 1]} : vector<2x8x128xf32> to vector<2x8x32xf32>
    %cst_87 = arith.constant 0.176776692 : f32
    %198 = vector.broadcast %cst_87 : f32 to vector<2x8x32xf32>
    %199 = arith.mulf %197, %198 : vector<2x8x32xf32>
    %200 = vector.extract_strided_slice %194 {offsets = [0, 0, 0], sizes = [2, 8, 32], strides = [1, 1, 1]} : vector<2x8x128xf32> to vector<2x8x32xf32>
    %201 = vector.extract_strided_slice %195 {offsets = [0, 0, 0], sizes = [2, 8, 32], strides = [1, 1, 1]} : vector<2x8x128xf32> to vector<2x8x32xf32>
    "tpu.trace_start"() <{level = 10 : i32, message = "bqd,bkd->bqk"}> : () -> ()
    %cst_88 = arith.constant dense<0.000000e+00> : vector<2x8x8xf32>
    %202 = tpu.matmul %199, %200, %cst_88 {dimension_numbers = #tpu.dot_dimension_numbers<[2], [2], [1], [1], [0, 0, 0, 1, 1, 1], [0], [0]>} : vector<2x8x32xf32>, vector<2x8x32xf32>, vector<2x8x8xf32> -> vector<2x8x8xf32>
    "tpu.trace_stop"() : () -> ()
    %203 = arith.addf %202, %196 : vector<2x8x8xf32>
    %cst_89 = arith.constant dense<0xFF800000> : vector<2x8xf32>
    %204 = vector.multi_reduction <maximumf>, %203, %cst_89 [2] : vector<2x8x8xf32> to vector<2x8xf32>
    %205 = vector.shape_cast %204 : vector<2x8xf32> to vector<2x8x1xf32>
    %206 = vector.broadcast %205 : vector<2x8x1xf32> to vector<2x8x8xf32>
    %207 = arith.subf %203, %206 : vector<2x8x8xf32>
    %208 = math.exp %207 : vector<2x8x8xf32>
    %cst_90 = arith.constant dense<0.000000e+00> : vector<2x8xf32>
    %209 = vector.multi_reduction <add>, %208, %cst_90 [2] : vector<2x8x8xf32> to vector<2x8xf32>
    %210 = vector.shape_cast %209 : vector<2x8xf32> to vector<2x8x1xf32>
    %211 = tpu.reciprocal %210 {approx = true} : vector<2x8x1xf32> -> vector<2x8x1xf32>
    %212 = vector.broadcast %211 : vector<2x8x1xf32> to vector<2x8x8xf32>
    %213 = arith.mulf %208, %212 : vector<2x8x8xf32>
    "tpu.trace_start"() <{level = 10 : i32, message = "bqk,bkd->bqd"}> : () -> ()
    %cst_91 = arith.constant dense<0.000000e+00> : vector<2x8x32xf32>
    %214 = tpu.matmul %213, %201, %cst_91 {dimension_numbers = #tpu.dot_dimension_numbers<[2], [1], [1], [2], [0, 0, 0, 1, 1, 2], [0], [0]>} : vector<2x8x8xf32>, vector<2x8x32xf32>, vector<2x8x32xf32> -> vector<2x8x32xf32>
    "tpu.trace_stop"() : () -> ()
    %215 = vector.extract_strided_slice %183 {offsets = [0, 0, 32], sizes = [2, 8, 32], strides = [1, 1, 1]} : vector<2x8x128xf32> to vector<2x8x32xf32>
    %cst_92 = arith.constant 0.176776692 : f32
    %216 = vector.broadcast %cst_92 : f32 to vector<2x8x32xf32>
    %217 = arith.mulf %215, %216 : vector<2x8x32xf32>
    %218 = vector.extract_strided_slice %194 {offsets = [0, 0, 32], sizes = [2, 8, 32], strides = [1, 1, 1]} : vector<2x8x128xf32> to vector<2x8x32xf32>
    %219 = vector.extract_strided_slice %195 {offsets = [0, 0, 32], sizes = [2, 8, 32], strides = [1, 1, 1]} : vector<2x8x128xf32> to vector<2x8x32xf32>
    "tpu.trace_start"() <{level = 10 : i32, message = "bqd,bkd->bqk"}> : () -> ()
    %cst_93 = arith.constant dense<0.000000e+00> : vector<2x8x8xf32>
    %220 = tpu.matmul %217, %218, %cst_93 {dimension_numbers = #tpu.dot_dimension_numbers<[2], [2], [1], [1], [0, 0, 0, 1, 1, 1], [0], [0]>} : vector<2x8x32xf32>, vector<2x8x32xf32>, vector<2x8x8xf32> -> vector<2x8x8xf32>
    "tpu.trace_stop"() : () -> ()
    %221 = arith.addf %220, %196 : vector<2x8x8xf32>
    %cst_94 = arith.constant dense<0xFF800000> : vector<2x8xf32>
    %222 = vector.multi_reduction <maximumf>, %221, %cst_94 [2] : vector<2x8x8xf32> to vector<2x8xf32>
    %223 = vector.shape_cast %222 : vector<2x8xf32> to vector<2x8x1xf32>
    %224 = vector.broadcast %223 : vector<2x8x1xf32> to vector<2x8x8xf32>
    %225 = arith.subf %221, %224 : vector<2x8x8xf32>
    %226 = math.exp %225 : vector<2x8x8xf32>
    %cst_95 = arith.constant dense<0.000000e+00> : vector<2x8xf32>
    %227 = vector.multi_reduction <add>, %226, %cst_95 [2] : vector<2x8x8xf32> to vector<2x8xf32>
    %228 = vector.shape_cast %227 : vector<2x8xf32> to vector<2x8x1xf32>
    %229 = tpu.reciprocal %228 {approx = true} : vector<2x8x1xf32> -> vector<2x8x1xf32>
    %230 = vector.broadcast %229 : vector<2x8x1xf32> to vector<2x8x8xf32>
    %231 = arith.mulf %226, %230 : vector<2x8x8xf32>
    "tpu.trace_start"() <{level = 10 : i32, message = "bqk,bkd->bqd"}> : () -> ()
    %cst_96 = arith.constant dense<0.000000e+00> : vector<2x8x32xf32>
    %232 = tpu.matmul %231, %219, %cst_96 {dimension_numbers = #tpu.dot_dimension_numbers<[2], [1], [1], [2], [0, 0, 0, 1, 1, 2], [0], [0]>} : vector<2x8x8xf32>, vector<2x8x32xf32>, vector<2x8x32xf32> -> vector<2x8x32xf32>
    "tpu.trace_stop"() : () -> ()
    %233 = vector.extract_strided_slice %183 {offsets = [0, 0, 64], sizes = [2, 8, 32], strides = [1, 1, 1]} : vector<2x8x128xf32> to vector<2x8x32xf32>
    %cst_97 = arith.constant 0.176776692 : f32
    %234 = vector.broadcast %cst_97 : f32 to vector<2x8x32xf32>
    %235 = arith.mulf %233, %234 : vector<2x8x32xf32>
    %236 = vector.extract_strided_slice %194 {offsets = [0, 0, 64], sizes = [2, 8, 32], strides = [1, 1, 1]} : vector<2x8x128xf32> to vector<2x8x32xf32>
    %237 = vector.extract_strided_slice %195 {offsets = [0, 0, 64], sizes = [2, 8, 32], strides = [1, 1, 1]} : vector<2x8x128xf32> to vector<2x8x32xf32>
    "tpu.trace_start"() <{level = 10 : i32, message = "bqd,bkd->bqk"}> : () -> ()
    %cst_98 = arith.constant dense<0.000000e+00> : vector<2x8x8xf32>
    %238 = tpu.matmul %235, %236, %cst_98 {dimension_numbers = #tpu.dot_dimension_numbers<[2], [2], [1], [1], [0, 0, 0, 1, 1, 1], [0], [0]>} : vector<2x8x32xf32>, vector<2x8x32xf32>, vector<2x8x8xf32> -> vector<2x8x8xf32>
    "tpu.trace_stop"() : () -> ()
    %239 = arith.addf %238, %196 : vector<2x8x8xf32>
    %cst_99 = arith.constant dense<0xFF800000> : vector<2x8xf32>
    %240 = vector.multi_reduction <maximumf>, %239, %cst_99 [2] : vector<2x8x8xf32> to vector<2x8xf32>
    %241 = vector.shape_cast %240 : vector<2x8xf32> to vector<2x8x1xf32>
    %242 = vector.broadcast %241 : vector<2x8x1xf32> to vector<2x8x8xf32>
    %243 = arith.subf %239, %242 : vector<2x8x8xf32>
    %244 = math.exp %243 : vector<2x8x8xf32>
    %cst_100 = arith.constant dense<0.000000e+00> : vector<2x8xf32>
    %245 = vector.multi_reduction <add>, %244, %cst_100 [2] : vector<2x8x8xf32> to vector<2x8xf32>
    %246 = vector.shape_cast %245 : vector<2x8xf32> to vector<2x8x1xf32>
    %247 = tpu.reciprocal %246 {approx = true} : vector<2x8x1xf32> -> vector<2x8x1xf32>
    %248 = vector.broadcast %247 : vector<2x8x1xf32> to vector<2x8x8xf32>
    %249 = arith.mulf %244, %248 : vector<2x8x8xf32>
    "tpu.trace_start"() <{level = 10 : i32, message = "bqk,bkd->bqd"}> : () -> ()
    %cst_101 = arith.constant dense<0.000000e+00> : vector<2x8x32xf32>
    %250 = tpu.matmul %249, %237, %cst_101 {dimension_numbers = #tpu.dot_dimension_numbers<[2], [1], [1], [2], [0, 0, 0, 1, 1, 2], [0], [0]>} : vector<2x8x8xf32>, vector<2x8x32xf32>, vector<2x8x32xf32> -> vector<2x8x32xf32>
    "tpu.trace_stop"() : () -> ()
    %251 = vector.extract_strided_slice %183 {offsets = [0, 0, 96], sizes = [2, 8, 32], strides = [1, 1, 1]} : vector<2x8x128xf32> to vector<2x8x32xf32>
    %cst_102 = arith.constant 0.176776692 : f32
    %252 = vector.broadcast %cst_102 : f32 to vector<2x8x32xf32>
    %253 = arith.mulf %251, %252 : vector<2x8x32xf32>
    %254 = vector.extract_strided_slice %194 {offsets = [0, 0, 96], sizes = [2, 8, 32], strides = [1, 1, 1]} : vector<2x8x128xf32> to vector<2x8x32xf32>
    %255 = vector.extract_strided_slice %195 {offsets = [0, 0, 96], sizes = [2, 8, 32], strides = [1, 1, 1]} : vector<2x8x128xf32> to vector<2x8x32xf32>
    "tpu.trace_start"() <{level = 10 : i32, message = "bqd,bkd->bqk"}> : () -> ()
    %cst_103 = arith.constant dense<0.000000e+00> : vector<2x8x8xf32>
    %256 = tpu.matmul %253, %254, %cst_103 {dimension_numbers = #tpu.dot_dimension_numbers<[2], [2], [1], [1], [0, 0, 0, 1, 1, 1], [0], [0]>} : vector<2x8x32xf32>, vector<2x8x32xf32>, vector<2x8x8xf32> -> vector<2x8x8xf32>
    "tpu.trace_stop"() : () -> ()
    %257 = arith.addf %256, %196 : vector<2x8x8xf32>
    %cst_104 = arith.constant dense<0xFF800000> : vector<2x8xf32>
    %258 = vector.multi_reduction <maximumf>, %257, %cst_104 [2] : vector<2x8x8xf32> to vector<2x8xf32>
    %259 = vector.shape_cast %258 : vector<2x8xf32> to vector<2x8x1xf32>
    %260 = vector.broadcast %259 : vector<2x8x1xf32> to vector<2x8x8xf32>
    %261 = arith.subf %257, %260 : vector<2x8x8xf32>
    %262 = math.exp %261 : vector<2x8x8xf32>
    %cst_105 = arith.constant dense<0.000000e+00> : vector<2x8xf32>
    %263 = vector.multi_reduction <add>, %262, %cst_105 [2] : vector<2x8x8xf32> to vector<2x8xf32>
    %264 = vector.shape_cast %263 : vector<2x8xf32> to vector<2x8x1xf32>
    %265 = tpu.reciprocal %264 {approx = true} : vector<2x8x1xf32> -> vector<2x8x1xf32>
    %266 = vector.broadcast %265 : vector<2x8x1xf32> to vector<2x8x8xf32>
    %267 = arith.mulf %262, %266 : vector<2x8x8xf32>
    "tpu.trace_start"() <{level = 10 : i32, message = "bqk,bkd->bqd"}> : () -> ()
    %cst_106 = arith.constant dense<0.000000e+00> : vector<2x8x32xf32>
    %268 = tpu.matmul %267, %255, %cst_106 {dimension_numbers = #tpu.dot_dimension_numbers<[2], [1], [1], [2], [0, 0, 0, 1, 1, 2], [0], [0]>} : vector<2x8x8xf32>, vector<2x8x32xf32>, vector<2x8x32xf32> -> vector<2x8x32xf32>
    "tpu.trace_stop"() : () -> ()
    %269 = tpu.concatenate %214, %232, %250, %268 in 2 : vector<2x8x32xf32>, vector<2x8x32xf32>, vector<2x8x32xf32>, vector<2x8x32xf32> -> vector<2x8x128xf32>
    %270 = vector.shape_cast %269 : vector<2x8x128xf32> to vector<16x128xf32>
    %c0_107 = arith.constant 0 : index
    %c0_108 = arith.constant 0 : index
    %c0_109 = arith.constant 0 : index
    %271 = vector.load %arg19[%c0_107, %c0_108, %c0_109] : memref<1x128x128xf32, #tpu.memory_space<vmem>>, vector<1x128x128xf32>
    %272 = vector.shape_cast %271 : vector<1x128x128xf32> to vector<128x128xf32>
    %cst_110 = arith.constant dense<0.000000e+00> : vector<16x128xf32>
    %273 = tpu.matmul %270, %272, %cst_110 {dimension_numbers = #tpu.dot_dimension_numbers<[1], [0], [0], [1], [0, 0, 1, 1], [], []>} : vector<16x128xf32>, vector<128x128xf32>, vector<16x128xf32> -> vector<16x128xf32>
    %c0_111 = arith.constant 0 : index
    %c0_112 = arith.constant 0 : index
    %c0_113 = arith.constant 0 : index
    %274 = vector.load %arg20[%c0_111, %c0_112, %c0_113] : memref<1x1x128xf32, #tpu.memory_space<vmem>>, vector<1x1x128xf32>
    %275 = vector.shape_cast %274 : vector<1x1x128xf32> to vector<1x128xf32>
    %276 = vector.broadcast %275 : vector<1x128xf32> to vector<16x128xf32>
    %277 = arith.addf %273, %276 : vector<16x128xf32>
    %278 = arith.addf %151, %277 : vector<16x128xf32>
    %c0_114 = arith.constant 0 : index
    %c2 = arith.constant 2 : index
    %c0_115 = arith.constant 0 : index
    %279 = vector.load %arg8[%c0_114, %c2, %c0_115] : memref<1x3x128xf32, #tpu.memory_space<vmem>>, vector<1x1x128xf32>
    %280 = vector.shape_cast %279 : vector<1x1x128xf32> to vector<1x128xf32>
    %c0_116 = arith.constant 0 : index
    %c2_117 = arith.constant 2 : index
    %c0_118 = arith.constant 0 : index
    %281 = vector.load %arg9[%c0_116, %c2_117, %c0_118] : memref<1x3x128xf32, #tpu.memory_space<vmem>>, vector<1x1x128xf32>
    %282 = vector.shape_cast %281 : vector<1x1x128xf32> to vector<1x128xf32>
    %cst_119 = arith.constant dense<0.000000e+00> : vector<16xf32>
    %283 = vector.multi_reduction <add>, %278, %cst_119 [1] : vector<16x128xf32> to vector<16xf32>
    %284 = vector.shape_cast %283 : vector<16xf32> to vector<16x1xf32>
    %cst_120 = arith.constant 1.280000e+02 : f32
    %285 = vector.broadcast %cst_120 : f32 to vector<16x1xf32>
    %286 = arith.divf %284, %285 : vector<16x1xf32>
    %287 = vector.broadcast %286 : vector<16x1xf32> to vector<16x128xf32>
    %288 = arith.subf %278, %287 : vector<16x128xf32>
    %289 = arith.mulf %288, %288 : vector<16x128xf32>
    %cst_121 = arith.constant dense<0.000000e+00> : vector<16xf32>
    %290 = vector.multi_reduction <add>, %289, %cst_121 [1] : vector<16x128xf32> to vector<16xf32>
    %291 = vector.shape_cast %290 : vector<16xf32> to vector<16x1xf32>
    %cst_122 = arith.constant 1.280000e+02 : f32
    %292 = vector.broadcast %cst_122 : f32 to vector<16x1xf32>
    %293 = arith.divf %291, %292 : vector<16x1xf32>
    %cst_123 = arith.constant 9.99999974E-6 : f32
    %294 = vector.broadcast %cst_123 : f32 to vector<16x1xf32>
    %295 = arith.addf %293, %294 : vector<16x1xf32>
    %296 = math.rsqrt %295 : vector<16x1xf32>
    %297 = vector.broadcast %296 : vector<16x1xf32> to vector<16x128xf32>
    %298 = arith.mulf %288, %297 : vector<16x128xf32>
    %299 = vector.broadcast %280 : vector<1x128xf32> to vector<16x128xf32>
    %300 = arith.mulf %298, %299 : vector<16x128xf32>
    %301 = vector.broadcast %282 : vector<1x128xf32> to vector<16x128xf32>
    %302 = arith.addf %300, %301 : vector<16x128xf32>
    %c0_124 = arith.constant 0 : index
    %c0_125 = arith.constant 0 : index
    %c0_126 = arith.constant 0 : index
    %303 = vector.load %arg21[%c0_124, %c0_125, %c0_126] : memref<1x128x512xf32, #tpu.memory_space<vmem>>, vector<1x128x512xf32>
    %304 = vector.shape_cast %303 : vector<1x128x512xf32> to vector<128x512xf32>
    %cst_127 = arith.constant dense<0.000000e+00> : vector<16x512xf32>
    %305 = tpu.matmul %302, %304, %cst_127 {dimension_numbers = #tpu.dot_dimension_numbers<[1], [0], [0], [1], [0, 0, 1, 1], [], []>} : vector<16x128xf32>, vector<128x512xf32>, vector<16x512xf32> -> vector<16x512xf32>
    %c0_128 = arith.constant 0 : index
    %c0_129 = arith.constant 0 : index
    %c0_130 = arith.constant 0 : index
    %306 = vector.load %arg22[%c0_128, %c0_129, %c0_130] : memref<1x1x512xf32, #tpu.memory_space<vmem>>, vector<1x1x512xf32>
    %307 = vector.shape_cast %306 : vector<1x1x512xf32> to vector<1x512xf32>
    %308 = vector.broadcast %307 : vector<1x512xf32> to vector<16x512xf32>
    %309 = arith.addf %305, %308 : vector<16x512xf32>
    %cst_131 = arith.constant 0.000000e+00 : f32
    %310 = vector.broadcast %cst_131 : f32 to vector<16x512xf32>
    %311 = arith.maximumf %309, %310 : vector<16x512xf32>
    %c0_132 = arith.constant 0 : index
    %c0_133 = arith.constant 0 : index
    %c0_134 = arith.constant 0 : index
    %312 = vector.load %arg23[%c0_132, %c0_133, %c0_134] : memref<1x512x128xf32, #tpu.memory_space<vmem>>, vector<1x512x128xf32>
    %313 = vector.shape_cast %312 : vector<1x512x128xf32> to vector<512x128xf32>
    %cst_135 = arith.constant dense<0.000000e+00> : vector<16x128xf32>
    %314 = tpu.matmul %311, %313, %cst_135 {dimension_numbers = #tpu.dot_dimension_numbers<[1], [0], [0], [1], [0, 0, 1, 1], [], []>} : vector<16x512xf32>, vector<512x128xf32>, vector<16x128xf32> -> vector<16x128xf32>
    %c0_136 = arith.constant 0 : index
    %c0_137 = arith.constant 0 : index
    %c0_138 = arith.constant 0 : index
    %315 = vector.load %arg24[%c0_136, %c0_137, %c0_138] : memref<1x1x128xf32, #tpu.memory_space<vmem>>, vector<1x1x128xf32>
    %316 = vector.shape_cast %315 : vector<1x1x128xf32> to vector<1x128xf32>
    %317 = vector.broadcast %316 : vector<1x128xf32> to vector<16x128xf32>
    %318 = arith.addf %314, %317 : vector<16x128xf32>
    %319 = arith.addf %278, %318 : vector<16x128xf32>
    %c0_139 = arith.constant 0 : index
    %c0_140 = arith.constant 0 : index
    %320 = vector.load %arg26[%c0_139, %c0_140] : memref<16x128xf32, #tpu.memory_space<vmem>>, vector<16x128xf32>
    tpu.vector_store %arg26[%c0_139, %c0_140], %319 {strides = array<i32>} : memref<16x128xf32, #tpu.memory_space<vmem>>, vector<16x128xf32>,
    %c1_i32 = arith.constant 1 : i32
    %321 = arith.cmpi eq, %arg0, %c1_i32 : i32
    %322 = arith.extui %321 : i1 to i32
    %c0_i32_141 = arith.constant 0 : i32
    %323 = arith.cmpi ne, %322, %c0_i32_141 : i32
    scf.if %323 {
      %c0_142 = arith.constant 0 : index
      %c0_143 = arith.constant 0 : index
      %324 = vector.load %arg5[%c0_142, %c0_143] : memref<2x128xf32, #tpu.memory_space<vmem>>, vector<1x128xf32>
      %c1_144 = arith.constant 1 : index
      %c0_145 = arith.constant 0 : index
      %325 = vector.load %arg5[%c1_144, %c0_145] : memref<2x128xf32, #tpu.memory_space<vmem>>, vector<1x128xf32>
      %cst_146 = arith.constant dense<0.000000e+00> : vector<16xf32>
      %326 = vector.multi_reduction <add>, %319, %cst_146 [1] : vector<16x128xf32> to vector<16xf32>
      %327 = vector.shape_cast %326 : vector<16xf32> to vector<16x1xf32>
      %cst_147 = arith.constant 1.280000e+02 : f32
      %328 = vector.broadcast %cst_147 : f32 to vector<16x1xf32>
      %329 = arith.divf %327, %328 : vector<16x1xf32>
      %330 = vector.broadcast %329 : vector<16x1xf32> to vector<16x128xf32>
      %331 = arith.subf %319, %330 : vector<16x128xf32>
      %332 = arith.mulf %331, %331 : vector<16x128xf32>
      %cst_148 = arith.constant dense<0.000000e+00> : vector<16xf32>
      %333 = vector.multi_reduction <add>, %332, %cst_148 [1] : vector<16x128xf32> to vector<16xf32>
      %334 = vector.shape_cast %333 : vector<16xf32> to vector<16x1xf32>
      %cst_149 = arith.constant 1.280000e+02 : f32
      %335 = vector.broadcast %cst_149 : f32 to vector<16x1xf32>
      %336 = arith.divf %334, %335 : vector<16x1xf32>
      %cst_150 = arith.constant 9.99999974E-6 : f32
      %337 = vector.broadcast %cst_150 : f32 to vector<16x1xf32>
      %338 = arith.addf %336, %337 : vector<16x1xf32>
      %339 = math.rsqrt %338 : vector<16x1xf32>
      %340 = vector.broadcast %339 : vector<16x1xf32> to vector<16x128xf32>
      %341 = arith.mulf %331, %340 : vector<16x128xf32>
      %342 = vector.broadcast %324 : vector<1x128xf32> to vector<16x128xf32>
      %343 = arith.mulf %341, %342 : vector<16x128xf32>
      %344 = vector.broadcast %325 : vector<1x128xf32> to vector<16x128xf32>
      %345 = arith.addf %343, %344 : vector<16x128xf32>
      %c0_151 = arith.constant 0 : index
      %c0_152 = arith.constant 0 : index
      %346 = vector.load %arg6[%c0_151, %c0_152] : memref<128x128xf32, #tpu.memory_space<vmem>>, vector<128x128xf32>
      %cst_153 = arith.constant dense<0.000000e+00> : vector<16x128xf32>
      %347 = tpu.matmul %345, %346, %cst_153 {dimension_numbers = #tpu.dot_dimension_numbers<[1], [0], [0], [1], [0, 0, 1, 1], [], []>} : vector<16x128xf32>, vector<128x128xf32>, vector<16x128xf32> -> vector<16x128xf32>
      %c0_154 = arith.constant 0 : index
      %c0_155 = arith.constant 0 : index
      %348 = vector.load %arg7[%c0_154, %c0_155] : memref<1x128xf32, #tpu.memory_space<vmem>>, vector<1x128xf32>
      %349 = vector.broadcast %348 : vector<1x128xf32> to vector<16x128xf32>
      %350 = arith.addf %347, %349 : vector<16x128xf32>
      %c0_156 = arith.constant 0 : index
      %c0_157 = arith.constant 0 : index
      %351 = vector.load %arg25[%c0_156, %c0_157] : memref<16x128xf32, #tpu.memory_space<vmem>>, vector<16x128xf32>
      tpu.vector_store %arg25[%c0_156, %c0_157], %350 {strides = array<i32>} : memref<16x128xf32, #tpu.memory_space<vmem>>, vector<16x128xf32>,
    } else {
    }
    return
  }
  func.func @transform_0(%arg0: i32) -> (i32, i32) {
    %c0_i32 = arith.constant 0 : i32
    %c0_i32_0 = arith.constant 0 : i32
    %c0_i32_1 = arith.constant 0 : i32
    return %c0_i32, %c0_i32_0 : i32, i32
  }
  func.func @transform_1(%arg0: i32) -> (i32, i32, i32) {
    %c0_i32 = arith.constant 0 : i32
    %c0_i32_0 = arith.constant 0 : i32
    %c0_i32_1 = arith.constant 0 : i32
    %c0_i32_2 = arith.constant 0 : i32
    return %c0_i32, %c0_i32_0, %c0_i32_1 : i32, i32, i32
  }
  func.func @transform_2(%arg0: i32) -> (i32, i32, i32) {
    %c0_i32 = arith.constant 0 : i32
    %c0_i32_0 = arith.constant 0 : i32
    %c0_i32_1 = arith.constant 0 : i32
    %c0_i32_2 = arith.constant 0 : i32
    return %c0_i32, %c0_i32_0, %c0_i32_1 : i32, i32, i32
  }
  func.func @transform_3(%arg0: i32) -> (i32, i32, i32) {
    %c0_i32 = arith.constant 0 : i32
    %c0_i32_0 = arith.constant 0 : i32
    %c0_i32_1 = arith.constant 0 : i32
    %c0_i32_2 = arith.constant 0 : i32
    return %c0_i32, %c0_i32_0, %c0_i32_1 : i32, i32, i32
  }
  func.func @transform_4(%arg0: i32) -> (i32, i32) {
    %c0_i32 = arith.constant 0 : i32
    %c0_i32_0 = arith.constant 0 : i32
    %c0_i32_1 = arith.constant 0 : i32
    return %c0_i32, %c0_i32_0 : i32, i32
  }
  func.func @transform_5(%arg0: i32) -> (i32, i32) {
    %c0_i32 = arith.constant 0 : i32
    %c0_i32_0 = arith.constant 0 : i32
    %c0_i32_1 = arith.constant 0 : i32
    return %c0_i32, %c0_i32_0 : i32, i32
  }
  func.func @transform_6(%arg0: i32) -> (i32, i32) {
    %c0_i32 = arith.constant 0 : i32
    %c0_i32_0 = arith.constant 0 : i32
    %c0_i32_1 = arith.constant 0 : i32
    return %c0_i32, %c0_i32_0 : i32, i32
  }
  func.func @transform_7(%arg0: i32) -> (i32, i32, i32) {
    %c0_i32 = arith.constant 0 : i32
    %c0_i32_0 = arith.constant 0 : i32
    %c0_i32_1 = arith.constant 0 : i32
    return %arg0, %c0_i32, %c0_i32_0 : i32, i32, i32
  }
  func.func @transform_8(%arg0: i32) -> (i32, i32, i32) {
    %c0_i32 = arith.constant 0 : i32
    %c0_i32_0 = arith.constant 0 : i32
    %c0_i32_1 = arith.constant 0 : i32
    return %arg0, %c0_i32, %c0_i32_0 : i32, i32, i32
  }
  func.func @transform_9(%arg0: i32) -> (i32, i32, i32) {
    %c0_i32 = arith.constant 0 : i32
    %c0_i32_0 = arith.constant 0 : i32
    %c0_i32_1 = arith.constant 0 : i32
    return %arg0, %c0_i32, %c0_i32_0 : i32, i32, i32
  }
  func.func @transform_10(%arg0: i32) -> (i32, i32, i32) {
    %c0_i32 = arith.constant 0 : i32
    %c0_i32_0 = arith.constant 0 : i32
    %c0_i32_1 = arith.constant 0 : i32
    return %arg0, %c0_i32, %c0_i32_0 : i32, i32, i32
  }
  func.func @transform_11(%arg0: i32) -> (i32, i32, i32) {
    %c0_i32 = arith.constant 0 : i32
    %c0_i32_0 = arith.constant 0 : i32
    %c0_i32_1 = arith.constant 0 : i32
    return %arg0, %c0_i32, %c0_i32_0 : i32, i32, i32
  }
  func.func @transform_12(%arg0: i32) -> (i32, i32, i32) {
    %c0_i32 = arith.constant 0 : i32
    %c0_i32_0 = arith.constant 0 : i32
    %c0_i32_1 = arith.constant 0 : i32
    return %arg0, %c0_i32, %c0_i32_0 : i32, i32, i32
  }
  func.func @transform_13(%arg0: i32) -> (i32, i32, i32, i32) {
    %c0_i32 = arith.constant 0 : i32
    %c0_i32_0 = arith.constant 0 : i32
    %c0_i32_1 = arith.constant 0 : i32
    %c0_i32_2 = arith.constant 0 : i32
    return %arg0, %c0_i32, %c0_i32_0, %c0_i32_1 : i32, i32, i32, i32
  }
  func.func @transform_14(%arg0: i32) -> (i32, i32, i32) {
    %c0_i32 = arith.constant 0 : i32
    %c0_i32_0 = arith.constant 0 : i32
    %c0_i32_1 = arith.constant 0 : i32
    return %arg0, %c0_i32, %c0_i32_0 : i32, i32, i32
  }
  func.func @transform_15(%arg0: i32) -> (i32, i32, i32) {
    %c0_i32 = arith.constant 0 : i32
    %c0_i32_0 = arith.constant 0 : i32
    %c0_i32_1 = arith.constant 0 : i32
    return %arg0, %c0_i32, %c0_i32_0 : i32, i32, i32
  }
  func.func @transform_16(%arg0: i32) -> (i32, i32, i32) {
    %c0_i32 = arith.constant 0 : i32
    %c0_i32_0 = arith.constant 0 : i32
    %c0_i32_1 = arith.constant 0 : i32
    return %arg0, %c0_i32, %c0_i32_0 : i32, i32, i32
  }
  func.func @transform_17(%arg0: i32) -> (i32, i32, i32) {
    %c0_i32 = arith.constant 0 : i32
    %c0_i32_0 = arith.constant 0 : i32
    %c0_i32_1 = arith.constant 0 : i32
    return %arg0, %c0_i32, %c0_i32_0 : i32, i32, i32
  }
  func.func @transform_18(%arg0: i32) -> (i32, i32, i32) {
    %c0_i32 = arith.constant 0 : i32
    %c0_i32_0 = arith.constant 0 : i32
    %c0_i32_1 = arith.constant 0 : i32
    return %arg0, %c0_i32, %c0_i32_0 : i32, i32, i32
  }
  func.func @transform_19(%arg0: i32) -> (i32, i32, i32) {
    %c0_i32 = arith.constant 0 : i32
    %c0_i32_0 = arith.constant 0 : i32
    %c0_i32_1 = arith.constant 0 : i32
    return %arg0, %c0_i32, %c0_i32_0 : i32, i32, i32
  }
  func.func @transform_20(%arg0: i32) -> (i32, i32, i32) {
    %c0_i32 = arith.constant 0 : i32
    %c0_i32_0 = arith.constant 0 : i32
    %c0_i32_1 = arith.constant 0 : i32
    return %arg0, %c0_i32, %c0_i32_0 : i32, i32, i32
  }
  func.func @transform_21(%arg0: i32) -> (i32, i32, i32) {
    %c0_i32 = arith.constant 0 : i32
    %c0_i32_0 = arith.constant 0 : i32
    %c0_i32_1 = arith.constant 0 : i32
    return %arg0, %c0_i32, %c0_i32_0 : i32, i32, i32
  }
  func.func @transform_22(%arg0: i32) -> (i32, i32, i32) {
    %c0_i32 = arith.constant 0 : i32
    %c0_i32_0 = arith.constant 0 : i32
    %c0_i32_1 = arith.constant 0 : i32
    return %arg0, %c0_i32, %c0_i32_0 : i32, i32, i32
  }
  func.func @transform_23(%arg0: i32) -> (i32, i32, i32) {
    %c0_i32 = arith.constant 0 : i32
    %c0_i32_0 = arith.constant 0 : i32
    %c0_i32_1 = arith.constant 0 : i32
    return %arg0, %c0_i32, %c0_i32_0 : i32, i32, i32
  }
  func.func @transform_24(%arg0: i32) -> (i32, i32) {
    %c0_i32 = arith.constant 0 : i32
    %c0_i32_0 = arith.constant 0 : i32
    %c0_i32_1 = arith.constant 0 : i32
    return %c0_i32, %c0_i32_0 : i32, i32
  }
}

</mosaic_0001>

<bundles_post_ra>
// kernel: tpu_custom_call.1
= control target key start
LH: loop header
LB: loop body
LE: loop exit
PB: predicated region body
PF: predicated region fallthrough
CT: control target
= control target key end

     0   :  { %s10519_s0 = inlined_call_operand.vmem [shape: f32[16,128], index: 0, kind: input, shape index: {}]   ;;  %s10520_s1 = inlined_call_operand.hbm [shape: f32[2,8,128], index: 1, kind: input, shape index: {}]   ;;  %s10521_s2 = inlined_call_operand.vmem [shape: f32[2,8,8], index: 2, kind: input, shape index: {}]   ;;  %s10522_s3 = inlined_call_operand.hbm [shape: f32[2,8,8], index: 3, kind: input, shape index: {}]   ;;  %s10523_s4 = inlined_call_operand.hbm [shape: f32[2,128], index: 4, kind: input, shape index: {}]   ;;  %s10524_s5 = inlined_call_operand.hbm [shape: f32[128,128], index: 5, kind: input, shape index: {}]   ;;  %s10525_s6 = inlined_call_operand.hbm [shape: f32[1,128], index: 6, kind: input, shape index: {}]   ;;  %s10526_s7 = inlined_call_operand.vmem [shape: f32[2,3,128], index: 7, kind: input, shape index: {}]   ;;  %s10527_s8 = inlined_call_operand.vmem [shape: f32[2,3,128], index: 8, kind: input, shape index: {}]   ;;  %s10528_s9 = inlined_call_operand.hbm [shape: f32[2,128,384], index: 9, kind: input, shape index: {}]   ;;  %s10529_s10 = inlined_call_operand.vmem [shape: f32[2,1,384], index: 10, kind: input, shape index: {}]   ;;  %s10530_s11 = inlined_call_operand.hbm [shape: f32[2,128,128], index: 11, kind: input, shape index: {}]   ;;  %s10531_s12 = inlined_call_operand.vmem [shape: f32[2,1,128], index: 12, kind: input, shape index: {}]   ;;  %s10532_s13 = inlined_call_operand.hbm [shape: f32[2,8,8,32], index: 13, kind: input, shape index: {}]   ;;  %s10533_s14 = inlined_call_operand.hbm [shape: f32[2,128,128], index: 14, kind: input, shape index: {}]   ;;  %s10534_s15 = inlined_call_operand.vmem [shape: f32[2,1,128], index: 15, kind: input, shape index: {}]   ;;  %s10535_s16 = inlined_call_operand.hbm [shape: f32[2,128,256], index: 16, kind: input, shape index: {}]   ;;  %s10536_s17 = inlined_call_operand.vmem [shape: f32[2,1,256], index: 17, kind: input, shape index: {}]   ;;  %s10537_s18 = inlined_call_operand.hbm [shape: f32[2,128,128], index: 18, kind: input, shape index: {}]   ;;  %s10538_s19 = inlined_call_operand.vmem [shape: f32[2,1,128], index: 19, kind: input, shape index: {}]   ;;  %s10539_s20 = inlined_call_operand.hbm [shape: f32[2,128,512], index: 20, kind: input, shape index: {}]   ;;  %s10540_s21 = inlined_call_operand.vmem [shape: f32[2,1,512], index: 21, kind: input, shape index: {}]   ;;  %s10541_s22 = inlined_call_operand.hbm [shape: f32[2,512,128], index: 22, kind: input, shape index: {}]   ;;  %s10542_s23 = inlined_call_operand.vmem [shape: f32[2,1,128], index: 23, kind: input, shape index: {}]   ;;  %s10543_s24 = inlined_call_operand.hbm [shape: f32[16,128], index: 24, kind: output, shape index: {}]  }
   0x1   :  { %10590 = sst [smem:[#allocation44_spill]] %s10519_s0 }
   0x2   :  { %10591 = sst [smem:[#allocation45_spill]] %s10520_s1 }
   0x3   :  { %10592 = sst [smem:[#allocation46_spill]] %s10521_s2 }
   0x4   :  { %10593 = sst [smem:[#allocation47_spill]] %s10522_s3 }
   0x5   :  { %10594 = sst [smem:[#allocation48_spill]] %s10523_s4 }
   0x6   :  { %10595 = sst [smem:[#allocation49_spill]] %s10524_s5 }
   0x7   :  { %10596 = sst [smem:[#allocation50_spill]] %s10525_s6 }
   0x8   :  { %10597 = sst [smem:[#allocation51_spill]] %s10526_s7 }
   0x9   :  { %10598 = sst [smem:[#allocation52_spill]] %s10527_s8 }
   0xa   :  { %10599 = sst [smem:[#allocation53_spill]] %s10528_s9 }
   0xb   :  { %10600 = sst [smem:[#allocation54_spill]] %s10529_s10 }
   0xc   :  { %10601 = sst [smem:[#allocation55_spill]] %s10530_s11 }
   0xd   :  { %10602 = sst [smem:[#allocation56_spill]] %s10531_s12 }
   0xe   :  { %10603 = sst [smem:[#allocation57_spill]] %s10532_s13 }
   0xf   :  { %10604 = sst [smem:[#allocation58_spill]] %s10533_s14 }
  0x10   :  { %10605 = sst [smem:[#allocation59_spill]] %s10534_s15 }
  0x11   :  { %10606 = sst [smem:[#allocation60_spill]] %s10535_s16 }
  0x12   :  { %10607 = sst [smem:[#allocation61_spill]] %s10536_s17 }
  0x13   :  { %10608 = sst [smem:[#allocation62_spill]] %s10537_s18 }
  0x14   :  { %10609 = sst [smem:[#allocation63_spill]] %s10538_s19 }
  0x15   :  { %10610 = sst [smem:[#allocation64_spill]] %s10539_s20 }
  0x16   :  { %10611 = sst [smem:[#allocation65_spill]] %s10540_s21 }
  0x17   :  { %10612 = sst [smem:[#allocation66_spill]] %s10541_s22 }
  0x18   :  { %10613 = sst [smem:[#allocation67_spill]] %s10542_s23 }
  0x19   :  { %10614 = sst [smem:[#allocation68_spill]] %s10543_s24 }
  0x1a   :  { %29 = vsyncpa [#allocation4], 0 }
  0x1b   :  { %30 = vsyncpa [#allocation7], 0 }
  0x1c   :  { %31 = vsyncpa [#allocation10], 0 }
  0x1d   :  { %32 = vsyncpa [#allocation13], 0 }
  0x1e   :  { %34 = vsyncpa [#allocation13 + $0x1], 0 }
  0x1f   :  { %35 = vsyncpa [#allocation16], 0 }
  0x20   :  { %37 = vsyncpa [#allocation16 + $0x1], 0 }
  0x21   :  { %38 = vsyncpa [#allocation19], 0 }
  0x22   :  { %40 = vsyncpa [#allocation19 + $0x1], 0 }
  0x23   :  { %41 = vsyncpa [#allocation22], 0 }
  0x24   :  { %43 = vsyncpa [#allocation22 + $0x1], 0 }
  0x25   :  { %44 = vsyncpa [#allocation5], 0  ;;  %s8694_s5 = smov 0   ;;  %s8696_s26 = smov 0  }
  0x26   :  { %s8698_s27 = smov 0   ;;  %s8700_s28 = smov 0  }
  0x27 LB: > { %10615 = sst [smem:[#allocation33_spill]] %s8529_s26  ;;  %s8713_s6 = sadd.s32 4294967295, %s8537_s28   ;;  %s8537_s28 = sphi %s8700_s28, %s10694_s28   ;;  %s8533_s27 = sphi %s8698_s27, %s10697_s27   ;;  %s8529_s26 = sphi %s8696_s26, %s10696_s26   ;;  %s8525_s5 = sphi %s8694_s5, %s10695_s5  }
  0x28   : > { %10616 = sst [smem:[#allocation34_spill]] %s8533_s27  ;;  %p269_p0 = scmp.ne.s32.totalorder %s8529_s26, %s8525_s5 }
  0x29   : > { %10617 = sst [smem:[#allocation35_spill]] %s8713_s6  ;;  %p10552_p1 = scmp.eq.s32.totalorder %s8713_s6, 0 }
  0x2a   : > { %p6758_p2 = scmp.ge.s32.totalorder %s8537_s28, 1  ;;  %p665_p3 = scmp.lt.s32.totalorder %s8537_s28, 3 }
  0x2b   : > { %p8722_p5 = por %p10552_p1, %p269_p0  ;;  %s8539_s0 = smov [#allocation6]  }
  0x2c   : > { %p8726_p6 = pnand %p6758_p2, %p665_p3  ;;  %s696_s7 = sshll.u32 %s8539_s0, 4  ;;  %s697_s7 = int_to_ptr.vmem [resolvable:$true] %s696_s7 }
  0x2d   : > { %s10618_s2 = scalar_select %p8722_p5, 1, 0 }
  0x2e   : > { %s10620_s29 = scalar_select %p8726_p6, 1, 0 }
  0x2f   : > { %10619 = sst [smem:[#allocation36_spill]] %s10618_s2  ;;  %p7839_p7 = pneg %p8726_p6 }
  0x30   : > { %10621 = sst [smem:[#allocation37_spill]] %s10620_s29  ;;  %s8540_s3 = smov [#allocation9]  }
  0x31   : > { %p8734_p8 = pnand %p7839_p7, %p10552_p1  ;;  %s720_s25 = sshll.u32 %s8540_s3, 4  ;;  %s8738_s25 = int_to_ptr.vmem [resolvable:$true] %s720_s25 }
  0x32   : > { %s10623_s1 = sld [smem:[#allocation47_spill]] }
  0x33   : > { %s10622_s30 = scalar_select %p8734_p8, 1, 0 }
  0x34   : > { %p8748_p10 = pneg %p8734_p8 }
  0x36   : > { %s10624_s0 = scalar_select %p8748_p10, 1, 0 }
  0x38   : > { %s8069_s5 = scalar_lea.hbm %s10623_s1, 256 }
  0x39   : > { %p8070_p9 = scmp.ne.s32.totalorder %s10623_s1, %s8069_s5  ;;  %p8076_p13 = scmp.lt.u32.totalorder %s8069_s5, %s10623_s1 }
  0x3b   : > { %p8072_p11 = pnand %p8748_p10, %p8070_p9 }
  0x3d   : > { %p8073_p12 = pneg %p8072_p11 }
  0x3f   : > { %p8078_p0 = pnand %p8076_p13, %p8073_p12 }
  0x41   : > { %8081 = shalt.err (!%p8078_p0)
}
  0x42   : > { %s8082_s8 = scalar_lea.vmem %s697_s7, 256  ;;  %p8090_p4 = scmp.lt.s32.totalorder %s697_s7, %s697_s7 }
  0x43   : > { %p8083_p2 = scmp.ne.s32.totalorder %s697_s7, %s8082_s8  ;;  %p8091_p1 = scmp.lt.s32.totalorder %s8082_s8, %s8082_s8 }
  0x45   : > { %p8085_p3 = pnand %p8083_p2, %p8748_p10  ;;  %p8092_p5 = por %p8091_p1, %p8090_p4 }
  0x47   : > { %p8086_p7 = pneg %p8085_p3 }
  0x49   : > { %p8093_p6 = pnand %p8092_p5, %p8086_p7 }
  0x4b   : > { %8096 = shalt.err (!%p8093_p6)
}
  0x4c   : > { %s10555_s23 = smov 128   ;;  %s10557_s24 = smov 8  }
  0x4d   : > { %7845 = dma.hbm_to_vmem [thread:$0]  (!%p8734_p8), %s10623_s1, 256, %s697_s7, [#allocation7], %s10555_s23, %s10555_s23, %s10557_s24  }
  0x4e   : > { %s10625_s19 = sld [smem:[#allocation49_spill]] }
  0x54   : > { %s8097_s17 = scalar_lea.hbm %s10625_s19, 2048 }
  0x55   : > { %p8098_p1 = scmp.ne.s32.totalorder %s10625_s19, %s8097_s17  ;;  %p8104_p6 = scmp.lt.u32.totalorder %s8097_s17, %s10625_s19 }
  0x57   : > { %p8100_p4 = pnand %p8098_p1, %p8748_p10 }
  0x59   : > { %p8101_p5 = pneg %p8100_p4 }
  0x5b   : > { %p8106_p9 = pnand %p8104_p6, %p8101_p5 }
  0x5d   : > { %8109 = shalt.err (!%p8106_p9)
}
  0x5e   : > { %s8110_s7 = scalar_lea.vmem %s8738_s25, 2048  ;;  %p8118_p0 = scmp.lt.s32.totalorder %s8738_s25, %s8738_s25 }
  0x5f   : > { %p8111_p11 = scmp.ne.s32.totalorder %s8738_s25, %s8110_s7  ;;  %p8119_p2 = scmp.lt.s32.totalorder %s8110_s7, %s8110_s7 }
  0x61   : > { %p8113_p12 = pnand %p8111_p11, %p8748_p10  ;;  %p8120_p3 = por %p8119_p2, %p8118_p0 }
  0x63   : > { %p8114_p13 = pneg %p8113_p12 }
  0x65   : > { %p8121_p7 = pnand %p8120_p3, %p8114_p13 }
  0x67   : > { %8124 = shalt.err (!%p8121_p7)
}
  0x68   : > { %7851 = dma.hbm_to_vmem [thread:$0]  (!%p8734_p8), %s10625_s19, 2048, %s8738_s25, [#allocation10], %s10555_s23, %s10555_s23, %s10557_s24  }
  0x69   : > { %s8794_s15 = sadd.s32 1, %s8537_s28   ;;  %s256_s17 = sadd.s32 1, %s8533_s27 }
  0x6a   : > { %10626 = sst [smem:[#allocation38_spill]] %s8794_s15  ;;  %s253_s21 = ssub.s32 %s8537_s28, %s8794_s15 }
  0x6b   : > { %p263_p1 = scmp.ne.s32.totalorder %s8533_s27, %s8529_s26  ;;  %p254_p4 = scmp.eq.s32.totalorder %s253_s21, 0 }
  0x6c   : > { %p264_p5 = scmp.eq.s32.totalorder %s8537_s28, 0  ;;  %p7885_p6 = scmp.lt.s32.totalorder %s8537_s28, 2 }
  0x6d   : > { %s8804_s4 = sand.u32 1, %s8537_s28   ;;  %s8810_s3 = sand.u32 1, %s8533_s27  }
  0x6e   : > { %s8807_s5 = scalar_select %p254_p4, %s8533_s27, %s256_s17  }
  0x6f   : > { %p265_p9 = por %p264_p5, %p263_p1  ;;  %s7796_s8 = smul.u32 6144, %s8537_s28 }
  0x70   : > { %10627 = sst [smem:[#allocation39_spill]] %s8807_s5  ;;  %s7795_s25 = smul.u32 384, %s8810_s3 }
  0x71   : > { %p8814_p11 = pnand %p7885_p6, %p265_p9  ;;  %s10629_s9 = sld [smem:[#allocation53_spill]] }
  0x72   : > { %s763_s17 = scalar_lea.vmem [#allocation12], %s7795_s25 }
  0x73   : > { %s10628_s7 = scalar_select %p8814_p11, 1, 0 }
  0x74   : > { %s770_s23 = sshll.u32 %s763_s17, 4  ;;  %p8830_p13 = pneg %p8814_p11  ;;  %s8823_s23 = int_to_ptr.vmem [resolvable:$true] %s770_s23 }
  0x76   : > { %s10630_s19 = scalar_select %p8830_p13, 1, 0 }
  0x77   : > { %s8821_s21 = scalar_lea.hbm %s10629_s9, %s7796_s8  ;;  %s8130_s12 = scalar_lea.hbm %s10629_s9, 12288 }
  0x78   : > { %s8125_s1 = scalar_lea.hbm %s8821_s21, 6144  ;;  %p8131_p3 = scmp.lt.u32.totalorder %s8821_s21, %s10629_s9 }
  0x79   : > { %p8126_p12 = scmp.ne.s32.totalorder %s8821_s21, %s8125_s1  ;;  %p8132_p7 = scmp.lt.u32.totalorder %s8130_s12, %s8125_s1 }
  0x7a   : > { %p8134_p4 = scmp.lt.u32.totalorder %s8125_s1, %s8821_s21 }
  0x7b   : > { %p8128_p0 = pnand %p8830_p13, %p8126_p12  ;;  %p8133_p1 = por %p8132_p7, %p8131_p3 }
  0x7d   : > { %p8129_p2 = pneg %p8128_p0  ;;  %p8135_p5 = por %p8134_p4, %p8133_p1 }
  0x7f   : > { %p8136_p6 = pnand %p8135_p5, %p8129_p2 }
  0x81   : > { %8139 = shalt.err (!%p8136_p6)
}
  0x82   : > { %s8140_s24 = scalar_lea.vmem %s8823_s23, 6144  ;;  %s8543_s8 = smov [#allocation12]  }
  0x83   : > { %p8141_p9 = scmp.ne.s32.totalorder %s8823_s23, %s8140_s24  ;;  %s8145_s10 = sshll.u32 %s8543_s8, 4  ;;  %s8146_s10 = int_to_ptr.vmem [resolvable:$false] %s8145_s10 }
  0x84   : > { %s8147_s25 = scalar_lea.vmem %s8146_s10, 12288  ;;  %p8148_p8 = scmp.lt.s32.totalorder %s8823_s23, %s8146_s10 }
  0x85   : > { %p8143_p12 = pnand %p8141_p9, %p8830_p13  ;;  %p8149_p10 = scmp.lt.s32.totalorder %s8147_s25, %s8140_s24 }
  0x87   : > { %p8144_p0 = pneg %p8143_p12  ;;  %p8150_p3 = por %p8149_p10, %p8148_p8 }
  0x89   : > { %p8151_p7 = pnand %p8150_p3, %p8144_p0 }
  0x8b   : > { %8154 = shalt.err (!%p8151_p7)
}
  0x8c   : > { %s8544_s1 = smov 384   ;;  %s8545_s12 = smov 24  }
  0x8d   : > { %s10631_s17 = scalar_lea.sflag [#allocation13], %s8804_s4  ;;  %s6769_s8 = sshll.u32 %s8810_s3, 6 }
  0x8e   : > { %7858 = dma.hbm_to_vmem [thread:$0]  (!%p8814_p11), %s8821_s21, 6144, %s8823_s23, %s10631_s17, %s8544_s1, %s8544_s1, %s8545_s12  }
  0x8f   : > { %s6872_s10 = sshll.u32 %s8537_s28, 10  ;;  %s10632_s13 = sld [smem:[#allocation57_spill]] }
  0x90   : > { %s818_s5 = scalar_lea.vmem [#allocation15], %s6769_s8  ;;  %s6775_s15 = sshll.u32 %s8810_s3, 8 }
  0x91   : > { %s825_s27 = sshll.u32 %s818_s5, 4  ;;  %s10571_s2 = scalar_lea.sflag [#allocation16], %s8804_s4  ;;  %s8862_s27 = int_to_ptr.vmem [resolvable:$true] %s825_s27 }
  0x95   : > { %s8860_s9 = scalar_lea.hbm %s10632_s13, %s6872_s10  ;;  %s8160_s1 = scalar_lea.hbm %s10632_s13, 2048 }
  0x96   : > { %s8155_s26 = scalar_lea.hbm %s8860_s9, 1024  ;;  %p8161_p1 = scmp.lt.u32.totalorder %s8860_s9, %s10632_s13 }
  0x97   : > { %p8156_p8 = scmp.ne.s32.totalorder %s8860_s9, %s8155_s26  ;;  %p8162_p4 = scmp.lt.u32.totalorder %s8160_s1, %s8155_s26 }
  0x98   : > { %p8164_p6 = scmp.lt.u32.totalorder %s8155_s26, %s8860_s9 }
  0x99   : > { %p8158_p10 = pnand %p8156_p8, %p8830_p13  ;;  %p8163_p5 = por %p8162_p4, %p8161_p1 }
  0x9b   : > { %p8159_p2 = pneg %p8158_p10  ;;  %p8165_p9 = por %p8164_p6, %p8163_p5 }
  0x9d   : > { %p8166_p12 = pnand %p8165_p9, %p8159_p2 }
  0x9f   : > { %8169 = shalt.err (!%p8166_p12)
}
  0xa0   : > { %s8170_s5 = scalar_lea.vmem %s8862_s27, 1024  ;;  %s8546_s8 = smov [#allocation15]  }
  0xa1   : > { %p8171_p0 = scmp.ne.s32.totalorder %s8862_s27, %s8170_s5  ;;  %s8175_s10 = sshll.u32 %s8546_s8, 4  ;;  %s8176_s10 = int_to_ptr.vmem [resolvable:$false] %s8175_s10 }
  0xa2   : > { %s8177_s24 = scalar_lea.vmem %s8176_s10, 2048  ;;  %p8178_p8 = scmp.lt.s32.totalorder %s8862_s27, %s8176_s10 }
  0xa3   : > { %p8173_p3 = pnand %p8171_p0, %p8830_p13  ;;  %p8179_p10 = scmp.lt.s32.totalorder %s8177_s24, %s8170_s5 }
  0xa5   : > { %p8174_p7 = pneg %p8173_p3  ;;  %p8180_p1 = por %p8179_p10, %p8178_p8 }
  0xa7   : > { %p8181_p4 = pnand %p8180_p1, %p8174_p7 }
  0xa9   : > { %8184 = shalt.err (!%p8181_p4)
}
  0xaa   : > { %s10633_s26 = smov 8   ;;  %s10634_s25 = smov 128  }
  0xab   : > { %7864 = dma.hbm_to_vmem [thread:$0]  (!%p8814_p11), %s8860_s9, 1024, %s8862_s27, %s10571_s2, %s10634_s25, %s10634_s25, %s10633_s26  }
  0xac   : > { %s6874_s23 = sshll.u32 %s8537_s28, 12  ;;  %s10635_s16 = sld [smem:[#allocation60_spill]] }
  0xad   : > { %s866_s17 = scalar_lea.vmem [#allocation18], %s6775_s15  ;;  %s10572_s8 = scalar_lea.sflag [#allocation19], %s8804_s4 }
  0xae   : > { %s873_s5 = sshll.u32 %s866_s17, 4  ;;  %s8900_s5 = int_to_ptr.vmem [resolvable:$true] %s873_s5 }
  0xb2   : > { %s8896_s12 = scalar_lea.hbm %s10635_s16, %s6874_s23  ;;  %s8190_s24 = scalar_lea.hbm %s10635_s16, 8192 }
  0xb3   : > { %s8185_s10 = scalar_lea.hbm %s8896_s12, 4096  ;;  %p8191_p9 = scmp.lt.u32.totalorder %s8896_s12, %s10635_s16 }
  0xb4   : > { %p8186_p2 = scmp.ne.s32.totalorder %s8896_s12, %s8185_s10  ;;  %p8192_p12 = scmp.lt.u32.totalorder %s8190_s24, %s8185_s10 }
  0xb5   : > { %p8194_p3 = scmp.lt.u32.totalorder %s8185_s10, %s8896_s12 }
  0xb6   : > { %p8188_p5 = pnand %p8186_p2, %p8830_p13  ;;  %p8193_p0 = por %p8192_p12, %p8191_p9 }
  0xb8   : > { %p8189_p6 = pneg %p8188_p5  ;;  %p8195_p7 = por %p8194_p3, %p8193_p0 }
  0xba   : > { %p8196_p8 = pnand %p8195_p7, %p8189_p6 }
  0xbc   : > { %8199 = shalt.err (!%p8196_p8)
}
  0xbd   : > { %s8200_s15 = scalar_lea.vmem %s8900_s5, 4096  ;;  %s8547_s1 = smov [#allocation18]  }
  0xbe   : > { %p8201_p10 = scmp.ne.s32.totalorder %s8900_s5, %s8200_s15  ;;  %s8205_s17 = sshll.u32 %s8547_s1, 4  ;;  %s8206_s17 = int_to_ptr.vmem [resolvable:$false] %s8205_s17 }
  0xbf   : > { %s8207_s9 = scalar_lea.vmem %s8206_s17, 8192  ;;  %p8208_p2 = scmp.lt.s32.totalorder %s8900_s5, %s8206_s17 }
  0xc0   : > { %p8203_p1 = pnand %p8201_p10, %p8830_p13  ;;  %p8209_p5 = scmp.lt.s32.totalorder %s8207_s9, %s8200_s15 }
  0xc2   : > { %p8204_p4 = pneg %p8203_p1  ;;  %p8210_p9 = por %p8209_p5, %p8208_p2 }
  0xc4   : > { %p8211_p12 = pnand %p8210_p9, %p8204_p4 }
  0xc6   : > { %8214 = shalt.err (!%p8211_p12)
}
  0xc7   : > { %s8548_s10 = smov 256   ;;  %s8549_s27 = smov 16  }
  0xc8   : > { %7870 = dma.hbm_to_vmem [thread:$0]  (!%p8814_p11), %s8896_s12, 4096, %s8900_s5, %s10572_s8, %s8548_s10, %s8548_s10, %s8549_s27  }
  0xc9   : > { %s6781_s24 = sshll.u32 %s8810_s3, 9  ;;  %s6876_s23 = sshll.u32 %s8537_s28, 13 }
  0xca   : > { %s10636_s20 = sld [smem:[#allocation64_spill]]  ;;  %s921_s17 = scalar_lea.vmem [#allocation21], %s6781_s24 }
  0xcb   : > { %s928_s9 = sshll.u32 %s921_s17, 4  ;;  %s918_s2 = scalar_lea.sflag [#allocation22], %s8804_s4  ;;  %s8937_s9 = int_to_ptr.vmem [resolvable:$true] %s928_s9 }
  0xd0   : > { %s8933_s1 = scalar_lea.hbm %s10636_s20, %s6876_s23  ;;  %s8220_s10 = scalar_lea.hbm %s10636_s20, 16384 }
  0xd1   : > { %s8215_s13 = scalar_lea.hbm %s8933_s1, 8192  ;;  %p8221_p7 = scmp.lt.u32.totalorder %s8933_s1, %s10636_s20 }
  0xd2   : > { %p8216_p6 = scmp.ne.s32.totalorder %s8933_s1, %s8215_s13  ;;  %p8222_p8 = scmp.lt.u32.totalorder %s8220_s10, %s8215_s13 }
  0xd3   : > { %p8224_p1 = scmp.lt.u32.totalorder %s8215_s13, %s8933_s1 }
  0xd4   : > { %p8218_p0 = pnand %p8216_p6, %p8830_p13  ;;  %p8223_p10 = por %p8222_p8, %p8221_p7 }
  0xd6   : > { %p8219_p3 = pneg %p8218_p0  ;;  %p8225_p4 = por %p8224_p1, %p8223_p10 }
  0xd8   : > { %p8226_p2 = pnand %p8225_p4, %p8219_p3 }
  0xda   : > { %8229 = shalt.err (!%p8226_p2)
}
  0xdb   : > { %s8230_s15 = scalar_lea.vmem %s8937_s9, 8192  ;;  %s8550_s17 = smov [#allocation21]  }
  0xdc   : > { %p8231_p5 = scmp.ne.s32.totalorder %s8937_s9, %s8230_s15  ;;  %s8235_s12 = sshll.u32 %s8550_s17, 4  ;;  %s8236_s12 = int_to_ptr.vmem [resolvable:$false] %s8235_s12 }
  0xdd   : > { %s8237_s5 = scalar_lea.vmem %s8236_s12, 16384  ;;  %p8238_p6 = scmp.lt.s32.totalorder %s8937_s9, %s8236_s12 }
  0xde   : > { %p8233_p9 = pnand %p8231_p5, %p8830_p13  ;;  %p8239_p0 = scmp.lt.s32.totalorder %s8237_s5, %s8230_s15 }
  0xe0   : > { %p8234_p12 = pneg %p8233_p9  ;;  %p8240_p7 = por %p8239_p0, %p8238_p6 }
  0xe2   : > { %p8241_p8 = pnand %p8240_p7, %p8234_p12 }
  0xe4   : > { %8244 = shalt.err (!%p8241_p8)
}
  0xe5   : > { %s8551_s13 = smov 512   ;;  %s8552_s10 = smov 32  }
  0xe6   : > { %7876 = dma.hbm_to_vmem [thread:$0]  (!%p8814_p11), %s8933_s1, 8192, %s8937_s9, %s918_s2, %s8551_s13, %s8551_s13, %s8552_s10  }
  0xe7   : > { %s10637_s22 = sld [smem:[#allocation66_spill]]  ;;  %s949_s17 = scalar_lea.vmem [#allocation23], %s6781_s24 }
  0xe8   : > { %s956_s12 = sshll.u32 %s949_s17, 4  ;;  %s8553_s5 = smov [#allocation3]   ;;  %s8972_s12 = int_to_ptr.vmem [resolvable:$true] %s956_s12 }
  0xe9   : > { %s680_s8 = sshll.u32 %s8553_s5, 4  ;;  %s10638_s6 = sld [smem:[#allocation45_spill]]  ;;  %s681_s8 = int_to_ptr.vmem [resolvable:$true] %s680_s8 }
  0xea   : > { %p10639_p10 = scmp.ne.s32.totalorder %s10624_s0, 0 }
  0xed   : > { %s8968_s15 = scalar_lea.hbm %s10637_s22, %s6876_s23 }
  0xef   : > { %s8245_s29 = scalar_lea.hbm %s10638_s6, 256 }
  0xf0   : > { %p8246_p3 = scmp.ne.s32.totalorder %s10638_s6, %s8245_s29  ;;  %p8252_p2 = scmp.lt.u32.totalorder %s8245_s29, %s10638_s6 }
  0xf2   : > { %p8248_p1 = pnand %p8246_p3, %p10639_p10 }
  0xf4   : > { %p8249_p4 = pneg %p8248_p1 }
  0xf6   : > { %p8254_p5 = pnand %p8252_p2, %p8249_p4 }
  0xf8   : > { %8257 = shalt.err (!%p8254_p5)
}
  0xf9   : > { %s8258_s24 = scalar_lea.vmem %s681_s8, 256  ;;  %p8266_p0 = scmp.lt.s32.totalorder %s681_s8, %s681_s8 }
  0xfa   : > { %p8259_p9 = scmp.ne.s32.totalorder %s681_s8, %s8258_s24  ;;  %p8267_p7 = scmp.lt.s32.totalorder %s8258_s24, %s8258_s24 }
  0xfc   : > { %p8261_p12 = pnand %p8259_p9, %p10639_p10  ;;  %p8268_p8 = por %p8267_p7, %p8266_p0 }
  0xfe   : > { %p8262_p6 = pneg %p8261_p12 }
 0x100   : > { %p8269_p11 = pnand %p8268_p8, %p8262_p6 }
 0x102   : > { %8272 = shalt.err (!%p8269_p11)
}
 0x103   : > { %p10640_p3 = scmp.ne.s32.totalorder %s10622_s30, 0  ;;  %s8554_s20 = smov [#allocation8]  }
 0x104   : > { %s710_s29 = sshll.u32 %s8554_s20, 4  ;;  %s8555_s13 = smov [#allocation11]   ;;  %s711_s29 = int_to_ptr.vmem [resolvable:$true] %s710_s29 }
 0x105   : > { %7842 = dma.hbm_to_vmem [thread:$0]  (!%p10640_p3), %s10638_s6, 256, %s681_s8, [#allocation4], %s10634_s25, %s10634_s25, %s10633_s26  }
 0x106   : > { %s734_s10 = sshll.u32 %s8555_s13, 4  ;;  %s10641_s17 = sld [smem:[#allocation48_spill]]  ;;  %s735_s10 = int_to_ptr.vmem [resolvable:$true] %s734_s10 }
 0x10c   : > { %s8273_s5 = scalar_lea.hbm %s10641_s17, 32 }
 0x10d   : > { %p8274_p11 = scmp.ne.s32.totalorder %s10641_s17, %s8273_s5  ;;  %p8280_p2 = scmp.lt.u32.totalorder %s8273_s5, %s10641_s17 }
 0x10f   : > { %p8276_p1 = pnand %p8274_p11, %p10639_p10 }
 0x111   : > { %p8277_p4 = pneg %p8276_p1 }
 0x113   : > { %p8282_p5 = pnand %p8280_p2, %p8277_p4 }
 0x115   : > { %8285 = shalt.err (!%p8282_p5)
}
 0x116   : > { %s8286_s8 = scalar_lea.vmem %s711_s29, 32  ;;  %p8294_p0 = scmp.lt.s32.totalorder %s711_s29, %s711_s29 }
 0x117   : > { %p8287_p9 = scmp.ne.s32.totalorder %s711_s29, %s8286_s8  ;;  %p8295_p7 = scmp.lt.s32.totalorder %s8286_s8, %s8286_s8 }
 0x119   : > { %p8289_p12 = pnand %p8287_p9, %p10639_p10  ;;  %p8296_p8 = por %p8295_p7, %p8294_p0 }
 0x11b   : > { %p8290_p6 = pneg %p8289_p12 }
 0x11d   : > { %p8297_p13 = pnand %p8296_p8, %p8290_p6 }
 0x11f   : > { %8300 = shalt.err (!%p8297_p13)
}
 0x120   : > { %7848 = dma.hbm_to_vmem [thread:$0]  (!%p10640_p3), %s10641_s17, 32, %s711_s29, [#allocation7]  }
 0x121   : > { %s9014_s20 = sshll.u32 %s8810_s3, 7  ;;  %s10642_s21 = sld [smem:[#allocation50_spill]] }
 0x127   : > { %s8301_s5 = scalar_lea.hbm %s10642_s21, 16 }
 0x128   : > { %p8302_p11 = scmp.ne.s32.totalorder %s10642_s21, %s8301_s5  ;;  %p8308_p4 = scmp.lt.u32.totalorder %s8301_s5, %s10642_s21 }
 0x12a   : > { %p8304_p13 = pnand %p8302_p11, %p10639_p10 }
 0x12c   : > { %p8305_p1 = pneg %p8304_p13 }
 0x12e   : > { %p8310_p2 = pnand %p8308_p4, %p8305_p1 }
 0x130   : > { %8313 = shalt.err (!%p8310_p2)
}
 0x131   : > { %s8314_s29 = scalar_lea.vmem %s735_s10, 16  ;;  %s8321_s3 = scalar_lea.vmem %s735_s10, 32 }
 0x132   : > { %p8315_p5 = scmp.ne.s32.totalorder %s735_s10, %s8314_s29  ;;  %p8322_p6 = scmp.lt.s32.totalorder %s735_s10, %s735_s10 }
 0x133   : > { %p8323_p0 = scmp.lt.s32.totalorder %s8321_s3, %s8314_s29 }
 0x134   : > { %p8317_p9 = pnand %p8315_p5, %p10639_p10 }
 0x135   : > { %p8324_p7 = por %p8323_p0, %p8322_p6 }
 0x136   : > { %p8318_p12 = pneg %p8317_p9 }
 0x138   : > { %p8325_p8 = pnand %p8324_p7, %p8318_p12 }
 0x13a   : > { %8328 = shalt.err (!%p8325_p8)
}
 0x13b   : > { %7854 = dma.hbm_to_vmem [thread:$0]  (!%p10640_p3), %s10642_s21, 16, %s735_s10, [#allocation10]  }
 0x13c   : > { %s9035_s18 = sshll.u32 %s8537_s28, 11  ;;  %s10643_s11 = sld [smem:[#allocation55_spill]] }
 0x13d   : > { %s791_s30 = scalar_lea.vmem [#allocation14], %s9014_s20  ;;  %p10644_p11 = scmp.ne.s32.totalorder %s10630_s19, 0 }
 0x13e   : > { %s798_s5 = sshll.u32 %s791_s30, 4  ;;  %s9044_s5 = int_to_ptr.vmem [resolvable:$true] %s798_s5 }
 0x142   : > { %s9041_s27 = scalar_lea.hbm %s10643_s11, %s9035_s18  ;;  %s8334_s23 = scalar_lea.hbm %s10643_s11, 4096 }
 0x143   : > { %s8329_s1 = scalar_lea.hbm %s9041_s27, 2048  ;;  %p8335_p1 = scmp.lt.u32.totalorder %s9041_s27, %s10643_s11 }
 0x144   : > { %p8330_p10 = scmp.ne.s32.totalorder %s9041_s27, %s8329_s1  ;;  %p8336_p4 = scmp.lt.u32.totalorder %s8334_s23, %s8329_s1 }
 0x145   : > { %p8338_p5 = scmp.lt.u32.totalorder %s8329_s1, %s9041_s27 }
 0x146   : > { %p8332_p3 = pnand %p8330_p10, %p10644_p11  ;;  %p8337_p2 = por %p8336_p4, %p8335_p1 }
 0x148   : > { %p8333_p13 = pneg %p8332_p3  ;;  %p8339_p9 = por %p8338_p5, %p8337_p2 }
 0x14a   : > { %p8340_p12 = pnand %p8339_p9, %p8333_p13 }
 0x14c   : > { %8343 = shalt.err (!%p8340_p12)
}
 0x14d   : > { %s8344_s29 = scalar_lea.vmem %s9044_s5, 2048  ;;  %s8556_s3 = smov [#allocation14]  }
 0x14e   : > { %p8345_p6 = scmp.ne.s32.totalorder %s9044_s5, %s8344_s29  ;;  %s8349_s8 = sshll.u32 %s8556_s3, 4  ;;  %s8350_s8 = int_to_ptr.vmem [resolvable:$false] %s8349_s8 }
 0x14f   : > { %s8351_s16 = scalar_lea.vmem %s8350_s8, 4096  ;;  %p8352_p8 = scmp.lt.s32.totalorder %s9044_s5, %s8350_s8 }
 0x150   : > { %p8347_p0 = pnand %p8345_p6, %p10644_p11  ;;  %p8353_p10 = scmp.lt.s32.totalorder %s8351_s16, %s8344_s29 }
 0x152   : > { %p8348_p7 = pneg %p8347_p0  ;;  %p8354_p3 = por %p8353_p10, %p8352_p8 }
 0x154   : > { %p8355_p1 = pnand %p8354_p3, %p8348_p7 }
 0x156   : > { %8358 = shalt.err (!%p8355_p1)
}
 0x157   : > { %p10645_p13 = scmp.ne.s32.totalorder %s10628_s7, 0  ;;  %s10646_s0 = scalar_lea.sflag [#allocation13], %s8804_s4 }
 0x158   : > { %s10647_s14 = sld [smem:[#allocation58_spill]]  ;;  %s839_s28 = scalar_lea.vmem [#allocation17], %s9014_s20 }
 0x159   : > { %7861 = dma.hbm_to_vmem [thread:$0]  (!%p10645_p13), %s9041_s27, 2048, %s9044_s5, %s10646_s0, %s10634_s25, %s10634_s25, %s10633_s26  }
 0x15a   : > { %s846_s10 = sshll.u32 %s839_s28, 4  ;;  %s9079_s10 = int_to_ptr.vmem [resolvable:$true] %s846_s10 }
 0x15e   : > { %s9076_s1 = scalar_lea.hbm %s10647_s14, %s9035_s18  ;;  %s8364_s5 = scalar_lea.hbm %s10647_s14, 4096 }
 0x15f   : > { %s8359_s23 = scalar_lea.hbm %s9076_s1, 2048  ;;  %p8365_p9 = scmp.lt.u32.totalorder %s9076_s1, %s10647_s14 }
 0x160   : > { %p8360_p4 = scmp.ne.s32.totalorder %s9076_s1, %s8359_s23  ;;  %p8366_p12 = scmp.lt.u32.totalorder %s8364_s5, %s8359_s23 }
 0x161   : > { %p8368_p0 = scmp.lt.u32.totalorder %s8359_s23, %s9076_s1 }
 0x162   : > { %p8362_p2 = pnand %p8360_p4, %p10644_p11  ;;  %p8367_p6 = por %p8366_p12, %p8365_p9 }
 0x164   : > { %p8363_p5 = pneg %p8362_p2  ;;  %p8369_p7 = por %p8368_p0, %p8367_p6 }
 0x166   : > { %p8370_p8 = pnand %p8369_p7, %p8363_p5 }
 0x168   : > { %8373 = shalt.err (!%p8370_p8)
}
 0x169   : > { %s8374_s3 = scalar_lea.vmem %s9079_s10, 2048  ;;  %s8557_s8 = smov [#allocation17]  }
 0x16a   : > { %p8375_p10 = scmp.ne.s32.totalorder %s9079_s10, %s8374_s3  ;;  %s8379_s16 = sshll.u32 %s8557_s8, 4  ;;  %s8380_s16 = int_to_ptr.vmem [resolvable:$false] %s8379_s16 }
 0x16b   : > { %s8381_s0 = scalar_lea.vmem %s8380_s16, 4096  ;;  %p8382_p4 = scmp.lt.s32.totalorder %s9079_s10, %s8380_s16 }
 0x16c   : > { %p8377_p3 = pnand %p8375_p10, %p10644_p11  ;;  %p8383_p2 = scmp.lt.s32.totalorder %s8381_s0, %s8374_s3 }
 0x16e   : > { %p8378_p1 = pneg %p8377_p3  ;;  %p8384_p9 = por %p8383_p2, %p8382_p4 }
 0x170   : > { %p8385_p12 = pnand %p8384_p9, %p8378_p1 }
 0x172   : > { %8388 = shalt.err (!%p8385_p12)
}
 0x173   : > { %s10648_s13 = scalar_lea.sflag [#allocation16], %s8804_s4  ;;  %s10649_s23 = sld [smem:[#allocation62_spill]] }
 0x174   : > { %7867 = dma.hbm_to_vmem [thread:$0]  (!%p10645_p13), %s9076_s1, 2048, %s9079_s10, %s10648_s13, %s10634_s25, %s10634_s25, %s10633_s26  }
 0x175   : > { %s894_s27 = scalar_lea.vmem [#allocation20], %s9014_s20 }
 0x176   : > { %s901_s5 = sshll.u32 %s894_s27, 4  ;;  %s9114_s5 = int_to_ptr.vmem [resolvable:$true] %s901_s5 }
 0x179   : > { %s9111_s9 = scalar_lea.hbm %s10649_s23, %s9035_s18  ;;  %s8394_s10 = scalar_lea.hbm %s10649_s23, 4096 }
 0x17a   : > { %s8389_s24 = scalar_lea.hbm %s9111_s9, 2048  ;;  %p8395_p7 = scmp.lt.u32.totalorder %s9111_s9, %s10649_s23 }
 0x17b   : > { %p8390_p5 = scmp.ne.s32.totalorder %s9111_s9, %s8389_s24  ;;  %p8396_p8 = scmp.lt.u32.totalorder %s8394_s10, %s8389_s24 }
 0x17c   : > { %p8398_p3 = scmp.lt.u32.totalorder %s8389_s24, %s9111_s9 }
 0x17d   : > { %p8392_p6 = pnand %p8390_p5, %p10644_p11  ;;  %p8397_p10 = por %p8396_p8, %p8395_p7 }
 0x17f   : > { %p8393_p0 = pneg %p8392_p6  ;;  %p8399_p1 = por %p8398_p3, %p8397_p10 }
 0x181   : > { %p8400_p4 = pnand %p8399_p1, %p8393_p0 }
 0x183   : > { %8403 = shalt.err (!%p8400_p4)
}
 0x184   : > { %s8404_s20 = scalar_lea.vmem %s9114_s5, 2048  ;;  %s8558_s8 = smov [#allocation20]  }
 0x185   : > { %p8405_p2 = scmp.ne.s32.totalorder %s9114_s5, %s8404_s20  ;;  %s8409_s16 = sshll.u32 %s8558_s8, 4  ;;  %s8410_s16 = int_to_ptr.vmem [resolvable:$false] %s8409_s16 }
 0x186   : > { %s8411_s0 = scalar_lea.vmem %s8410_s16, 4096  ;;  %p8412_p5 = scmp.lt.s32.totalorder %s9114_s5, %s8410_s16 }
 0x187   : > { %p8407_p9 = pnand %p8405_p2, %p10644_p11  ;;  %p8413_p6 = scmp.lt.s32.totalorder %s8411_s0, %s8404_s20 }
 0x189   : > { %p8408_p12 = pneg %p8407_p9  ;;  %p8414_p7 = por %p8413_p6, %p8412_p5 }
 0x18b   : > { %p8415_p8 = pnand %p8414_p7, %p8408_p12 }
 0x18d   : > { %8418 = shalt.err (!%p8415_p8)
}
 0x18e   : > { %s10650_s13 = scalar_lea.sflag [#allocation19], %s8804_s4  ;;  %s8419_s30 = scalar_lea.hbm %s8968_s15, 8192 }
 0x18f   : > { %7873 = dma.hbm_to_vmem [thread:$0]  (!%p10645_p13), %s9111_s9, 2048, %s9114_s5, %s10650_s13, %s10634_s25, %s10634_s25, %s10633_s26  }
 0x190   : > { %p8420_p0 = scmp.ne.s32.totalorder %s8968_s15, %s8419_s30  ;;  %s8424_s24 = scalar_lea.hbm %s10637_s22, 16384 }
 0x191   : > { %p8425_p1 = scmp.lt.u32.totalorder %s8968_s15, %s10637_s22  ;;  %p8426_p4 = scmp.lt.u32.totalorder %s8424_s24, %s8419_s30 }
 0x192   : > { %p8422_p10 = pnand %p8420_p0, %p10644_p11  ;;  %p8428_p9 = scmp.lt.u32.totalorder %s8419_s30, %s8968_s15 }
 0x193   : > { %p8427_p2 = por %p8426_p4, %p8425_p1 }
 0x194   : > { %p8423_p3 = pneg %p8422_p10 }
 0x195   : > { %p8429_p12 = por %p8428_p9, %p8427_p2 }
 0x197   : > { %p8430_p5 = pnand %p8429_p12, %p8423_p3 }
 0x199   : > { %8433 = shalt.err (!%p8430_p5)
}
 0x19a   : > { %s8434_s9 = scalar_lea.vmem %s8972_s12, 8192  ;;  %s8559_s5 = smov [#allocation23]  }
 0x19b   : > { %p8435_p6 = scmp.ne.s32.totalorder %s8972_s12, %s8434_s9  ;;  %s8439_s10 = sshll.u32 %s8559_s5, 4  ;;  %s8440_s10 = int_to_ptr.vmem [resolvable:$false] %s8439_s10 }
 0x19c   : > { %s8441_s3 = scalar_lea.vmem %s8440_s10, 16384  ;;  %p8442_p0 = scmp.lt.s32.totalorder %s8972_s12, %s8440_s10 }
 0x19d   : > { %p8437_p7 = pnand %p8435_p6, %p10644_p11  ;;  %p8443_p10 = scmp.lt.s32.totalorder %s8441_s3, %s8434_s9 }
 0x19f   : > { %p8438_p8 = pneg %p8437_p7  ;;  %p8444_p1 = por %p8443_p10, %p8442_p0 }
 0x1a1   : > { %p8445_p4 = pnand %p8444_p1, %p8438_p8 }
 0x1a3   : > { %8448 = shalt.err (!%p8445_p4)
}
 0x1a4   : > { %7879 = dma.hbm_to_vmem [thread:$0]  (!%p10645_p13), %s8968_s15, 8192, %s8972_s12, %s918_s2, %s10634_s25, %s10634_s25, %s10633_s26  }
 0x1a5   : > { %s10651_s19 = sld [smem:[#allocation37_spill]] }
 0x1ab   : > { %p10652_p11 = scmp.ne.s32.totalorder %s10651_s19, 0 }
 0x1ad   : > { %974 = sbr.rel (%p10652_p11) target bundleno = 8484 (0x2124), region = 116 }
 0x1b4   : > { %s10653_s18 = sld [smem:[#allocation35_spill]] }
 0x1ba   : > { %p10654_p3 = scmp.eq.s32.totalorder %s10653_s18, 0 }
 0x1bc   : > { %8492 = dma.done.wait (%p10654_p3), [#allocation4], 256   ;;  %p10655_p2 = pmov %p10654_p3 }
 0x1be   : > { %8494 = vsyncadd (%p10655_p2), [#allocation4], 4294967040  ;;  %p10656_p9 = pmov %p10655_p2 }
 0x1bf   : > { %p10657_p12 = pmov %p10655_p2 }
 0x1c0   : > { %8496 = dma.done.wait (%p10656_p9), [#allocation7], 288  }
 0x1c1   : > { %8498 = vsyncadd (%p10657_p12), [#allocation7], 4294967008  ;;  %p10658_p5 = pmov %p10655_p2 }
 0x1c2   : > { %p10659_p13 = pmov %p10655_p2 }
 0x1c3   : > { %8500 = dma.done.wait (%p10658_p5), [#allocation10], 2064  }
 0x1c4   : > { %8502 = vsyncadd (%p10659_p13), [#allocation10], 4294965232  ;;  %s10660_s2 = sld [smem:[#allocation33_spill]]  ;;  %s10661_s4 = sld [smem:[#allocation36_spill]] }
 0x1c5   : > { %s996_s7 = sand.u32 1, %s10653_s18  }
 0x1c6   : > { %s997_s15 = scalar_lea.sflag [#allocation13], %s996_s7 }
 0x1ca   : > { %s9184_s26 = sand.u32 1, %s10660_s2   ;;  %p10662_p6 = scmp.ne.s32.totalorder %s10661_s4, 0 }
 0x1cb   : > { %s7797_s25 = smul.u32 384, %s9184_s26 }
 0x1cd   : > { %s9187_s12 = scalar_lea.vmem [#allocation12], %s7797_s25 }
 0x1ce   : > { %8504 = dma.done.wait (%p10662_p6), %s997_s15, 8192  }
 0x1cf   : > { %8506 = vsyncadd (%p10662_p6), %s997_s15, 4294959104  ;;  %s6793_s20 = sshll.u32 %s9184_s26, 7  ;;  %s6794_s8 = sshll.u32 %s9184_s26, 6 }
 0x1d0   : > { %s9195_s16 = scalar_lea.vmem [#allocation14], %s6793_s20  ;;  %s1015_s0 = scalar_lea.sflag [#allocation16], %s996_s7 }
 0x1d1   : > { %s9197_s13 = scalar_lea.vmem [#allocation15], %s6794_s8 }
 0x1d2   : > { %8508 = dma.done.wait (%p10662_p6), %s1015_s0, 3072  }
 0x1d3   : > { %8510 = vsyncadd (%p10662_p6), %s1015_s0, 4294964224  ;;  %s6796_s30 = sshll.u32 %s9184_s26, 8  ;;  %s9204_s28 = scalar_lea.vmem [#allocation17], %s6793_s20 }
 0x1d4   : > { %10663 = sst [smem:[#allocation40_spill]] %s9204_s28  ;;  %s1033_s27 = scalar_lea.sflag [#allocation19], %s996_s7 }
 0x1d5   : > { %s9206_s24 = scalar_lea.vmem [#allocation18], %s6796_s30 }
 0x1d6   : > { %10664 = sst [smem:[#allocation41_spill]] %s9206_s24 }
 0x1d7   : > { %8512 = dma.done.wait (%p10662_p6), %s1033_s27, 6144  }
 0x1d8   : > { %8514 = vsyncadd (%p10662_p6), %s1033_s27, 4294961152  ;;  %s6798_s29 = sshll.u32 %s9184_s26, 9  ;;  %s9213_s1 = scalar_lea.vmem [#allocation20], %s6793_s20 }
 0x1d9   : > { %10665 = sst [smem:[#allocation42_spill]] %s9213_s1  ;;  %s1051_s9 = scalar_lea.sflag [#allocation22], %s996_s7 }
 0x1da   : > { %s9215_s5 = scalar_lea.vmem [#allocation21], %s6798_s29 }
 0x1db   : > { %10666 = sst [smem:[#allocation43_spill]] %s9215_s5 }
 0x1dc   : > { %8516 = dma.done.wait (%p10662_p6), %s1051_s9, 16384  }
 0x1dd   : > { %8518 = vsyncadd (%p10662_p6), %s1051_s9, 4294950912  ;;  %p1190_p7 = scmp.lt.s32.totalorder %s10653_s18, 1  ;;  %s10667_s7 = sld [smem:[#allocation51_spill]] }
 0x1de   : > { %s10668_s20 = sld [smem:[#allocation52_spill]]  ;;  %s10669_s27 = sld [smem:[#allocation54_spill]] }
 0x1df   : > { %s9223_s10 = scalar_select %p1190_p7, %s10653_s18, 1 }
 0x1e0   : > { %s10671_s23 = sld [smem:[#allocation59_spill]]  ;;  %s10672_s1 = sld [smem:[#allocation61_spill]] }
 0x1e1   : > { %s9226_s3 = sshll.u32 %s9223_s10, 2  ;;  %s7798_s19 = smul.u32 3, %s9223_s10 }
 0x1e2   : > { %s6802_s4 = sshll.u32 %s9223_s10, 1  ;;  %s10673_s28 = sld [smem:[#allocation63_spill]] }
 0x1e3   : > { %s9233_s26 = scalar_lea.vmem %s10667_s7, %s9226_s3  ;;  %s10675_s6 = sld [smem:[#allocation67_spill]] }
 0x1e4   : > { %s9239_s8 = scalar_lea.vmem %s10668_s20, %s9226_s3  ;;  %s9244_s9 = scalar_lea.vmem %s10669_s27, %s7798_s19 }
 0x1e5   : > { %s10674_s27 = sld [smem:[#allocation65_spill]]  ;;  %s9272_s22 = scalar_lea.vmem [#allocation23], %s6798_s29 }
 0x1e6   : > { %s1207_s2 = scalar_lea.vmem %s10671_s23, %s9223_s10  ;;  %s9258_s25 = scalar_lea.vmem %s10672_s1, %s6802_s4 }
 0x1e7   : > { %p10676_p8 = scmp.ne.s32.totalorder %s10653_s18, 0 }
 0x1e8   : > { %s1214_s0 = scalar_lea.vmem %s10673_s28, %s9223_s10  ;;  %s10677_s1 = sld [smem:[#allocation44_spill]] (!%p10676_p8) }
 0x1e9   : > { %s1221_s17 = scalar_lea.vmem %s10675_s6, %s9223_s10  ;;  %1225 = sbr.rel (%p10676_p8) target bundleno = 496 (0x1f0), region = 172 }
 0x1eb   : > { %s1218_s24 = scalar_lea.vmem %s10674_s27, %s9226_s3 }
 0x1ee   : > { %v1226_v0 = vld [vmem:[%s10677_s1] sm:$0xff] (!%p10676_p8)  ;;  %v1227_v1 = vld [vmem:[%s10677_s1 + $0x8] sm:$0xff] (!%p10676_p8) }
 0x1ef   : > { %1228 = vst [vmem:[#allocation2] sm:$0xff] (!%p10676_p8), %v1226_v0  ;;  %1229 = vst [vmem:[#allocation2 + $0x8] sm:$0xff] (!%p10676_p8), %v1227_v1 }
 0x1f0 PF: > { %v1270_v4 = vld [vmem:[%s9187_s12 + $0x8] sm:$0xff]  ;;  %v1273_v5 = vld [vmem:[%s9187_s12 + $0x20] sm:$0xff]  ;;  %v1272_v8 = vld [vmem:[%s9187_s12 + $0x18] sm:$0xff]  ;;  %vm8561_vm0 = vmmov 0   ;;  %vm1694_vm1 = vcmask 261120   ;;  %vm1785_vm2 = vcmask 1041409  }
 0x1f1   : > { %v1269_v6 = vld [vmem:[%s9187_s12] sm:$0xff]  ;;  %v7443_v7 = vpack.c.bf16 %v1273_v5, %v1270_v4  ;;  %v1276_v9 = vld [vmem:[%s9187_s12 + $0x38] sm:$0xff]  ;;  %v1279_v10 = vld [vmem:[%s9187_s12 + $0x50] sm:$0xff]  ;;  %vm1787_vm3 = vcmask 1042434   ;;  %vm1789_vm4 = vcmask 1043459   ;;  %vm1791_vm5 = vcmask 1044484  }
 0x1f2   : > { %v7445_v11 = vpack.c.bf16 %v1272_v8, %v1269_v6  ;;  %v7447_v12 = vpack.c.bf16 %v1279_v10, %v1276_v9  ;;  %v1271_v13 = vld [vmem:[%s9187_s12 + $0x10] sm:$0xff]  ;;  %v1274_v14 = vld [vmem:[%s9187_s12 + $0x28] sm:$0xff]  ;;  %v1285_v19 = vld [vmem:[%s9187_s12 + $0x80] sm:$0xff]  ;;  %v8560_v6 = vmov 0.0   ;;  %vm1793_vm6 = vcmask 1045509   ;;  %s10678_s28 = sld [smem:[#allocation46_spill]] }
 0x1f3   : > { %v1275_v15 = vld [vmem:[%s9187_s12 + $0x30] sm:$0xff]  ;;  %7444 = vmatprep.subr.bf16.mxu0 %v7443_v7  ;;  %v7475_v16 = vpack.c.bf16 %v1274_v14, %v1271_v13  ;;  %v1278_v17 = vld [vmem:[%s9187_s12 + $0x48] sm:$0xff]  ;;  %v1277_v21 = vld [vmem:[%s9187_s12 + $0x40] sm:$0xff]  ;;  %1398 = vmatprep.mubr.f32.mxu0 %v8560_v6  ;;  %vm1795_vm7 = vcmask 1046534   ;;  %vm1797_vm8 = vcmask 1047559   ;;  %vm2000_vm9 = vcmask 64512  }
 0x1f4   : > { %v1282_v18 = vld [vmem:[%s9187_s12 + $0x68] sm:$0xff]  ;;  %7446 = vmatpush1.bf16.msra.mxu0 %v7445_v11  ;;  %v7449_v20 = vpack.c.bf16 %v1278_v17, %v1275_v15  ;;  %v1280_v22 = vld [vmem:[%s9187_s12 + $0x58] sm:$0xff]  ;;  %v1281_v25 = vld [vmem:[%s9187_s12 + $0x60] sm:$0xff]  ;;  %s8563_s15 = smov 96   ;;  %s8564_s20 = smov 32   ;;  %vm3945_vm10 = vcmask 523264  }
 0x1f5   : > { %7448 = vmatprep.subr.bf16.mxu0 %v7447_v12  ;;  %7476 = vmatprep.subr.bf16.mxu1 %v7475_v16  ;;  %v7451_v23 = vpack.c.bf16 %v1285_v19, %v1282_v18  ;;  %v7479_v24 = vpack.c.bf16 %v1280_v22, %v1277_v21  ;;  %v1284_v26 = vld [vmem:[%s9187_s12 + $0x78] sm:$0xff]  ;;  %v1291_v37 = vld [vmem:[%s9187_s12 + $0xb0] sm:$0xff]  ;;  %v1286_v40 = vld [vmem:[%s9187_s12 + $0x88] sm:$0xff]  ;;  %s8565_s19 = smov 64   ;;  %vm3948_vm11 = vcmask 785408   ;;  %s10681_s14 = sld [smem:[#allocation40_spill]] }
 0x1f6   : > { %v1230_v2 = vld [vmem:[#allocation2] sm:$0xff]  ;;  %v1231_v3 = vld [vmem:[#allocation2 + $0x8] sm:$0xff]  ;;  %7478 = vmatpush3.bf16.msra.mxu1 %v7475_v16  ;;  %v7453_v27 = vpack.c.bf16 %v1284_v26, %v1281_v25  ;;  %v1297_v46 = vld [vmem:[%s9187_s12 + $0xe0] sm:$0xff]  ;;  %s10682_s23 = sld [smem:[#allocation56_spill]] }
 0x1f7   : > { %1234 = vadd.xlane.f32.xlu0 %v1230_v2  ;;  %7480 = vmatprep.subr.bf16.mxu1 %v7479_v24  ;;  %v1288_v36 = vld [vmem:[%s9187_s12 + $0x98] sm:$0xff]  ;;  %v1283_v38 = vld [vmem:[%s9187_s12 + $0x70] sm:$0xff]  ;;  %v1290_v42 = vld [vmem:[%s9187_s12 + $0xa8] sm:$0xff] }
 0x1f8   : > { %7450 = vmatpush1.bf16.msra.mxu0 %v7449_v20  ;;  %v7455_v39 = vpack.c.bf16 %v1291_v37, %v1288_v36  ;;  %v1287_v41 = vld [vmem:[%s9187_s12 + $0x90] sm:$0xff]  ;;  %v7483_v43 = vpack.c.bf16 %v1286_v40, %v1283_v38  ;;  %v1294_v45 = vld [vmem:[%s9187_s12 + $0xc8] sm:$0xff]  ;;  %v1289_v47 = vld [vmem:[%s9187_s12 + $0xa0] sm:$0xff]  ;;  %v8562_v40 = vmov 1966171168   ;;  %s10679_s29 = smov %s10678_s28 }
 0x1f9   : > { %7452 = vmatprep.subr.bf16.mxu0 %v7451_v23  ;;  %v7457_v44 = vpack.c.bf16 %v1290_v42, %v1287_v41  ;;  %v7459_v48 = vpack.c.bf16 %v1297_v46, %v1294_v45  ;;  %v1292_v49 = vld [vmem:[%s9187_s12 + $0xb8] sm:$0xff]  ;;  %v1293_v50 = vld [vmem:[%s9187_s12 + $0xc0] sm:$0xff]  ;;  %v1303_v55 = vld [vmem:[%s9187_s12 + $0x110] sm:$0xff]  ;;  %v1502_v41 = vunpack.c.l.s4 %v8562_v40 }
 0x1fa   : > { %7482 = vmatpush3.bf16.msra.mxu1 %v7479_v24  ;;  %v1296_v51 = vld [vmem:[%s9187_s12 + $0xd8] sm:$0xff]  ;;  %v7487_v52 = vpack.c.bf16 %v1292_v49, %v1289_v47  ;;  %v1295_v56 = vld [vmem:[%s9187_s12 + $0xd0] sm:$0xff]  ;;  %v1298_v58 = vld [vmem:[%s9187_s12 + $0xe8] sm:$0xff] }
 0x1fb   : > { %1236 = vadd.xlane.f32.xlu0 %v1231_v3  ;;  %7484 = vmatprep.subr.bf16.mxu1 %v7483_v43  ;;  %v7461_v53 = vpack.c.bf16 %v1296_v51, %v1293_v50  ;;  %v1300_v54 = vld [vmem:[%s9187_s12 + $0xf8] sm:$0xff]  ;;  %v1299_v59 = vld [vmem:[%s9187_s12 + $0xf0] sm:$0xff]  ;;  %v1302_v60 = vld [vmem:[%s9187_s12 + $0x108] sm:$0xff]  ;;  %v7491_v61 = vpack.c.bf16 %v1298_v58, %v1295_v56  ;;  %v1503_v46 = vunpack.c.0.s8 %v1502_v41 }
 0x1fc   : > { %7454 = vmatpush1.bf16.msra.mxu0 %v7453_v27  ;;  %v7463_v57 = vpack.c.bf16 %v1303_v55, %v1300_v54  ;;  %v7465_v62 = vpack.c.bf16 %v1302_v60, %v1299_v59  ;;  %v1306_v63 = vld [vmem:[%s9187_s12 + $0x128] sm:$0xff]  ;;  %v1309_v0 = vld [vmem:[%s9187_s12 + $0x140] sm:$0xff]  ;;  %v1308_v5 = vld [vmem:[%s9187_s12 + $0x138] sm:$0xff]  ;;  %s10683_s5 = scalar_lea.vmem %s10682_s23, %s9223_s10 }
 0x1fd   : > { %7456 = vmatprep.subr.bf16.mxu0 %v7455_v39  ;;  %v1301_v1 = vld [vmem:[%s9187_s12 + $0x100] sm:$0xff]  ;;  %v1312_v9 = vld [vmem:[%s9187_s12 + $0x158] sm:$0xff]  ;;  %v1315_v10 = vld [vmem:[%s9187_s12 + $0x170] sm:$0xff] }
 0x1fe   : > { %7486 = vmatpush3.bf16.msra.mxu1 %v7483_v43  ;;  %v1305_v4 = vld [vmem:[%s9187_s12 + $0x120] sm:$0xff]  ;;  %v1307_v11 = vld [vmem:[%s9187_s12 + $0x130] sm:$0xff]  ;;  %v7471_v12 = vpack.c.bf16 %v1315_v10, %v1312_v9  ;;  %v1310_v13 = vld [vmem:[%s9187_s12 + $0x148] sm:$0xff] }
 0x1ff   : > { %7488 = vmatprep.subr.bf16.mxu1 %v7487_v52  ;;  %v7469_v8 = vpack.c.bf16 %v1308_v5, %v1305_v4  ;;  %v1311_v14 = vld [vmem:[%s9187_s12 + $0x150] sm:$0xff]  ;;  %v1314_v15 = vld [vmem:[%s9187_s12 + $0x168] sm:$0xff]  ;;  %v7499_v16 = vpack.c.bf16 %v1310_v13, %v1307_v11  ;;  %v1313_v18 = vld [vmem:[%s9187_s12 + $0x160] sm:$0xff] }
 0x200   : > { %7458 = vmatpush1.bf16.msra.mxu0 %v7457_v44  ;;  %v7473_v17 = vpack.c.bf16 %v1314_v15, %v1311_v14  ;;  %v1316_v19 = vld [vmem:[%s9187_s12 + $0x178] sm:$0xff]  ;;  %v1317_v42 = vld [vmem:[%s9244_s9] sm:$0x7]  ;;  %v9394_v4 = vld [vmem:[%s9197_s13] sm:$0xff] }
 0x201   : > { %7460 = vmatprep.subr.bf16.mxu0 %v7459_v48  ;;  %v7503_v20 = vpack.c.bf16 %v1316_v19, %v1313_v18  ;;  %v9405_v11 = vld [vmem:[%s9197_s13 + $0x8] sm:$0xff]  ;;  %v9422_v18 = vld [vmem:[%s9197_s13 + $0x18] sm:$0xff] }
 0x202   : > { %7490 = vmatpush3.bf16.msra.mxu1 %v7487_v52 }
 0x203   : > { %7492 = vmatprep.subr.bf16.mxu1 %v7491_v61 }
 0x204   : > { %7462 = vmatpush1.bf16.msra.mxu0 %v7461_v53 }
 0x205   : > { %7464 = vmatprep.subr.bf16.mxu0 %v7463_v57 }
 0x206   : > { %7494 = vmatpush3.bf16.msra.mxu1 %v7491_v61 }
 0x208   : > { %7466 = vmatpush1.bf16.msra.mxu0 %v7465_v62 }
 0x284   : > { %v1235_v28 = vpop.xlane.xlu0 %1234 }
 0x285   : > { %v1239_v29 = vmul.f32 0.0078125, %v1235_v28  ;;  %v6805_v28 = vld [vmem:[%s9233_s26] ss:$0 sm:$0xff] }
 0x287   : > { %v9298_v30 = vsub.f32 %v1230_v2, %v1239_v29  ;;  %v7467_v2 = vpack.c.bf16 %v1309_v0, %v1306_v63 }
 0x288   : > { %v1237_v31 = vpop.xlane.xlu0 %1236 }
 0x289   : > { %v1240_v32 = vmul.f32 0.0078125, %v1237_v31  ;;  %v1243_v33 = vmul.f32 %v9298_v30, %v9298_v30  ;;  %7468 = vmatprep.subr.bf16.mxu0 %v7467_v2  ;;  %v6806_v31 = vld [vmem:[%s9239_s8] ss:$0 sm:$0xff] }
 0x28a   : > { %7470 = vmatpush1.bf16.msra.mxu0 %v7469_v8 }
 0x28b   : > { %1245 = vadd.xlane.f32.xlu1 %v1243_v33  ;;  %v9302_v34 = vsub.f32 %v1231_v3, %v1240_v32  ;;  %v1304_v3 = vld [vmem:[%s9187_s12 + $0x118] sm:$0xff]  ;;  %7472 = vmatprep.subr.bf16.mxu0 %v7471_v12  ;;  %v9408_v12 = vld [vmem:[%s9197_s13 + $0x10] sm:$0xff]  ;;  %s10686_s12 = sld [smem:[#allocation43_spill]] }
 0x28c   : > { %v7495_v7 = vpack.c.bf16 %v1304_v3, %v1301_v1 }
 0x28d   : > { %v1244_v35 = vmul.f32 %v9302_v34, %v9302_v34 }
 0x28e   : > { %7496 = vmatprep.subr.bf16.mxu1 %v7495_v7  ;;  %7474 = vmatpush1.bf16.msra.mxu0 %v7473_v17 }
 0x28f   : > { %1247 = vadd.xlane.f32.xlu1 %v1244_v35  ;;  %7498 = vmatpush3.bf16.msra.mxu1 %v7495_v7 }
 0x290   : > { %7500 = vmatprep.subr.bf16.mxu1 %v7499_v16  ;;  %7188 = vmatprep.subr.mxu0 %v8560_v6 }
 0x293   : > { %7502 = vmatpush3.bf16.msra.mxu1 %v7499_v16 }
 0x294   : > { %7504 = vmatprep.subr.bf16.mxu1 %v7503_v20 }
 0x297   : > { %7506 = vmatpush3.bf16.msra.mxu1 %v7503_v20 }
 0x298   : > { %7143 = vmatprep.subr.mxu1 %v8560_v6 }
 0x318   : > { %v1246_v21 = vpop.xlane.xlu1 %1245 }
 0x319   : > { %v1249_v22 = vmul.f32 0.0078125, %v1246_v21 }
 0x31b   : > { %v1251_v23 = vadd.f32 1e-05, %v1249_v22 }
 0x31c   : > { %v1248_v24 = vpop.xlane.xlu1 %1247 }
 0x31d   : > { %7977 = vrsqrt.f32 %v1251_v23  ;;  %v1250_v25 = vmul.f32 0.0078125, %v1248_v24 }
 0x31f   : > { %v1252_v26 = vadd.f32 1e-05, %v1250_v25 }
 0x321   : > { %7979 = vrsqrt.f32 %v1252_v26 }
 0x327   : > { %v7978_v27 = vpop.eup %7977 }
 0x328   : > { %v1255_v29 = vmul.f32 %v7978_v27, %v9298_v30  ;;  %v1319_v30 = vlaneseq  ;;  %v9442_v27 = vld [vmem:[%s9197_s13 + $0x20] sm:$0xff] }
 0x32a   : > { %v1261_v32 = vmul.f32 %v6805_v28, %v1255_v29  ;;  %v9351_v39 = vshrl.u32 %v1319_v30, 7 }
 0x32b   : > { %v7980_v33 = vpop.eup %7979 }
 0x32c   : > { %v1267_v35 = vadd.f32 %v6806_v31, %v1261_v32  ;;  %v1256_v36 = vmul.f32 %v7980_v33, %v9302_v34  ;;  %v9354_v34 = vsub.s32 0, %v9351_v39  ;;  %v9358_v43 = vsub.s32 1, %v9351_v39  ;;  %v9451_v32 = vld [vmem:[%s9197_s13 + $0x28] sm:$0xff] }
 0x32d   : > { %v1329_v45 = vsub.s32 2, %v9351_v39  ;;  %v9366_v52 = vsub.s32 %v1503_v46, %v9351_v39 }
 0x32e   : > { %1399 = vmatmul.mubr.f32.vlgmr.msra.gmra.mrb[0].mxu0 %v1267_v35  ;;  %7140 = vmatprep.mubr.f32.mxu1 %v1267_v35  ;;  %v1262_v37 = vmul.f32 %v6805_v28, %v1256_v36  ;;  %v1322_v44 = vrot.slane %v1317_v42, %v9354_v34  ;;  %v1326_v47 = vrot.slane %v1317_v42, %v9358_v43 }
 0x32f   : > { %1404 = vmatprep.mubr.f32.mxu0 %v8560_v6  ;;  %v1330_v51 = vrot.slane %v1317_v42, %v1329_v45 }
 0x330   : > { %v1268_v38 = vadd.f32 %v6806_v31, %v1262_v37 }
 0x332   : > { %1405 = vmatmul.mubr.f32.gmra.mrb[2].mxu0 %v1268_v38  ;;  %7141 = vmatmul.mubr.f32.vlgmr.msra.gmra.mrb[0].mxu1 %v1268_v38 }
 0x333   : > { %7145 = vmatprep.mubr.msk.f32.mxu1 %vm8561_vm0, %v8560_v6  ;;  %7190 = vmatprep.mubr.msk.f32.mxu0 %vm8561_vm0, %v8560_v6 }
 0x401   : > { %v1400_v48 = vpop.f32.mrb[0].mxu0 }
 0x402   : > { %v1401_v49 = vadd.f32 %v1400_v48, %v1322_v44  ;;  %v1402_v50 = vpop.f32.mrb[1].mxu0 }
 0x403   : > { %v9368_v53 = vadd.f32 %v1402_v50, %v1326_v47  ;;  %v9474_v50 = vld [vmem:[%s9197_s13 + $0x38] sm:$0xff] }
 0x404   : > { %v9370_v54 = vmul.f32 0.17677669, %v1401_v49 }
 0x405   : > { %v1406_v55 = vpop.f32.mrb[2].mxu0  ;;  %v7142_v56 = vpop.f32.mrb[0].mxu1  ;;  %7144 = vmatpush3.xpose.msk.msra.mxu1 %vm1694_vm1, %v9368_v53 }
 0x406   : > { %v1407_v57 = vadd.f32 %v1406_v55, %v1322_v44  ;;  %v9374_v58 = vadd.f32 %v7142_v56, %v1330_v51  ;;  %v1408_v59 = vpop.f32.mrb[3].mxu0  ;;  %v1477_v60 = vpop.f32.mrb[1].mxu1  ;;  %7148 = vmatprep.subr.mxu1 %v8560_v6  ;;  %v1507_v61 = vrot.slane %v9370_v54, %v9366_v52  ;;  %v1500_v62 = vcombine.high %v9370_v54, %v9370_v54  ;;  %v9465_v44 = vld [vmem:[%s9197_s13 + $0x30] sm:$0xff] }
 0x407   : > { %v9381_v63 = vadd.f32 %v1408_v59, %v1326_v47  ;;  %v9402_v10 = vadd.f32 %v1477_v60, %v1330_v51 }
 0x408   : > { %7146 = vmatmul.mubr.msk.f32.vlgmr.msra.gmra.mrb[2].mxu1 %vm1694_vm1, %v9370_v54  ;;  %v1523_v0 = vrot.slane %v1507_v61, %v9366_v52  ;;  %v1515_v1 = vcombine.high %v1507_v61, %v1507_v61  ;;  %v1514_v2 = vrot.slane %v1500_v62, %v9366_v52  ;;  %v9387_v3 = vmul.f32 0.17677669, %v1407_v57 }
 0x409   : > { %7149 = vmatpush3.xpose.msk.msra.mxu1 %vm1694_vm1, %v9381_v63  ;;  %7150 = vmatprep.mubr.msk.f32.mxu1 %vm8561_vm0, %v8560_v6 }
 0x40a   : > { %7153 = vmatprep.subr.mxu1 %v8560_v6  ;;  %v9398_v5 = vrot.slane %v1523_v0, %v9354_v34  ;;  %v1537_v7 = vrot.slane %v1515_v1, %v9366_v52  ;;  %v1545_v8 = vcombine.high %v1523_v0, %v1523_v0  ;;  %v1530_v9 = vrot.slane %v1514_v2, %v9366_v52 }
 0x40b   : > { %v1516_v13 = vcombine.high %v1514_v2, %v1514_v2  ;;  %v1556_v22 = vrot.slane %v9387_v3, %v9366_v52  ;;  %v1549_v35 = vcombine.high %v9387_v3, %v9387_v3 }
 0x40c   : > { %7151 = vmatmul.mubr.msk.f32.vlgmr.msra.gmra.mrb[4].mxu1 %vm1694_vm1, %v9387_v3  ;;  %v1678_v14 = vmul.f32 %v9398_v5, %v9394_v4  ;;  %v9415_v15 = vrot.slane %v1537_v7, %v9354_v34  ;;  %v9418_v16 = vrot.slane %v1545_v8, %v9354_v34  ;;  %v1547_v17 = vcombine.high %v1537_v7, %v1537_v7 }
 0x40d   : > { %7154 = vmatpush3.msra.mxu1 %v9402_v10  ;;  %v9425_v19 = vrot.slane %v1530_v9, %v9354_v34  ;;  %v1544_v20 = vrot.slane %v1516_v13, %v9366_v52  ;;  %v1546_v21 = vcombine.high %v1530_v9, %v1530_v9  ;;  %7155 = vmatprep.mubr.msk.f32.mxu1 %vm8561_vm0, %v8560_v6 }
 0x40e   : > { %v1695_v23 = vsel %vm1694_vm1, %v1678_v14, 0.0  ;;  %v1679_v24 = vmul.f32 %v9415_v15, %v9405_v11  ;;  %v1680_v25 = vmul.f32 %v9418_v16, %v9408_v12  ;;  %v9436_v26 = vrot.slane %v1547_v17, %v9354_v34  ;;  %7158 = vmatprep.subr.mxu1 %v8560_v6 }
 0x40f   : > { %1696 = vadd.xlane.f32.xlu0 %v1695_v23  ;;  %v9445_v28 = vrot.slane %v1544_v20, %v9354_v34  ;;  %v1548_v33 = vcombine.high %v1544_v20, %v1544_v20  ;;  %v1572_v36 = vrot.slane %v1556_v22, %v9366_v52  ;;  %v1682_v38 = vmul.f32 %v9425_v19, %v9442_v27 }
 0x410   : > { %v1698_v29 = vsel %vm1694_vm1, %v1679_v24, 0.0  ;;  %v1681_v31 = vmul.f32 %v9436_v26, %v9422_v18  ;;  %v1701_v37 = vsel %vm1694_vm1, %v1680_v25, 0.0  ;;  %v9460_v40 = vrot.slane %v1546_v21, %v9354_v34 }
 0x411   : > { %1699 = vadd.xlane.f32.xlu1 %v1698_v29  ;;  %v1564_v41 = vcombine.high %v1556_v22, %v1556_v22  ;;  %v1683_v42 = vmul.f32 %v9445_v28, %v9451_v32  ;;  %v9469_v47 = vrot.slane %v1548_v33, %v9354_v34  ;;  %v1563_v49 = vrot.slane %v1549_v35, %v9366_v52 }
 0x412   : > { %v1704_v46 = vsel %vm1694_vm1, %v1681_v31, 0.0  ;;  %v1707_v51 = vsel %vm1694_vm1, %v1682_v38, 0.0  ;;  %v1684_v55 = vmul.f32 %v9460_v40, %v9465_v44  ;;  %v9480_v56 = vrot.slane %v1572_v36, %v9354_v34 }
 0x413   : > { %1702 = vadd.xlane.f32.xlu0 %v1701_v37  ;;  %v1586_v48 = vrot.slane %v1564_v41, %v9366_v52  ;;  %v1594_v57 = vcombine.high %v1572_v36, %v1572_v36  ;;  %v1710_v59 = vsel %vm1694_vm1, %v1683_v42, 0.0  ;;  %v1685_v60 = vmul.f32 %v9469_v47, %v9474_v50 }
 0x414   : > { %v1565_v0 = vcombine.high %v1563_v49, %v1563_v49  ;;  %v1713_v1 = vsel %vm1694_vm1, %v1684_v55, 0.0  ;;  %v1686_v2 = vmul.f32 %v9480_v56, %v9394_v4  ;;  %v1579_v8 = vrot.slane %v1563_v49, %v9366_v52 }
 0x415   : > { %1705 = vadd.xlane.f32.xlu1 %v1704_v46  ;;  %v9486_v61 = vrot.slane %v1586_v48, %v9354_v34  ;;  %v1596_v62 = vcombine.high %v1586_v48, %v1586_v48  ;;  %v9492_v7 = vrot.slane %v1594_v57, %v9354_v34  ;;  %v1716_v9 = vsel %vm1694_vm1, %v1685_v60, 0.0 }
 0x416   : > { %v1593_v17 = vrot.slane %v1565_v0, %v9366_v52  ;;  %v1719_v20 = vsel %vm1694_vm1, %v1686_v2, 0.0  ;;  %v9506_v22 = vrot.slane %v1579_v8, %v9354_v34  ;;  %v1595_v23 = vcombine.high %v1579_v8, %v1579_v8 }
 0x417   : > { %1708 = vadd.xlane.f32.xlu0 %v1707_v51  ;;  %v1687_v13 = vmul.f32 %v9486_v61, %v9405_v11  ;;  %v9499_v14 = vrot.slane %v1596_v62, %v9354_v34  ;;  %v1688_v21 = vmul.f32 %v9492_v7, %v9408_v12  ;;  %v1752_v2 = vand.u32 127, %v1319_v30 }
 0x418   : > { %v9512_v29 = vrot.slane %v1593_v17, %v9354_v34  ;;  %v1597_v52 = vcombine.high %v1593_v17, %v1593_v17  ;;  %v1690_v33 = vmul.f32 %v9506_v22, %v9442_v27  ;;  %v9518_v35 = vrot.slane %v1595_v23, %v9354_v34 }
 0x419   : > { %1711 = vadd.xlane.f32.xlu1 %v1710_v59  ;;  %v1722_v24 = vsel %vm1694_vm1, %v1687_v13, 0.0  ;;  %v1689_v25 = vmul.f32 %v9499_v14, %v9422_v18  ;;  %v1725_v31 = vsel %vm1694_vm1, %v1688_v21, 0.0 }
 0x41a   : > { %v1691_v37 = vmul.f32 %v9512_v29, %v9451_v32  ;;  %v9524_v38 = vrot.slane %v1597_v52, %v9354_v34  ;;  %v1731_v41 = vsel %vm1694_vm1, %v1690_v33, 0.0  ;;  %v1692_v42 = vmul.f32 %v9518_v35, %v9465_v44 }
 0x41b   : > { %1714 = vadd.xlane.f32.xlu0 %v1713_v1  ;;  %v1728_v36 = vsel %vm1694_vm1, %v1689_v25, 0.0 }
 0x41c   : > { %v1734_v46 = vsel %vm1694_vm1, %v1691_v37, 0.0  ;;  %v1693_v48 = vmul.f32 %v9524_v38, %v9474_v50  ;;  %v1737_v49 = vsel %vm1694_vm1, %v1692_v42, 0.0 }
 0x41d   : > { %1717 = vadd.xlane.f32.xlu1 %v1716_v9  ;;  %v9536_v9 = vsub.s32 %v1752_v2, %v9351_v39 }
 0x41e   : > { %v1740_v51 = vsel %vm1694_vm1, %v1693_v48, 0.0 }
 0x41f   : > { %1720 = vadd.xlane.f32.xlu0 %v1719_v20 }
 0x421   : > { %1723 = vadd.xlane.f32.xlu1 %v1722_v24 }
 0x423   : > { %1726 = vadd.xlane.f32.xlu0 %v1725_v31 }
 0x425   : > { %1729 = vadd.xlane.f32.xlu1 %v1728_v36 }
 0x427   : > { %1732 = vadd.xlane.f32.xlu0 %v1731_v41 }
 0x429   : > { %1735 = vadd.xlane.f32.xlu1 %v1734_v46 }
 0x42b   : > { %1738 = vadd.xlane.f32.xlu0 %v1737_v49 }
 0x42d   : > { %1741 = vadd.xlane.f32.xlu1 %v1740_v51 }
 0x49c   : > { %v1697_v55 = vpop.xlane.xlu0 %1696 }
 0x49d   : > { %v1756_v21 = vrot.slane %v1697_v55, %v9536_v9 }
 0x49e   : > { %v1700_v57 = vpop.xlane.xlu1 %1699 }
 0x49f   : > { %v1760_v17 = vrot.slane %v1700_v57, %v9536_v9 }
 0x4a0   : > { %v1703_v59 = vpop.xlane.xlu0 %1702 }
 0x4a1   : > { %v1764_v23 = vrot.slane %v1703_v59, %v9536_v9  ;;  %v1786_v24 = vsel %vm1785_vm2, %v1760_v17, %v1756_v21 }
 0x4a2   : > { %v1706_v60 = vpop.xlane.xlu1 %1705 }
 0x4a3   : > { %v1768_v30 = vrot.slane %v1706_v60, %v9536_v9  ;;  %v1788_v33 = vsel %vm1787_vm3, %v1764_v23, %v1786_v24 }
 0x4a4   : > { %v1709_v62 = vpop.xlane.xlu0 %1708 }
 0x4a5   : > { %v1772_v42 = vrot.slane %v1709_v62, %v9536_v9  ;;  %v1790_v46 = vsel %vm1789_vm4, %v1768_v30, %v1788_v33  ;;  %v9569_v33 = vld [vmem:[%s10678_s28] sm:$0xff] }
 0x4a6   : > { %v1712_v0 = vpop.xlane.xlu1 %1711 }
 0x4a7   : > { %v1776_v55 = vrot.slane %v1712_v0, %v9536_v9  ;;  %v1792_v57 = vsel %vm1791_vm5, %v1772_v42, %v1790_v46 }
 0x4a8   : > { %v1715_v1 = vpop.xlane.xlu0 %1714 }
 0x4a9   : > { %v1780_v62 = vrot.slane %v1715_v1, %v9536_v9 }
 0x4aa   : > { %v1718_v8 = vpop.xlane.xlu1 %1717 }
 0x4ab   : > { %v1784_v0 = vrot.slane %v1718_v8, %v9536_v9 }
 0x4ac   : > { %v1721_v13 = vpop.xlane.xlu0 %1720 }
 0x4ad   : > { %v1886_v31 = vrot.slane %v1721_v13, %v9536_v9 }
 0x4ae   : > { %v1724_v20 = vpop.xlane.xlu1 %1723 }
 0x4af   : > { %v1890_v25 = vrot.slane %v1724_v20, %v9536_v9  ;;  %v1794_v20 = vsel %vm1793_vm6, %v1776_v55, %v1792_v57 }
 0x4b0   : > { %v1727_v52 = vpop.xlane.xlu0 %1726 }
 0x4b1   : > { %v1894_v36 = vrot.slane %v1727_v52, %v9536_v9  ;;  %v1915_v41 = vsel %vm1785_vm2, %v1890_v25, %v1886_v31  ;;  %v1796_v25 = vsel %vm1795_vm7, %v1780_v62, %v1794_v20 }
 0x4b2   : > { %v1730_v37 = vpop.xlane.xlu1 %1729  ;;  %v1798_v30 = vsel %vm1797_vm8, %v1784_v0, %v1796_v25 }
 0x4b3   : > { %v1898_v48 = vrot.slane %v1730_v37, %v9536_v9  ;;  %v1916_v51 = vsel %vm1787_vm3, %v1894_v36, %v1915_v41 }
 0x4b4   : > { %v1733_v49 = vpop.xlane.xlu0 %1732 }
 0x4b5   : > { %v1902_v59 = vrot.slane %v1733_v49, %v9536_v9  ;;  %v1917_v2 = vsel %vm1789_vm4, %v1898_v48, %v1916_v51  ;;  %v9577_v48 = vld [vmem:[%s10679_s29 + $0x8] sm:$0xff] }
 0x4b6   : > { %v1736_v60 = vpop.xlane.xlu1 %1735 }
 0x4b7   : > { %v1906_v13 = vrot.slane %v1736_v60, %v9536_v9  ;;  %v1918_v21 = vsel %vm1791_vm5, %v1902_v59, %v1917_v2 }
 0x4b8   : > { %v1739_v17 = vpop.xlane.xlu0 %1738 }
 0x4b9   : > { %v1910_v23 = vrot.slane %v1739_v17, %v9536_v9  ;;  %v1919_v52 = vsel %vm1793_vm6, %v1906_v13, %v1918_v21 }
 0x4ba   : > { %v1742_v24 = vpop.xlane.xlu1 %1741 }
 0x4bb   : > { %v1914_v1 = vrot.slane %v1742_v24, %v9536_v9  ;;  %v1920_v37 = vsel %vm1795_vm7, %v1910_v23, %v1919_v52 }
 0x4bd   : > { %v1921_v42 = vsel %vm1797_vm8, %v1914_v1, %v1920_v37 }
 0x4db   : > { %v1871_v31 = vpop.f32.mrb[2].mxu1 }
 0x4dc   : > { %v1872_v36 = vadd.f32 %v1871_v31, %v1798_v30  ;;  %v7147_v8 = vpop.f32.mrb[3].mxu1 }
 0x4de   : > { %v1998_v41 = vadd.f32 %v1872_v36, %v9569_v33 }
 0x4df   : > { %v1994_v46 = vpop.f32.mrb[4].mxu1 }
 0x4e0   : > { %v1995_v49 = vadd.f32 %v1994_v46, %v1921_v42  ;;  %v7152_v51 = vpop.f32.mrb[5].mxu1  ;;  %v2001_v55 = vsel %vm2000_vm9, %v1998_v41, -inf }
 0x4e1   : > { %2002 = vmax.xlane.f32.xlu0 %v2001_v55 }
 0x4e2   : > { %v1999_v57 = vadd.f32 %v1995_v49, %v9577_v48 }
 0x4e4   : > { %v2004_v59 = vsel %vm2000_vm9, %v1999_v57, -inf }
 0x4e5   : > { %2005 = vmax.xlane.f32.xlu1 %v2004_v59 }
 0x4f6   : > { %2329 = vrot.lane.b32.xlu1 %v9370_v54, %s8563_s15 }
 0x56e   : > { %v2003_v60 = vpop.xlane.xlu0 %2002 }
 0x56f   : > { %v2007_v2 = vsub.f32 %v1998_v41, %v2003_v60 }
 0x571   : > { %v2009_v62 = vmul.f32 1.442695, %v2007_v2 }
 0x572   : > { %v2006_v13 = vpop.xlane.xlu1 %2005 }
 0x573   : > { %7981 = vpow2.f32 %v2009_v62  ;;  %v2008_v17 = vsub.f32 %v1999_v57, %v2006_v13 }
 0x575   : > { %v2011_v20 = vmul.f32 1.442695, %v2008_v17 }
 0x576   : > { %v2330_v25 = vpop.permute.xlu1 %2329 }
 0x577   : > { %7983 = vpow2.f32 %v2011_v20 }
 0x57d   : > { %v7982_v21 = vpop.eup %7981 }
 0x57e   : > { %v2013_v0 = vsel %vm2000_vm9, %v7982_v21, 0.0 }
 0x57f   : > { %2014 = vadd.xlane.f32.xlu0 %v2013_v0 }
 0x581   : > { %v7984_v23 = vpop.eup %7983 }
 0x582   : > { %v2016_v24 = vsel %vm2000_vm9, %v7984_v23, 0.0 }
 0x583   : > { %2017 = vadd.xlane.f32.xlu1 %v2016_v24 }
 0x594   : > { %2457 = vrot.lane.b32.xlu1 %v9381_v63, %s8563_s15 }
 0x595   : > { %2331 = vrot.lane.b32.xlu0 %v9368_v53, %s8563_s15 }
 0x598   : > { %2455 = vrot.lane.b32.xlu1 %v9387_v3, %s8563_s15 }
 0x599   : > { %2177 = vrot.lane.b32.xlu0 %v9394_v4, %s8564_s20 }
 0x59c   : > { %2179 = vrot.lane.b32.xlu1 %v9405_v11, %s8564_s20 }
 0x59d   : > { %2181 = vrot.lane.b32.xlu0 %v9408_v12, %s8564_s20 }
 0x5a0   : > { %2183 = vrot.lane.b32.xlu1 %v9422_v18, %s8564_s20 }
 0x5a1   : > { %2185 = vrot.lane.b32.xlu0 %v9442_v27, %s8564_s20 }
 0x5a4   : > { %2187 = vrot.lane.b32.xlu1 %v9451_v32, %s8564_s20 }
 0x5a5   : > { %2189 = vrot.lane.b32.xlu0 %v9465_v44, %s8564_s20 }
 0x5a8   : > { %2191 = vrot.lane.b32.xlu1 %v9474_v50, %s8564_s20 }
 0x60c   : > { %v2015_v52 = vpop.xlane.xlu0 %2014 }
 0x60d   : > { %7985 = vrcp.f32 %v2015_v52 }
 0x610   : > { %v2018_v1 = vpop.xlane.xlu1 %2017  ;;  %v2332_v30 = vpop.permute.xlu0 %2331 }
 0x611   : > { %7987 = vrcp.f32 %v2018_v1 }
 0x614   : > { %v2458_v31 = vpop.permute.xlu1 %2457  ;;  %v2178_v36 = vpop.permute.xlu0 %2177 }
 0x615   : > { %v2201_v8 = vmul.f32 %v2178_v36, %v9398_v5  ;;  %v2209_v0 = vmul.f32 %v2178_v36, %v9480_v56 }
 0x617   : > { %v7986_v37 = vpop.eup %7985  ;;  %2233 = vrot.lane.b32.xlu0 %v2201_v8, %s8563_s15 }
 0x618   : > { %v2456_v41 = vpop.permute.xlu1 %2455  ;;  %v2182_v42 = vpop.permute.xlu0 %2181  ;;  %v2021_v46 = vmul.f32 %v7986_v37, %v7982_v21 }
 0x619   : > { %v2203_v49 = vmul.f32 %v2182_v42, %v9418_v16  ;;  %v2211_v52 = vmul.f32 %v2182_v42, %v9492_v7 }
 0x61a   : > { %7156 = vmatmul.mubr.msk.f32.vlgmr.msra.gmra.mrb[6].mxu1 %vm2000_vm9, %v2021_v46 }
 0x61b   : > { %v7988_v51 = vpop.eup %7987  ;;  %7159 = vmatpush3.msra.mxu1 %v9374_v58  ;;  %2237 = vrot.lane.b32.xlu0 %v2203_v49, %s8563_s15 }
 0x61c   : > { %v2180_v55 = vpop.permute.xlu1 %2179  ;;  %v2186_v57 = vpop.permute.xlu0 %2185  ;;  %7160 = vmatprep.mubr.msk.f32.mxu1 %vm8561_vm0, %v8560_v6  ;;  %v2022_v59 = vmul.f32 %v7988_v51, %v7984_v23  ;;  %7163 = vmatprep.subr.mxu1 %v8560_v6 }
 0x61d   : > { %v2202_v60 = vmul.f32 %v2180_v55, %v9415_v15  ;;  %v2205_v2 = vmul.f32 %v2186_v57, %v9425_v19 }
 0x61e   : > { %7161 = vmatmul.mubr.msk.f32.vlgmr.msra.gmra.mrb[8].mxu1 %vm2000_vm9, %v2022_v59 }
 0x61f   : > { %2235 = vrot.lane.b32.xlu1 %v2202_v60, %s8563_s15  ;;  %2241 = vrot.lane.b32.xlu0 %v2205_v2, %s8563_s15 }
 0x620   : > { %v2184_v62 = vpop.permute.xlu1 %2183  ;;  %v2190_v13 = vpop.permute.xlu0 %2189  ;;  %7165 = vmatprep.mubr.msk.f32.mxu1 %vm8561_vm0, %v8560_v6 }
 0x621   : > { %v2204_v17 = vmul.f32 %v2184_v62, %v9436_v26  ;;  %v2207_v20 = vmul.f32 %v2190_v13, %v9460_v40  ;;  %v2215_v36 = vmul.f32 %v2190_v13, %v9518_v35 }
 0x622   : > { %7164 = vmatpush3.xpose.msk.msra.mxu1 %vm1694_vm1, %v2332_v30  ;;  %v2213_v30 = vmul.f32 %v2186_v57, %v9506_v22 }
 0x623   : > { %2239 = vrot.lane.b32.xlu1 %v2204_v17, %s8563_s15  ;;  %2245 = vrot.lane.b32.xlu0 %v2207_v20, %s8563_s15 }
 0x624   : > { %v2188_v21 = vpop.permute.xlu1 %2187  ;;  %7168 = vmatprep.subr.mxu1 %v8560_v6 }
 0x625   : > { %v2206_v23 = vmul.f32 %v2188_v21, %v9445_v28  ;;  %7166 = vmatmul.mubr.msk.f32.vlgmr.msra.gmra.mrb[10].mxu1 %vm1694_vm1, %v2330_v25  ;;  %v2210_v25 = vmul.f32 %v2180_v55, %v9486_v61  ;;  %v2214_v8 = vmul.f32 %v2188_v21, %v9512_v29 }
 0x626   : > { %7169 = vmatpush3.xpose.msk.msra.mxu1 %vm1694_vm1, %v2458_v31  ;;  %7170 = vmatprep.mubr.msk.f32.mxu1 %vm8561_vm0, %v8560_v6  ;;  %v2212_v31 = vmul.f32 %v2184_v62, %v9499_v14 }
 0x627   : > { %2243 = vrot.lane.b32.xlu1 %v2206_v23, %s8563_s15  ;;  %2249 = vrot.lane.b32.xlu0 %v2209_v0, %s8563_s15 }
 0x628   : > { %v2192_v24 = vpop.permute.xlu1 %2191  ;;  %7173 = vmatprep.subr.mxu1 %v8560_v6 }
 0x629   : > { %v2208_v1 = vmul.f32 %v2192_v24, %v9469_v47  ;;  %7171 = vmatmul.mubr.msk.f32.vlgmr.msra.gmra.mrb[12].mxu1 %vm1694_vm1, %v2456_v41  ;;  %v2216_v37 = vmul.f32 %v2192_v24, %v9524_v38 }
 0x62a   : > { %7175 = vmatprep.mubr.msk.f32.mxu1 %vm8561_vm0, %v8560_v6 }
 0x62b   : > { %2247 = vrot.lane.b32.xlu1 %v2208_v1, %s8563_s15  ;;  %2253 = vrot.lane.b32.xlu0 %v2211_v52, %s8563_s15 }
 0x62f   : > { %2251 = vrot.lane.b32.xlu1 %v2210_v25, %s8563_s15  ;;  %2257 = vrot.lane.b32.xlu0 %v2213_v30, %s8563_s15 }
 0x633   : > { %2255 = vrot.lane.b32.xlu1 %v2212_v31, %s8563_s15  ;;  %2261 = vrot.lane.b32.xlu0 %v2215_v36, %s8563_s15 }
 0x637   : > { %2259 = vrot.lane.b32.xlu1 %v2214_v8, %s8563_s15 }
 0x63b   : > { %2263 = vrot.lane.b32.xlu1 %v2216_v37, %s8563_s15 }
 0x689   : > { %v2234_v41 = vpop.permute.xlu0 %2233 }
 0x68a   : > { %v2281_v42 = vsel %vm1694_vm1, %v2234_v41, 0.0 }
 0x68b   : > { %2282 = vadd.xlane.f32.xlu0 %v2281_v42 }
 0x68d   : > { %v2238_v46 = vpop.permute.xlu0 %2237 }
 0x68e   : > { %v2287_v49 = vsel %vm1694_vm1, %v2238_v46, 0.0 }
 0x68f   : > { %2288 = vadd.xlane.f32.xlu0 %v2287_v49 }
 0x691   : > { %v2236_v51 = vpop.permute.xlu1 %2235  ;;  %v2242_v55 = vpop.permute.xlu0 %2241 }
 0x692   : > { %v2284_v57 = vsel %vm1694_vm1, %v2236_v51, 0.0  ;;  %v2293_v20 = vsel %vm1694_vm1, %v2242_v55, 0.0 }
 0x693   : > { %2285 = vadd.xlane.f32.xlu1 %v2284_v57 }
 0x695   : > { %v2240_v59 = vpop.permute.xlu1 %2239  ;;  %v2246_v60 = vpop.permute.xlu0 %2245 }
 0x696   : > { %v2290_v2 = vsel %vm1694_vm1, %v2240_v59, 0.0  ;;  %v2299_v23 = vsel %vm1694_vm1, %v2246_v60, 0.0 }
 0x697   : > { %2291 = vadd.xlane.f32.xlu0 %v2290_v2 }
 0x699   : > { %v2244_v62 = vpop.permute.xlu1 %2243  ;;  %v2250_v13 = vpop.permute.xlu0 %2249 }
 0x69a   : > { %v2296_v17 = vsel %vm1694_vm1, %v2244_v62, 0.0  ;;  %v2305_v25 = vsel %vm1694_vm1, %v2250_v13, 0.0 }
 0x69b   : > { %2297 = vadd.xlane.f32.xlu1 %v2296_v17  ;;  %2294 = vadd.xlane.f32.xlu0 %v2293_v20 }
 0x69d   : > { %v2248_v21 = vpop.permute.xlu1 %2247  ;;  %v2254_v24 = vpop.permute.xlu0 %2253 }
 0x69e   : > { %v2302_v0 = vsel %vm1694_vm1, %v2248_v21, 0.0  ;;  %v2311_v8 = vsel %vm1694_vm1, %v2254_v24, 0.0 }
 0x69f   : > { %2303 = vadd.xlane.f32.xlu1 %v2302_v0  ;;  %2300 = vadd.xlane.f32.xlu0 %v2299_v23 }
 0x6a1   : > { %v2252_v52 = vpop.permute.xlu1 %2251  ;;  %v2258_v30 = vpop.permute.xlu0 %2257 }
 0x6a2   : > { %v2308_v1 = vsel %vm1694_vm1, %v2252_v52, 0.0  ;;  %v2317_v42 = vsel %vm1694_vm1, %v2258_v30, 0.0 }
 0x6a3   : > { %2309 = vadd.xlane.f32.xlu1 %v2308_v1  ;;  %2306 = vadd.xlane.f32.xlu0 %v2305_v25 }
 0x6a5   : > { %v2256_v31 = vpop.permute.xlu1 %2255  ;;  %v2262_v46 = vpop.permute.xlu0 %2261 }
 0x6a6   : > { %v2314_v36 = vsel %vm1694_vm1, %v2256_v31, 0.0  ;;  %v2323_v55 = vsel %vm1694_vm1, %v2262_v46, 0.0 }
 0x6a7   : > { %2315 = vadd.xlane.f32.xlu1 %v2314_v36  ;;  %2312 = vadd.xlane.f32.xlu0 %v2311_v8 }
 0x6a9   : > { %v2260_v37 = vpop.permute.xlu1 %2259 }
 0x6aa   : > { %v2320_v41 = vsel %vm1694_vm1, %v2260_v37, 0.0 }
 0x6ab   : > { %2321 = vadd.xlane.f32.xlu1 %v2320_v41  ;;  %2318 = vadd.xlane.f32.xlu0 %v2317_v42 }
 0x6ad   : > { %v2264_v49 = vpop.permute.xlu1 %2263 }
 0x6ae   : > { %v2326_v51 = vsel %vm1694_vm1, %v2264_v49, 0.0 }
 0x6af   : > { %2327 = vadd.xlane.f32.xlu1 %v2326_v51  ;;  %2324 = vadd.xlane.f32.xlu0 %v2323_v55 }
 0x6ed   : > { %v9674_v57 = vpop.f32.mrb[6].mxu1 }
 0x6ee   : > { %v7157_v59 = vpop.f32.mrb[7].mxu1 }
 0x6f1   : > { %v9676_v60 = vpop.f32.mrb[8].mxu1 }
 0x6f2   : > { %v7162_v2 = vpop.f32.mrb[9].mxu1 }
 0x6f8   : > { %v2451_v62 = vpop.f32.mrb[10].mxu1 }
 0x6f9   : > { %v7167_v13 = vpop.f32.mrb[11].mxu1 }
 0x6fc   : > { %v2577_v17 = vpop.f32.mrb[12].mxu1 }
 0x6fd   : > { %v7172_v20 = vpop.f32.mrb[13].mxu1 }
 0x718   : > { %v2283_v21 = vpop.xlane.xlu0 %2282 }
 0x719   : > { %v2344_v52 = vrot.slane %v2283_v21, %v9536_v9 }
 0x71c   : > { %v2289_v0 = vpop.xlane.xlu0 %2288 }
 0x71d   : > { %v2352_v31 = vrot.slane %v2289_v0, %v9536_v9 }
 0x720   : > { %v2286_v23 = vpop.xlane.xlu1 %2285 }
 0x721   : > { %v2348_v24 = vrot.slane %v2286_v23, %v9536_v9 }
 0x723   : > { %v2373_v25 = vsel %vm1785_vm2, %v2348_v24, %v2344_v52 }
 0x724   : > { %v2292_v1 = vpop.xlane.xlu0 %2291  ;;  %v2374_v37 = vsel %vm1787_vm3, %v2352_v31, %v2373_v25 }
 0x725   : > { %v2356_v30 = vrot.slane %v2292_v1, %v9536_v9 }
 0x727   : > { %v2375_v42 = vsel %vm1789_vm4, %v2356_v30, %v2374_v37 }
 0x728   : > { %v2298_v36 = vpop.xlane.xlu1 %2297  ;;  %v2295_v8 = vpop.xlane.xlu0 %2294 }
 0x729   : > { %v2360_v41 = vrot.slane %v2295_v8, %v9536_v9  ;;  %v2364_v46 = vrot.slane %v2298_v36, %v9536_v9 }
 0x72b   : > { %v2376_v49 = vsel %vm1791_vm5, %v2360_v41, %v2375_v42 }
 0x72c   : > { %v2304_v51 = vpop.xlane.xlu1 %2303  ;;  %v2301_v55 = vpop.xlane.xlu0 %2300  ;;  %v2377_v13 = vsel %vm1793_vm6, %v2364_v46, %v2376_v49 }
 0x72d   : > { %v2372_v59 = vrot.slane %v2304_v51, %v9536_v9  ;;  %v2368_v2 = vrot.slane %v2301_v55, %v9536_v9 }
 0x72f   : > { %v2378_v20 = vsel %vm1795_vm7, %v2368_v2, %v2377_v13 }
 0x730   : > { %v2310_v21 = vpop.xlane.xlu1 %2309  ;;  %v2307_v0 = vpop.xlane.xlu0 %2306  ;;  %v2379_v23 = vsel %vm1797_vm8, %v2372_v59, %v2378_v20 }
 0x731   : > { %v2452_v24 = vadd.f32 %v2451_v62, %v2379_v23  ;;  %v2474_v52 = vrot.slane %v2310_v21, %v9536_v9  ;;  %v2470_v1 = vrot.slane %v2307_v0, %v9536_v9 }
 0x733   : > { %v2581_v25 = vadd.f32 %v2452_v24, %v9569_v33  ;;  %v2499_v37 = vsel %vm1785_vm2, %v2474_v52, %v2470_v1 }
 0x734   : > { %v2316_v30 = vpop.xlane.xlu1 %2315  ;;  %v2313_v31 = vpop.xlane.xlu0 %2312 }
 0x735   : > { %v2478_v36 = vrot.slane %v2313_v31, %v9536_v9  ;;  %v2583_v8 = vsel %vm2000_vm9, %v2581_v25, -inf  ;;  %v2482_v41 = vrot.slane %v2316_v30, %v9536_v9 }
 0x736   : > { %2584 = vmax.xlane.f32.xlu0 %v2583_v8 }
 0x737   : > { %v2500_v42 = vsel %vm1787_vm3, %v2478_v36, %v2499_v37 }
 0x738   : > { %v2322_v62 = vpop.xlane.xlu1 %2321  ;;  %v2319_v46 = vpop.xlane.xlu0 %2318  ;;  %v2501_v55 = vsel %vm1789_vm4, %v2482_v41, %v2500_v42 }
 0x739   : > { %v2486_v49 = vrot.slane %v2319_v46, %v9536_v9  ;;  %v2490_v51 = vrot.slane %v2322_v62, %v9536_v9 }
 0x73b   : > { %v2502_v59 = vsel %vm1791_vm5, %v2486_v49, %v2501_v55 }
 0x73c   : > { %v2328_v2 = vpop.xlane.xlu1 %2327  ;;  %v2325_v13 = vpop.xlane.xlu0 %2324  ;;  %v2503_v0 = vsel %vm1793_vm6, %v2490_v51, %v2502_v59 }
 0x73d   : > { %v2498_v20 = vrot.slane %v2328_v2, %v9536_v9  ;;  %v2494_v21 = vrot.slane %v2325_v13, %v9536_v9 }
 0x73f   : > { %v2504_v23 = vsel %vm1795_vm7, %v2494_v21, %v2503_v0 }
 0x740   : > { %v2505_v24 = vsel %vm1797_vm8, %v2498_v20, %v2504_v23 }
 0x741   : > { %v2578_v52 = vadd.f32 %v2577_v17, %v2505_v24 }
 0x743   : > { %v2582_v1 = vadd.f32 %v2578_v52, %v9577_v48 }
 0x745   : > { %v2586_v30 = vsel %vm2000_vm9, %v2582_v1, -inf }
 0x746   : > { %2587 = vmax.xlane.f32.xlu1 %v2586_v30 }
 0x757   : > { %2683 = vrot.lane.b32.xlu1 %v9374_v58, %s8563_s15 }
 0x75b   : > { %2913 = vrot.lane.b32.xlu1 %v9368_v53, %s8565_s19 }
 0x75f   : > { %3039 = vrot.lane.b32.xlu1 %v9381_v63, %s8565_s19 }
 0x7c3   : > { %v2585_v31 = vpop.xlane.xlu0 %2584 }
 0x7c4   : > { %v2589_v36 = vsub.f32 %v2581_v25, %v2585_v31 }
 0x7c6   : > { %v2591_v8 = vmul.f32 1.442695, %v2589_v36 }
 0x7c8   : > { %7989 = vpow2.f32 %v2591_v8 }
 0x7d2   : > { %v7990_v17 = vpop.eup %7989 }
 0x7d3   : > { %v2588_v37 = vpop.xlane.xlu1 %2587  ;;  %v2595_v41 = vsel %vm2000_vm9, %v7990_v17, 0.0 }
 0x7d4   : > { %v2590_v42 = vsub.f32 %v2582_v1, %v2588_v37  ;;  %2596 = vadd.xlane.f32.xlu0 %v2595_v41 }
 0x7d6   : > { %v2593_v62 = vmul.f32 1.442695, %v2590_v42 }
 0x7d7   : > { %v2684_v46 = vpop.permute.xlu1 %2683 }
 0x7d8   : > { %7991 = vpow2.f32 %v2593_v62 }
 0x7db   : > { %v2914_v49 = vpop.permute.xlu1 %2913 }
 0x7df   : > { %v3040_v51 = vpop.permute.xlu1 %3039 }
 0x7e0   : > { %7189 = vmatpush3.xpose.msk.msra.mxu0 %vm1694_vm1, %v3040_v51 }
 0x7e1   : > { %7198 = vmatprep.subr.mxu0 %v8560_v6 }
 0x7e2   : > { %v7992_v55 = vpop.eup %7991 }
 0x7e3   : > { %v2598_v25 = vsel %vm2000_vm9, %v7992_v55, 0.0 }
 0x7e4   : > { %2599 = vadd.xlane.f32.xlu1 %v2598_v25 }
 0x7ea   : > { %2606 = vrot.lane.b32.xlu0 %v9402_v10, %s8563_s15 }
 0x7ee   : > { %2911 = vrot.lane.b32.xlu0 %v9370_v54, %s8565_s19 }
 0x7f2   : > { %2759 = vrot.lane.b32.xlu0 %v9394_v4, %s8565_s19 }
 0x7f5   : > { %3037 = vrot.lane.b32.xlu1 %v9387_v3, %s8565_s19 }
 0x7f6   : > { %2763 = vrot.lane.b32.xlu0 %v9408_v12, %s8565_s19 }
 0x7f9   : > { %2761 = vrot.lane.b32.xlu1 %v9405_v11, %s8565_s19 }
 0x7fa   : > { %2767 = vrot.lane.b32.xlu0 %v9442_v27, %s8565_s19 }
 0x7fd   : > { %2765 = vrot.lane.b32.xlu1 %v9422_v18, %s8565_s19 }
 0x7fe   : > { %2771 = vrot.lane.b32.xlu0 %v9465_v44, %s8565_s19 }
 0x801   : > { %2769 = vrot.lane.b32.xlu1 %v9451_v32, %s8565_s19 }
 0x805   : > { %2773 = vrot.lane.b32.xlu1 %v9474_v50, %s8565_s19 }
 0x861   : > { %v2597_v4 = vpop.xlane.xlu0 %2596 }
 0x862   : > { %7993 = vrcp.f32 %v2597_v4 }
 0x865   : > { %v2607_v12 = vpop.permute.xlu0 %2606 }
 0x866   : > { %7174 = vmatpush3.msra.mxu1 %v2607_v12 }
 0x867   : > { %7178 = vmatprep.subr.mxu1 %v8560_v6 }
 0x869   : > { %v2912_v11 = vpop.permute.xlu0 %2911 }
 0x86c   : > { %v7994_v27 = vpop.eup %7993 }
 0x86d   : > { %v2760_v59 = vpop.permute.xlu0 %2759  ;;  %v2603_v2 = vmul.f32 %v7994_v27, %v7990_v17 }
 0x86e   : > { %v2783_v18 = vmul.f32 %v2760_v59, %v9398_v5  ;;  %v2791_v52 = vmul.f32 %v2760_v59, %v9480_v56 }
 0x86f   : > { %7176 = vmatmul.mubr.msk.f32.vlgmr.msra.gmra.mrb[14].mxu1 %vm2000_vm9, %v2603_v2 }
 0x870   : > { %7179 = vmatpush3.msra.mxu1 %v2684_v46  ;;  %2815 = vrot.lane.b32.xlu0 %v2783_v18, %s8565_s19 }
 0x871   : > { %v2600_v32 = vpop.xlane.xlu1 %2599  ;;  %v2764_v44 = vpop.permute.xlu0 %2763  ;;  %7180 = vmatprep.mubr.msk.f32.mxu1 %vm8561_vm0, %v8560_v6  ;;  %7183 = vmatprep.subr.mxu1 %v8560_v6 }
 0x872   : > { %7995 = vrcp.f32 %v2600_v32  ;;  %v2785_v50 = vmul.f32 %v2764_v44, %v9418_v16  ;;  %v2793_v1 = vmul.f32 %v2764_v44, %v9492_v7 }
 0x874   : > { %2819 = vrot.lane.b32.xlu0 %v2785_v50, %s8565_s19 }
 0x875   : > { %v3038_v13 = vpop.permute.xlu1 %3037  ;;  %v2768_v36 = vpop.permute.xlu0 %2767 }
 0x876   : > { %7191 = vmatmul.mubr.msk.f32.vlgmr.msra.gmra.mrb[4].mxu0 %vm1694_vm1, %v3038_v13  ;;  %v2787_v17 = vmul.f32 %v2768_v36, %v9425_v19  ;;  %v2795_v37 = vmul.f32 %v2768_v36, %v9506_v22 }
 0x877   : > { %7200 = vmatprep.mubr.msk.f32.mxu0 %vm8561_vm0, %v8560_v6 }
 0x879   : > { %v2762_v20 = vpop.permute.xlu1 %2761  ;;  %v2772_v62 = vpop.permute.xlu0 %2771 }
 0x87a   : > { %v2784_v21 = vmul.f32 %v2762_v20, %v9415_v15  ;;  %v2792_v0 = vmul.f32 %v2762_v20, %v9486_v61  ;;  %v2797_v51 = vmul.f32 %v2772_v62, %v9518_v35 }
 0x87c   : > { %v7996_v23 = vpop.eup %7995  ;;  %2817 = vrot.lane.b32.xlu1 %v2784_v21, %s8565_s19  ;;  %2833 = vrot.lane.b32.xlu0 %v2792_v0, %s8565_s19 }
 0x87d   : > { %v2604_v24 = vmul.f32 %v7996_v23, %v7992_v55  ;;  %v2766_v30 = vpop.permute.xlu1 %2765 }
 0x87e   : > { %v2786_v31 = vmul.f32 %v2766_v30, %v9436_v26  ;;  %v2794_v8 = vmul.f32 %v2766_v30, %v9499_v14 }
 0x87f   : > { %7181 = vmatmul.mubr.msk.f32.vlgmr.msra.gmra.mrb[16].mxu1 %vm2000_vm9, %v2604_v24 }
 0x880   : > { %7184 = vmatpush3.xpose.msk.msra.mxu1 %vm1694_vm1, %v2914_v49  ;;  %2831 = vrot.lane.b32.xlu1 %v2791_v52, %s8565_s19  ;;  %v2789_v49 = vmul.f32 %v2772_v62, %v9460_v40 }
 0x881   : > { %2835 = vrot.lane.b32.xlu0 %v2793_v1, %s8565_s19  ;;  %7185 = vmatprep.mubr.msk.f32.mxu1 %vm8561_vm0, %v8560_v6  ;;  %v2770_v41 = vpop.permute.xlu1 %2769 }
 0x882   : > { %7193 = vmatprep.subr.mxu1 %v8560_v6  ;;  %v2788_v42 = vmul.f32 %v2770_v41, %v9445_v28  ;;  %v2796_v46 = vmul.f32 %v2770_v41, %v9512_v29 }
 0x883   : > { %7186 = vmatmul.mubr.msk.f32.vlgmr.msra.gmra.mrb[18].mxu1 %vm1694_vm1, %v2912_v11 }
 0x884   : > { %2821 = vrot.lane.b32.xlu1 %v2786_v31, %s8565_s19  ;;  %7195 = vmatprep.mubr.msk.f32.mxu1 %vm8561_vm0, %v8560_v6 }
 0x885   : > { %2837 = vrot.lane.b32.xlu0 %v2794_v8, %s8565_s19  ;;  %v2774_v55 = vpop.permute.xlu1 %2773 }
 0x886   : > { %v2790_v25 = vmul.f32 %v2774_v55, %v9469_v47  ;;  %v2798_v4 = vmul.f32 %v2774_v55, %v9524_v38 }
 0x888   : > { %2823 = vrot.lane.b32.xlu1 %v2787_v17, %s8565_s19 }
 0x889   : > { %2839 = vrot.lane.b32.xlu0 %v2795_v37, %s8565_s19 }
 0x88c   : > { %2825 = vrot.lane.b32.xlu1 %v2788_v42, %s8565_s19 }
 0x88d   : > { %2841 = vrot.lane.b32.xlu0 %v2796_v46, %s8565_s19 }
 0x890   : > { %2827 = vrot.lane.b32.xlu1 %v2789_v49, %s8565_s19 }
 0x891   : > { %2843 = vrot.lane.b32.xlu0 %v2797_v51, %s8565_s19 }
 0x894   : > { %2829 = vrot.lane.b32.xlu1 %v2790_v25, %s8565_s19 }
 0x898   : > { %2845 = vrot.lane.b32.xlu1 %v2798_v4, %s8565_s19 }
 0x8e2   : > { %v2816_v12 = vpop.permute.xlu0 %2815 }
 0x8e3   : > { %v2863_v11 = vsel %vm1694_vm1, %v2816_v12, 0.0 }
 0x8e4   : > { %2864 = vadd.xlane.f32.xlu0 %v2863_v11 }
 0x8e6   : > { %v2820_v27 = vpop.permute.xlu0 %2819 }
 0x8e7   : > { %v2869_v59 = vsel %vm1694_vm1, %v2820_v27, 0.0 }
 0x8e8   : > { %2870 = vadd.xlane.f32.xlu0 %v2869_v59 }
 0x8ee   : > { %v2818_v2 = vpop.permute.xlu1 %2817  ;;  %v2834_v18 = vpop.permute.xlu0 %2833 }
 0x8ef   : > { %v2866_v32 = vsel %vm1694_vm1, %v2818_v2, 0.0  ;;  %v2890_v23 = vsel %vm1694_vm1, %v2834_v18, 0.0 }
 0x8f0   : > { %2867 = vadd.xlane.f32.xlu1 %v2866_v32 }
 0x8f2   : > { %v2832_v44 = vpop.permute.xlu1 %2831 }
 0x8f3   : > { %v2836_v50 = vpop.permute.xlu0 %2835  ;;  %v2887_v13 = vsel %vm1694_vm1, %v2832_v44, 0.0 }
 0x8f4   : > { %2888 = vadd.xlane.f32.xlu0 %v2887_v13  ;;  %v2893_v1 = vsel %vm1694_vm1, %v2836_v50, 0.0 }
 0x8f6   : > { %v2822_v20 = vpop.permute.xlu1 %2821 }
 0x8f7   : > { %v2838_v21 = vpop.permute.xlu0 %2837  ;;  %v2872_v0 = vsel %vm1694_vm1, %v2822_v20, 0.0 }
 0x8f8   : > { %2873 = vadd.xlane.f32.xlu1 %v2872_v0  ;;  %2891 = vadd.xlane.f32.xlu0 %v2890_v23  ;;  %v2896_v8 = vsel %vm1694_vm1, %v2838_v21, 0.0 }
 0x8fa   : > { %v2824_v24 = vpop.permute.xlu1 %2823 }
 0x8fb   : > { %v2875_v52 = vsel %vm1694_vm1, %v2824_v24, 0.0  ;;  %v2840_v30 = vpop.permute.xlu0 %2839 }
 0x8fc   : > { %2876 = vadd.xlane.f32.xlu1 %v2875_v52  ;;  %2894 = vadd.xlane.f32.xlu0 %v2893_v1  ;;  %v2899_v42 = vsel %vm1694_vm1, %v2840_v30, 0.0 }
 0x8fe   : > { %v2826_v31 = vpop.permute.xlu1 %2825 }
 0x8ff   : > { %v2878_v36 = vsel %vm1694_vm1, %v2826_v31, 0.0  ;;  %v2842_v17 = vpop.permute.xlu0 %2841 }
 0x900   : > { %2879 = vadd.xlane.f32.xlu1 %v2878_v36  ;;  %2897 = vadd.xlane.f32.xlu0 %v2896_v8  ;;  %v2902_v49 = vsel %vm1694_vm1, %v2842_v17, 0.0 }
 0x902   : > { %v2828_v37 = vpop.permute.xlu1 %2827 }
 0x903   : > { %v2881_v41 = vsel %vm1694_vm1, %v2828_v37, 0.0  ;;  %v2844_v51 = vpop.permute.xlu0 %2843 }
 0x904   : > { %2882 = vadd.xlane.f32.xlu1 %v2881_v41  ;;  %2900 = vadd.xlane.f32.xlu0 %v2899_v42  ;;  %v2905_v4 = vsel %vm1694_vm1, %v2844_v51, 0.0 }
 0x906   : > { %v2830_v62 = vpop.permute.xlu1 %2829 }
 0x907   : > { %v2884_v46 = vsel %vm1694_vm1, %v2830_v62, 0.0 }
 0x908   : > { %2885 = vadd.xlane.f32.xlu1 %v2884_v46  ;;  %2903 = vadd.xlane.f32.xlu0 %v2902_v49 }
 0x90a   : > { %v2846_v55 = vpop.permute.xlu1 %2845 }
 0x90b   : > { %v2908_v25 = vsel %vm1694_vm1, %v2846_v55, 0.0 }
 0x90c   : > { %2909 = vadd.xlane.f32.xlu1 %v2908_v25  ;;  %2906 = vadd.xlane.f32.xlu0 %v2905_v4 }
 0x942   : > { %v9808_v12 = vpop.f32.mrb[14].mxu1 }
 0x943   : > { %v7177_v11 = vpop.f32.mrb[15].mxu1 }
 0x949   : > { %v3159_v27 = vpop.f32.mrb[4].mxu0 }
 0x94a   : > { %v7192_v59 = vpop.f32.mrb[5].mxu0 }
 0x952   : > { %v9810_v2 = vpop.f32.mrb[16].mxu1 }
 0x953   : > { %v7947_v18 = vpack.i.bf16 %v9810_v2, %v9808_v12  ;;  %v7182_v32 = vpop.f32.mrb[17].mxu1 }
 0x956   : > { %v3033_v44 = vpop.f32.mrb[18].mxu1 }
 0x957   : > { %v7187_v50 = vpop.f32.mrb[19].mxu1 }
 0x971   : > { %v2865_v13 = vpop.xlane.xlu0 %2864 }
 0x972   : > { %v2926_v8 = vrot.slane %v2865_v13, %v9536_v9 }
 0x975   : > { %v2871_v20 = vpop.xlane.xlu0 %2870 }
 0x976   : > { %v2934_v41 = vrot.slane %v2871_v20, %v9536_v9 }
 0x97d   : > { %v2868_v21 = vpop.xlane.xlu1 %2867 }
 0x97e   : > { %v2930_v30 = vrot.slane %v2868_v21, %v9536_v9 }
 0x980   : > { %v2955_v17 = vsel %vm1785_vm2, %v2930_v30, %v2926_v8 }
 0x981   : > { %v2889_v0 = vpop.xlane.xlu0 %2888  ;;  %v2956_v51 = vsel %vm1787_vm3, %v2934_v41, %v2955_v17 }
 0x982   : > { %v3052_v59 = vrot.slane %v2889_v0, %v9536_v9 }
 0x985   : > { %v2874_v23 = vpop.xlane.xlu1 %2873  ;;  %v2892_v24 = vpop.xlane.xlu0 %2891 }
 0x986   : > { %v2938_v37 = vrot.slane %v2874_v23, %v9536_v9  ;;  %v3056_v55 = vrot.slane %v2892_v24, %v9536_v9 }
 0x988   : > { %v2957_v4 = vsel %vm1789_vm4, %v2938_v37, %v2956_v51 }
 0x989   : > { %v2877_v52 = vpop.xlane.xlu1 %2876  ;;  %v2895_v1 = vpop.xlane.xlu0 %2894 }
 0x98a   : > { %v2942_v42 = vrot.slane %v2877_v52, %v9536_v9  ;;  %v3060_v11 = vrot.slane %v2895_v1, %v9536_v9  ;;  %v3081_v52 = vsel %vm1785_vm2, %v3056_v55, %v3052_v59 }
 0x98c   : > { %v2958_v32 = vsel %vm1791_vm5, %v2942_v42, %v2957_v4  ;;  %v3082_v0 = vsel %vm1787_vm3, %v3060_v11, %v3081_v52  ;;  %v8053_v52 = vld [vmem:[%s9197_s13] sm:$0xff] }
 0x98d   : > { %v2880_v31 = vpop.xlane.xlu1 %2879  ;;  %v2898_v36 = vpop.xlane.xlu0 %2897 }
 0x98e   : > { %v2946_v49 = vrot.slane %v2880_v31, %v9536_v9  ;;  %v3064_v50 = vrot.slane %v2898_v36, %v9536_v9 }
 0x990   : > { %v2959_v21 = vsel %vm1793_vm6, %v2946_v49, %v2958_v32  ;;  %v3083_v36 = vsel %vm1789_vm4, %v3064_v50, %v3082_v0  ;;  %v8058_v0 = vld [vmem:[%s9197_s13 + $0x18] sm:$0xff] }
 0x991   : > { %v2883_v62 = vpop.xlane.xlu1 %2882  ;;  %v2901_v46 = vpop.xlane.xlu0 %2900 }
 0x992   : > { %v2950_v25 = vrot.slane %v2883_v62, %v9536_v9  ;;  %v3068_v23 = vrot.slane %v2901_v46, %v9536_v9 }
 0x994   : > { %v2960_v30 = vsel %vm1795_vm7, %v2950_v25, %v2959_v21  ;;  %v3084_v41 = vsel %vm1791_vm5, %v3068_v23, %v3083_v36 }
 0x995   : > { %v2886_v13 = vpop.xlane.xlu1 %2885  ;;  %v2904_v20 = vpop.xlane.xlu0 %2903 }
 0x996   : > { %v2954_v24 = vrot.slane %v2886_v13, %v9536_v9  ;;  %v3072_v1 = vrot.slane %v2904_v20, %v9536_v9 }
 0x998   : > { %v2961_v31 = vsel %vm1797_vm8, %v2954_v24, %v2960_v30  ;;  %v3085_v46 = vsel %vm1793_vm6, %v3072_v1, %v3084_v41  ;;  %v8054_v30 = vld [vmem:[%s9197_s13 + $0x10] sm:$0xff]  ;;  %v8055_v1 = vld [vmem:[%s9197_s13 + $0x20] sm:$0xff] }
 0x999   : > { %v2910_v8 = vpop.xlane.xlu1 %2909  ;;  %v2907_v17 = vpop.xlane.xlu0 %2906  ;;  %v3034_v37 = vadd.f32 %v3033_v44, %v2961_v31  ;;  %v8059_v31 = vld [vmem:[%s9197_s13 + $0x28] sm:$0xff] }
 0x99a   : > { %v3080_v42 = vrot.slane %v2910_v8, %v9536_v9  ;;  %v3076_v62 = vrot.slane %v2907_v17, %v9536_v9 }
 0x99b   : > { %v3163_v49 = vadd.f32 %v3034_v37, %v9569_v33 }
 0x99c   : > { %v3086_v51 = vsel %vm1795_vm7, %v3076_v62, %v3085_v46 }
 0x99d   : > { %v3165_v55 = vsel %vm2000_vm9, %v3163_v49, -inf  ;;  %v3087_v25 = vsel %vm1797_vm8, %v3080_v42, %v3086_v51 }
 0x99e   : > { %3166 = vmax.xlane.f32.xlu0 %v3165_v55  ;;  %v3160_v4 = vadd.f32 %v3159_v27, %v3087_v25 }
 0x9a0   : > { %v3164_v44 = vadd.f32 %v3160_v4, %v9577_v48 }
 0x9a2   : > { %v3168_v11 = vsel %vm2000_vm9, %v3164_v44, -inf }
 0x9a3   : > { %3169 = vmax.xlane.f32.xlu1 %v3168_v11 }
 0x9b4   : > { %3187 = vrot.lane.b32.xlu0 %v9402_v10, %s8565_s19 }
 0xa2b   : > { %v3167_v59 = vpop.xlane.xlu0 %3166 }
 0xa2c   : > { %v3171_v32 = vsub.f32 %v3163_v49, %v3167_v59 }
 0xa2e   : > { %v3173_v50 = vmul.f32 1.442695, %v3171_v32 }
 0xa2f   : > { %v3188_v33 = vpop.permute.xlu0 %3187 }
 0xa30   : > { %7997 = vpow2.f32 %v3173_v50  ;;  %v3170_v13 = vpop.xlane.xlu1 %3169  ;;  %7194 = vmatpush3.msra.mxu1 %v3188_v33 }
 0xa31   : > { %v3172_v20 = vsub.f32 %v3164_v44, %v3170_v13  ;;  %7203 = vmatprep.subr.mxu1 %v8560_v6 }
 0xa33   : > { %v3175_v27 = vmul.f32 1.442695, %v3172_v20 }
 0xa35   : > { %7999 = vpow2.f32 %v3175_v27 }
 0xa3a   : > { %v7998_v48 = vpop.eup %7997 }
 0xa3b   : > { %v3177_v21 = vsel %vm2000_vm9, %v7998_v48, 0.0 }
 0xa3c   : > { %3178 = vadd.xlane.f32.xlu0 %v3177_v21 }
 0xa3f   : > { %v8000_v23 = vpop.eup %7999 }
 0xa40   : > { %v3180_v24 = vsel %vm2000_vm9, %v8000_v23, 0.0 }
 0xa41   : > { %3181 = vadd.xlane.f32.xlu1 %v3180_v24 }
 0xa52   : > { %3263 = vrot.lane.b32.xlu1 %v9374_v58, %s8565_s19  ;;  %3491 = vrot.lane.b32.xlu0 %v9370_v54, %s8564_s20  ;;  %v8056_v54 = vld [vmem:[%s9197_s13 + $0x30] sm:$0xff] }
 0xa56   : > { %3493 = vrot.lane.b32.xlu1 %v9368_v53, %s8564_s20  ;;  %3339 = vrot.lane.b32.xlu0 %v8053_v52, %s8563_s15  ;;  %v8057_v53 = vld [vmem:[%s9197_s13 + $0x8] sm:$0xff] }
 0xa5a   : > { %3619 = vrot.lane.b32.xlu1 %v9381_v63, %s8564_s20  ;;  %3343 = vrot.lane.b32.xlu0 %v8054_v30, %s8563_s15  ;;  %v8060_v63 = vld [vmem:[%s9197_s13 + $0x38] sm:$0xff] }
 0xa5e   : > { %3617 = vrot.lane.b32.xlu1 %v9387_v3, %s8564_s20  ;;  %3347 = vrot.lane.b32.xlu0 %v8055_v1, %s8563_s15 }
 0xa62   : > { %3351 = vrot.lane.b32.xlu0 %v8056_v54, %s8563_s15  ;;  %3341 = vrot.lane.b32.xlu1 %v8057_v53, %s8563_s15 }
 0xa66   : > { %3345 = vrot.lane.b32.xlu1 %v8058_v0, %s8563_s15 }
 0xa6a   : > { %3349 = vrot.lane.b32.xlu1 %v8059_v31, %s8563_s15 }
 0xa6e   : > { %3353 = vrot.lane.b32.xlu1 %v8060_v63, %s8563_s15 }
 0xac9   : > { %v3179_v36 = vpop.xlane.xlu0 %3178 }
 0xaca   : > { %8001 = vrcp.f32 %v3179_v36 }
 0xacd   : > { %v3492_v3 = vpop.permute.xlu0 %3491 }
 0xace   : > { %v3182_v8 = vpop.xlane.xlu1 %3181 }
 0xacf   : > { %8003 = vrcp.f32 %v3182_v8 }
 0xad1   : > { %v3340_v17 = vpop.permute.xlu0 %3339 }
 0xad2   : > { %v3363_v37 = vmul.f32 %v3340_v17, %v9398_v5  ;;  %v3264_v41 = vpop.permute.xlu1 %3263  ;;  %v3371_v59 = vmul.f32 %v3340_v17, %v9480_v56 }
 0xad3   : > { %7199 = vmatpush3.msra.mxu0 %v3264_v41 }
 0xad4   : > { %v8002_v42 = vpop.eup %8001  ;;  %3395 = vrot.lane.b32.xlu0 %v3363_v37, %s8564_s20  ;;  %7208 = vmatprep.subr.mxu0 %v8560_v6 }
 0xad5   : > { %v3344_v62 = vpop.permute.xlu0 %3343  ;;  %v3185_v46 = vmul.f32 %v8002_v42, %v7998_v48 }
 0xad6   : > { %v3365_v49 = vmul.f32 %v3344_v62, %v9418_v16  ;;  %v3494_v51 = vpop.permute.xlu1 %3493  ;;  %v3373_v32 = vmul.f32 %v3344_v62, %v9492_v7 }
 0xad7   : > { %7196 = vmatmul.mubr.msk.f32.vlgmr.msra.gmra.mrb[20].mxu1 %vm2000_vm9, %v3185_v46 }
 0xad8   : > { %7204 = vmatpush3.xpose.msk.msra.mxu1 %vm1694_vm1, %v3494_v51  ;;  %3399 = vrot.lane.b32.xlu0 %v3365_v49, %s8564_s20 }
 0xad9   : > { %v8004_v55 = vpop.eup %8003  ;;  %7205 = vmatprep.mubr.msk.f32.mxu1 %vm8561_vm0, %v8560_v6  ;;  %7213 = vmatprep.subr.mxu1 %v8560_v6 }
 0xada   : > { %v3620_v5 = vpop.permute.xlu1 %3619  ;;  %v3186_v25 = vmul.f32 %v8004_v55, %v8000_v23 }
 0xadb   : > { %7206 = vmatmul.mubr.msk.f32.vlgmr.msra.gmra.mrb[22].mxu1 %vm1694_vm1, %v3492_v3 }
 0xadc   : > { %7201 = vmatmul.mubr.msk.f32.vlgmr.msra.gmra.mrb[6].mxu0 %vm2000_vm9, %v3186_v25  ;;  %7215 = vmatprep.mubr.msk.f32.mxu1 %vm8561_vm0, %v8560_v6 }
 0xadd   : > { %7209 = vmatpush3.xpose.msk.msra.mxu0 %vm1694_vm1, %v3620_v5  ;;  %7210 = vmatprep.mubr.msk.f32.mxu0 %vm8561_vm0, %v8560_v6 }
 0xade   : > { %v3618_v16 = vpop.permute.xlu1 %3617  ;;  %7218 = vmatprep.subr.mxu0 %v8560_v6 }
 0xae0   : > { %7211 = vmatmul.mubr.msk.f32.vlgmr.msra.gmra.mrb[8].mxu0 %vm1694_vm1, %v3618_v16 }
 0xae1   : > { %7220 = vmatprep.mubr.msk.f32.mxu0 %vm8561_vm0, %v8560_v6 }
 0xae2   : > { %v3342_v4 = vpop.permute.xlu1 %3341 }
 0xae3   : > { %v3364_v44 = vmul.f32 %v3342_v4, %v9415_v15  ;;  %v3372_v11 = vmul.f32 %v3342_v4, %v9486_v61  ;;  %v3348_v15 = vpop.permute.xlu0 %3347 }
 0xae4   : > { %v3367_v61 = vmul.f32 %v3348_v15, %v9425_v19  ;;  %v3375_v56 = vmul.f32 %v3348_v15, %v9506_v22 }
 0xae5   : > { %3397 = vrot.lane.b32.xlu1 %v3364_v44, %s8564_s20  ;;  %3413 = vrot.lane.b32.xlu0 %v3372_v11, %s8564_s20 }
 0xae6   : > { %v3346_v50 = vpop.permute.xlu1 %3345 }
 0xae7   : > { %v3366_v33 = vmul.f32 %v3346_v50, %v9436_v26  ;;  %v3374_v13 = vmul.f32 %v3346_v50, %v9499_v14  ;;  %v3352_v27 = vpop.permute.xlu0 %3351 }
 0xae8   : > { %v3369_v14 = vmul.f32 %v3352_v27, %v9460_v40  ;;  %v3377_v19 = vmul.f32 %v3352_v27, %v9518_v35 }
 0xae9   : > { %3411 = vrot.lane.b32.xlu1 %v3371_v59, %s8564_s20  ;;  %3415 = vrot.lane.b32.xlu0 %v3373_v32, %s8564_s20 }
 0xaea   : > { %v3350_v20 = vpop.permute.xlu1 %3349 }
 0xaeb   : > { %v3368_v7 = vmul.f32 %v3350_v20, %v9445_v28  ;;  %v3376_v26 = vmul.f32 %v3350_v20, %v9512_v29 }
 0xaed   : > { %3401 = vrot.lane.b32.xlu1 %v3366_v33, %s8564_s20  ;;  %3417 = vrot.lane.b32.xlu0 %v3374_v13, %s8564_s20 }
 0xaee   : > { %v3354_v48 = vpop.permute.xlu1 %3353 }
 0xaef   : > { %v3370_v22 = vmul.f32 %v3354_v48, %v9469_v47  ;;  %v3378_v28 = vmul.f32 %v3354_v48, %v9524_v38 }
 0xaf1   : > { %3419 = vrot.lane.b32.xlu0 %v3375_v56, %s8564_s20  ;;  %3403 = vrot.lane.b32.xlu1 %v3367_v61, %s8564_s20 }
 0xaf5   : > { %3421 = vrot.lane.b32.xlu0 %v3376_v26, %s8564_s20  ;;  %3405 = vrot.lane.b32.xlu1 %v3368_v7, %s8564_s20 }
 0xaf9   : > { %3423 = vrot.lane.b32.xlu0 %v3377_v19, %s8564_s20  ;;  %3407 = vrot.lane.b32.xlu1 %v3369_v14, %s8564_s20 }
 0xafd   : > { %3409 = vrot.lane.b32.xlu1 %v3370_v22, %s8564_s20 }
 0xb01   : > { %3425 = vrot.lane.b32.xlu1 %v3378_v28, %s8564_s20 }
 0xb46   : > { %v3396_v29 = vpop.permute.xlu0 %3395 }
 0xb47   : > { %v3443_v21 = vsel %vm1694_vm1, %v3396_v29, 0.0 }
 0xb48   : > { %3444 = vadd.xlane.f32.xlu0 %v3443_v21 }
 0xb4a   : > { %v3400_v40 = vpop.permute.xlu0 %3399 }
 0xb4b   : > { %v3449_v35 = vsel %vm1694_vm1, %v3400_v40, 0.0 }
 0xb4c   : > { %3450 = vadd.xlane.f32.xlu0 %v3449_v35 }
 0xb57   : > { %v3398_v23 = vpop.permute.xlu1 %3397  ;;  %v3414_v24 = vpop.permute.xlu0 %3413 }
 0xb58   : > { %v3446_v52 = vsel %vm1694_vm1, %v3398_v23, 0.0  ;;  %v3470_v53 = vsel %vm1694_vm1, %v3414_v24, 0.0 }
 0xb59   : > { %3447 = vadd.xlane.f32.xlu1 %v3446_v52 }
 0xb5b   : > { %v3412_v47 = vpop.permute.xlu1 %3411  ;;  %v3416_v30 = vpop.permute.xlu0 %3415 }
 0xb5c   : > { %v3467_v1 = vsel %vm1694_vm1, %v3412_v47, 0.0  ;;  %v3473_v63 = vsel %vm1694_vm1, %v3416_v30, 0.0 }
 0xb5d   : > { %3468 = vadd.xlane.f32.xlu0 %v3467_v1 }
 0xb5f   : > { %v3402_v38 = vpop.permute.xlu1 %3401  ;;  %v3418_v54 = vpop.permute.xlu0 %3417 }
 0xb60   : > { %v3452_v0 = vsel %vm1694_vm1, %v3402_v38, 0.0  ;;  %v3476_v17 = vsel %vm1694_vm1, %v3418_v54, 0.0 }
 0xb61   : > { %3453 = vadd.xlane.f32.xlu1 %v3452_v0  ;;  %3471 = vadd.xlane.f32.xlu0 %v3470_v53 }
 0xb63   : > { %v3404_v31 = vpop.permute.xlu1 %3403  ;;  %v3420_v3 = vpop.permute.xlu0 %3419 }
 0xb64   : > { %v3455_v36 = vsel %vm1694_vm1, %v3404_v31, 0.0  ;;  %v3479_v62 = vsel %vm1694_vm1, %v3420_v3, 0.0 }
 0xb65   : > { %3456 = vadd.xlane.f32.xlu1 %v3455_v36  ;;  %3474 = vadd.xlane.f32.xlu0 %v3473_v63 }
 0xb67   : > { %v3406_v8 = vpop.permute.xlu1 %3405  ;;  %v3422_v41 = vpop.permute.xlu0 %3421 }
 0xb68   : > { %v3458_v37 = vsel %vm1694_vm1, %v3406_v8, 0.0  ;;  %v3482_v51 = vsel %vm1694_vm1, %v3422_v41, 0.0 }
 0xb69   : > { %3459 = vadd.xlane.f32.xlu1 %v3458_v37  ;;  %3477 = vadd.xlane.f32.xlu0 %v3476_v17 }
 0xb6b   : > { %v3408_v42 = vpop.permute.xlu1 %3407  ;;  %v3424_v5 = vpop.permute.xlu0 %3423 }
 0xb6c   : > { %v3461_v46 = vsel %vm1694_vm1, %v3408_v42, 0.0  ;;  %v3485_v16 = vsel %vm1694_vm1, %v3424_v5, 0.0 }
 0xb6d   : > { %3462 = vadd.xlane.f32.xlu1 %v3461_v46  ;;  %3480 = vadd.xlane.f32.xlu0 %v3479_v62 }
 0xb6f   : > { %v3410_v49 = vpop.permute.xlu1 %3409 }
 0xb70   : > { %v3464_v55 = vsel %vm1694_vm1, %v3410_v49, 0.0 }
 0xb71   : > { %3465 = vadd.xlane.f32.xlu1 %v3464_v55  ;;  %3483 = vadd.xlane.f32.xlu0 %v3482_v51 }
 0xb73   : > { %v3426_v25 = vpop.permute.xlu1 %3425 }
 0xb74   : > { %v3488_v4 = vsel %vm1694_vm1, %v3426_v25, 0.0 }
 0xb75   : > { %3489 = vadd.xlane.f32.xlu1 %v3488_v4  ;;  %3486 = vadd.xlane.f32.xlu0 %v3485_v16 }
 0xbaa   : > { %v9944_v44 = vpop.f32.mrb[20].mxu1 }
 0xbab   : > { %v7197_v11 = vpop.f32.mrb[21].mxu1 }
 0xbae   : > { %v3613_v59 = vpop.f32.mrb[22].mxu1 }
 0xbaf   : > { %v9946_v32 = vpop.f32.mrb[6].mxu0  ;;  %v7207_v50 = vpop.f32.mrb[23].mxu1 }
 0xbb0   : > { %v7952_v33 = vpack.i.bf16 %v9946_v32, %v9944_v44  ;;  %v7202_v13 = vpop.f32.mrb[7].mxu0  ;;  %v3951_v32 = vld [vmem:[%s9195_s16] sm:$0xff] }
 0xbb3   : > { %v3739_v15 = vpop.f32.mrb[8].mxu0 }
 0xbb4   : > { %v7212_v61 = vpop.f32.mrb[9].mxu0 }
 0xbb5   : > { %v8061_v61 = vld [vmem:[%s10679_s29] sm:$0xff] }
 0xbd5   : > { %v3445_v56 = vpop.xlane.xlu0 %3444 }
 0xbd6   : > { %v3506_v21 = vrot.slane %v3445_v56, %v9536_v9 }
 0xbd9   : > { %v3451_v20 = vpop.xlane.xlu0 %3450 }
 0xbda   : > { %v3514_v23 = vrot.slane %v3451_v20, %v9536_v9 }
 0xbe6   : > { %v3448_v7 = vpop.xlane.xlu1 %3447 }
 0xbe7   : > { %v3510_v22 = vrot.slane %v3448_v7, %v9536_v9 }
 0xbe9   : > { %v3535_v40 = vsel %vm1785_vm2, %v3510_v22, %v3506_v21 }
 0xbea   : > { %v3469_v26 = vpop.xlane.xlu0 %3468  ;;  %v3536_v1 = vsel %vm1787_vm3, %v3514_v23, %v3535_v40 }
 0xbeb   : > { %v3632_v31 = vrot.slane %v3469_v26, %v9536_v9 }
 0xbee   : > { %v3454_v27 = vpop.xlane.xlu1 %3453  ;;  %v3472_v14 = vpop.xlane.xlu0 %3471 }
 0xbef   : > { %v3518_v35 = vrot.slane %v3454_v27, %v9536_v9  ;;  %v3636_v38 = vrot.slane %v3472_v14, %v9536_v9  ;;  %v8062_v27 = vld [vmem:[%s10679_s29 + $0x8] sm:$0xff] }
 0xbf1   : > { %v3537_v53 = vsel %vm1789_vm4, %v3518_v35, %v3536_v1  ;;  %v3661_v42 = vsel %vm1785_vm2, %v3636_v38, %v3632_v31  ;;  %v3954_v1 = vld [vmem:[%s9195_s16 + $0x18] sm:$0xff]  ;;  %v3957_v31 = vld [vmem:[%s9195_s16 + $0x30] sm:$0xff] }
 0xbf2   : > { %v3457_v19 = vpop.xlane.xlu1 %3456  ;;  %v3475_v48 = vpop.xlane.xlu0 %3474 }
 0xbf3   : > { %v3522_v24 = vrot.slane %v3457_v19, %v9536_v9  ;;  %v3640_v0 = vrot.slane %v3475_v48, %v9536_v9 }
 0xbf5   : > { %v3538_v63 = vsel %vm1791_vm5, %v3522_v24, %v3537_v53  ;;  %v3662_v49 = vsel %vm1787_vm3, %v3640_v0, %v3661_v42  ;;  %v3956_v53 = vld [vmem:[%s9195_s16 + $0x28] sm:$0xff] }
 0xbf6   : > { %v3460_v28 = vpop.xlane.xlu1 %3459  ;;  %v3478_v29 = vpop.xlane.xlu0 %3477 }
 0xbf7   : > { %v3526_v30 = vrot.slane %v3460_v28, %v9536_v9  ;;  %v3644_v36 = vrot.slane %v3478_v29, %v9536_v9 }
 0xbf9   : > { %v3539_v17 = vsel %vm1793_vm6, %v3526_v30, %v3538_v63  ;;  %v3663_v55 = vsel %vm1789_vm4, %v3644_v36, %v3662_v49  ;;  %v3958_v63 = vld [vmem:[%s9195_s16 + $0x38] sm:$0xff] }
 0xbfa   : > { %v3463_v52 = vpop.xlane.xlu1 %3462  ;;  %v3481_v47 = vpop.xlane.xlu0 %3480  ;;  %v7519_v36 = vpack.c.bf16 %v3958_v63, %v3957_v31 }
 0xbfb   : > { %v3530_v54 = vrot.slane %v3463_v52, %v9536_v9  ;;  %v3648_v37 = vrot.slane %v3481_v47, %v9536_v9  ;;  %v3953_v47 = vld [vmem:[%s9195_s16 + $0x10] sm:$0xff] }
 0xbfc   : > { %v7511_v38 = vpack.c.bf16 %v3954_v1, %v3953_v47 }
 0xbfd   : > { %v3540_v62 = vsel %vm1795_vm7, %v3530_v54, %v3539_v17  ;;  %v3664_v4 = vsel %vm1791_vm5, %v3648_v37, %v3663_v55  ;;  %v3955_v54 = vld [vmem:[%s9195_s16 + $0x20] sm:$0xff]  ;;  %v3961_v37 = vld [vmem:[%s9195_s16 + $0x50] sm:$0xff]  ;;  %v3966_v55 = vld [vmem:[%s9195_s16 + $0x78] sm:$0xff] }
 0xbfe   : > { %v3466_v3 = vpop.xlane.xlu1 %3465  ;;  %v3484_v8 = vpop.xlane.xlu0 %3483  ;;  %v7515_v0 = vpack.c.bf16 %v3956_v53, %v3955_v54  ;;  %v4090_v53 = vld [vmem:[%s10681_s14 + $0x18] sm:$0xff] }
 0xbff   : > { %v3534_v41 = vrot.slane %v3466_v3, %v9536_v9  ;;  %v3652_v46 = vrot.slane %v3484_v8, %v9536_v9  ;;  %v3959_v3 = vld [vmem:[%s9195_s16 + $0x40] sm:$0xff]  ;;  %v3960_v8 = vld [vmem:[%s9195_s16 + $0x48] sm:$0xff] }
 0xc00   : > { %v7523_v17 = vpack.c.bf16 %v3960_v8, %v3959_v3 }
 0xc01   : > { %v3541_v51 = vsel %vm1797_vm8, %v3534_v41, %v3540_v62  ;;  %v3665_v13 = vsel %vm1793_vm6, %v3652_v46, %v3664_v4  ;;  %v3962_v41 = vld [vmem:[%s9195_s16 + $0x58] sm:$0xff]  ;;  %v3963_v62 = vld [vmem:[%s9195_s16 + $0x60] sm:$0xff]  ;;  %v3964_v46 = vld [vmem:[%s9195_s16 + $0x68] sm:$0xff] }
 0xc02   : > { %v3490_v5 = vpop.xlane.xlu1 %3489  ;;  %v3487_v25 = vpop.xlane.xlu0 %3486  ;;  %v3614_v16 = vadd.f32 %v3613_v59, %v3541_v51  ;;  %v7527_v42 = vpack.c.bf16 %v3962_v41, %v3961_v37  ;;  %v7531_v49 = vpack.c.bf16 %v3964_v46, %v3963_v62  ;;  %v3965_v51 = vld [vmem:[%s9195_s16 + $0x70] sm:$0xff] }
 0xc03   : > { %v3660_v11 = vrot.slane %v3490_v5, %v9536_v9  ;;  %v3656_v50 = vrot.slane %v3487_v25, %v9536_v9  ;;  %v7535_v5 = vpack.c.bf16 %v3966_v55, %v3965_v51  ;;  %v4091_v55 = vld [vmem:[%s10681_s14 + $0x20] sm:$0xff] }
 0xc04   : > { %v3743_v56 = vadd.f32 %v8061_v61, %v3614_v16 }
 0xc05   : > { %v3666_v20 = vsel %vm1795_vm7, %v3656_v50, %v3665_v13 }
 0xc06   : > { %v3745_v7 = vsel %vm2000_vm9, %v3743_v56, -inf  ;;  %v3667_v26 = vsel %vm1797_vm8, %v3660_v11, %v3666_v20 }
 0xc07   : > { %3746 = vmax.xlane.f32.xlu0 %v3745_v7  ;;  %v3740_v59 = vadd.f32 %v3739_v15, %v3667_v26 }
 0xc09   : > { %v3744_v9 = vadd.f32 %v8062_v27, %v3740_v59 }
 0xc0b   : > { %v3748_v14 = vsel %vm2000_vm9, %v3744_v9, -inf }
 0xc0c   : > { %3749 = vmax.xlane.f32.xlu1 %v3748_v14 }
 0xc94   : > { %v3747_v19 = vpop.xlane.xlu0 %3746 }
 0xc95   : > { %v3751_v48 = vsub.f32 %v3743_v56, %v3747_v19 }
 0xc97   : > { %v3753_v22 = vmul.f32 1.442695, %v3751_v48 }
 0xc99   : > { %8005 = vpow2.f32 %v3753_v22  ;;  %v3750_v28 = vpop.xlane.xlu1 %3749 }
 0xc9a   : > { %v3752_v29 = vsub.f32 %v3744_v9, %v3750_v28 }
 0xc9c   : > { %v3755_v21 = vmul.f32 1.442695, %v3752_v29 }
 0xc9e   : > { %8007 = vpow2.f32 %v3755_v21 }
 0xca3   : > { %v8006_v40 = vpop.eup %8005 }
 0xca4   : > { %v3757_v35 = vsel %vm2000_vm9, %v8006_v40, 0.0 }
 0xca5   : > { %3758 = vadd.xlane.f32.xlu0 %v3757_v35 }
 0xca8   : > { %v8008_v15 = vpop.eup %8007 }
 0xca9   : > { %v3760_v23 = vsel %vm2000_vm9, %v8008_v15, 0.0 }
 0xcaa   : > { %3761 = vadd.xlane.f32.xlu1 %v3760_v23 }
 0xcbb   : > { %3843 = vrot.lane.b32.xlu1 %v9374_v58, %s8564_s20  ;;  %3767 = vrot.lane.b32.xlu0 %v9402_v10, %s8564_s20 }
 0xcbf   : > { %7948 = vrot.lane.b32.xlu1 %v7947_v18, %s8564_s20 }
 0xcc3   : > { %7953 = vrot.lane.b32.xlu1 %v7952_v33, %s8565_s19  ;;  %v3952_v33 = vld [vmem:[%s9195_s16 + $0x8] sm:$0xff]  ;;  %s10680_s16 = sld [smem:[#allocation41_spill]] }
 0xcc4   : > { %v7507_v30 = vpack.c.bf16 %v3952_v33, %v3951_v32 }
 0xcc9   : > { %v4189_v32 = vld [vmem:[%s10680_s16 + $0x10] sm:$0xff]  ;;  %v4194_v1 = vld [vmem:[%s10680_s16 + $0x38] sm:$0xff] }
 0xcca   : > { %v4193_v31 = vld [vmem:[%s10680_s16 + $0x30] sm:$0xff]  ;;  %v4198_v51 = vld [vmem:[%s10680_s16 + $0x58] sm:$0xff] }
 0xd32   : > { %v3759_v24 = vpop.xlane.xlu0 %3758 }
 0xd33   : > { %8009 = vrcp.f32 %v3759_v24  ;;  %v8064_v24 = vld [vmem:[#allocation2] sm:$0xff] }
 0xd36   : > { %v3768_v52 = vpop.permute.xlu0 %3767 }
 0xd37   : > { %v3762_v58 = vpop.xlane.xlu1 %3761  ;;  %7214 = vmatpush3.msra.mxu1 %v3768_v52 }
 0xd38   : > { %8011 = vrcp.f32 %v3762_v58  ;;  %7508 = vmatprep.subr.bf16.mxu1 %v7507_v30  ;;  %v4188_v58 = vld [vmem:[%s10680_s16 + $0x8] sm:$0xff] }
 0xd3b   : > { %v3844_v10 = vpop.permute.xlu1 %3843 }
 0xd3c   : > { %7219 = vmatpush3.msra.mxu0 %v3844_v10  ;;  %v4190_v10 = vld [vmem:[%s10680_s16 + $0x18] sm:$0xff] }
 0xd3d   : > { %v8010_v12 = vpop.eup %8009 }
 0xd3e   : > { %v3765_v2 = vmul.f32 %v8010_v12, %v8006_v40  ;;  %v4087_v12 = vld [vmem:[%s10681_s14] sm:$0xff] }
 0xd3f   : > { %v7949_v13 = vpop.permute.xlu1 %7948 }
 0xd40   : > { %7216 = vmatmul.mubr.msk.f32.vlgmr.msra.gmra.mrb[24].mxu1 %vm2000_vm9, %v3765_v2  ;;  %v7951_v56 = vunpack.i.h.bf16 %v7949_v13  ;;  %v7950_v20 = vunpack.i.l.bf16 %v7949_v13  ;;  %v7571_v2 = vpack.c.bf16 %v4190_v10, %v4188_v58  ;;  %v4200_v13 = vld [vmem:[%s10680_s16 + $0x68] sm:$0xff]  ;;  %v4098_v58 = vld [vmem:[%s10681_s14 + $0x58] sm:$0xff]  ;;  %v4207_v10 = vld [vmem:[%s10680_s16 + $0xa0] sm:$0xff] }
 0xd41   : > { %7510 = vmatpush3.bf16.msra.mxu1 %v7507_v30  ;;  %v4192_v30 = vld [vmem:[%s10680_s16 + $0x28] sm:$0xff] }
 0xd42   : > { %v8012_v18 = vpop.eup %8011  ;;  %7512 = vmatprep.subr.bf16.mxu1 %v7511_v38  ;;  %v3944_v27 = vsel %vm1694_vm1, %v9676_v60, %v7951_v56  ;;  %v3943_v19 = vsel %vm1694_vm1, %v9674_v57, %v7950_v20  ;;  %v6831_v57 = vld [vmem:[%s10683_s5] ss:$0 sm:$0xff]  ;;  %v7575_v54 = vpack.c.bf16 %v4194_v1, %v4192_v30  ;;  %v4093_v56 = vld [vmem:[%s10681_s14 + $0x30] sm:$0xff] }
 0xd43   : > { %v3766_v44 = vmul.f32 %v8012_v18, %v8008_v15  ;;  %v7954_v61 = vpop.permute.xlu1 %7953  ;;  %v8063_v15 = vld [vmem:[#allocation2 + $0x8] sm:$0xff]  ;;  %v4211_v1 = vld [vmem:[%s10680_s16 + $0xc0] sm:$0xff] }
 0xd44   : > { %v7956_v7 = vunpack.i.h.bf16 %v7954_v61  ;;  %v7955_v26 = vunpack.i.l.bf16 %v7954_v61  ;;  %v4088_v18 = vld [vmem:[%s10681_s14 + $0x8] sm:$0xff]  ;;  %v4202_v61 = vld [vmem:[%s10680_s16 + $0x78] sm:$0xff] }
 0xd45   : > { %7221 = vmatmul.mubr.msk.f32.vlgmr.msra.gmra.mrb[10].mxu0 %vm2000_vm9, %v3766_v44  ;;  %7514 = vmatpush3.bf16.msra.mxu1 %v7511_v38  ;;  %v4187_v44 = vld [vmem:[%s10680_s16] sm:$0xff]  ;;  %v7539_v33 = vpack.c.bf16 %v4088_v18, %v4087_v12  ;;  %v4089_v38 = vld [vmem:[%s10681_s14 + $0x10] sm:$0xff]  ;;  %v7583_v20 = vpack.c.bf16 %v4202_v61, %v4200_v13  ;;  %v4212_v18 = vld [vmem:[%s10680_s16 + $0xc8] sm:$0xff] }
 0xd46   : > { %7516 = vmatprep.subr.bf16.mxu1 %v7515_v0  ;;  %v3946_v48 = vsel %vm3945_vm10, %v3943_v19, %v7955_v26  ;;  %v3947_v22 = vsel %vm3945_vm10, %v3944_v27, %v7956_v7  ;;  %v7573_v47 = vpack.c.bf16 %v4189_v32, %v4187_v44  ;;  %v7543_v63 = vpack.c.bf16 %v4090_v53, %v4089_v38  ;;  %v4094_v7 = vld [vmem:[%s10681_s14 + $0x38] sm:$0xff]  ;;  %v4199_v26 = vld [vmem:[%s10680_s16 + $0x60] sm:$0xff]  ;;  %v4209_v12 = vld [vmem:[%s10680_s16 + $0xb0] sm:$0xff] }
 0xd47   : > { %7540 = vmatprep.subr.bf16.mxu0 %v7539_v33  ;;  %v7551_v27 = vpack.c.bf16 %v4094_v7, %v4093_v56  ;;  %v4206_v19 = vld [vmem:[%s10680_s16 + $0x98] sm:$0xff]  ;;  %v4099_v32 = vld [vmem:[%s10681_s14 + $0x60] sm:$0xff]  ;;  %v4213_v38 = vld [vmem:[%s10680_s16 + $0xd0] sm:$0xff] }
 0xd48   : > { %7542 = vmatpush3.bf16.msra.mxu0 %v7539_v33  ;;  %v4214_v44 = vld [vmem:[%s10680_s16 + $0xd8] sm:$0xff]  ;;  %v4100_v33 = vld [vmem:[%s10681_s14 + $0x68] sm:$0xff]  ;;  %v6833_v61 = vld [vmem:[%s9239_s8 + $0x1] ss:$0 sm:$0xff] }
 0xd49   : > { %7518 = vmatpush3.bf16.msra.mxu1 %v7515_v0  ;;  %v4191_v0 = vld [vmem:[%s10680_s16 + $0x20] sm:$0xff]  ;;  %7544 = vmatprep.subr.bf16.mxu0 %v7543_v63  ;;  %v7595_v30 = vpack.c.bf16 %v4214_v44, %v4212_v18  ;;  %v4216_v53 = vld [vmem:[%s10680_s16 + $0xe8] sm:$0xff] }
 0xd4a   : > { %7520 = vmatprep.subr.bf16.mxu1 %v7519_v36 }
 0xd4c   : > { %7546 = vmatpush3.bf16.msra.mxu0 %v7543_v63  ;;  %v4102_v63 = vld [vmem:[%s10681_s14 + $0x78] sm:$0xff] }
 0xd4d   : > { %7522 = vmatpush3.bf16.msra.mxu1 %v7519_v36  ;;  %v7577_v36 = vpack.c.bf16 %v4193_v31, %v4191_v0  ;;  %v4218_v0 = vld [vmem:[%s10680_s16 + $0xf8] sm:$0xff]  ;;  %v4101_v31 = vld [vmem:[%s10681_s14 + $0x70] sm:$0xff] }
 0xd4e   : > { %7524 = vmatprep.subr.bf16.mxu1 %v7523_v17 }
 0xd51   : > { %7526 = vmatpush3.bf16.msra.mxu1 %v7523_v17 }
 0xd52   : > { %7528 = vmatprep.subr.bf16.mxu1 %v7527_v42 }
 0xd55   : > { %7530 = vmatpush3.bf16.msra.mxu1 %v7527_v42 }
 0xd56   : > { %7532 = vmatprep.subr.bf16.mxu1 %v7531_v49 }
 0xd59   : > { %7534 = vmatpush3.bf16.msra.mxu1 %v7531_v49  ;;  %v4196_v49 = vld [vmem:[%s10680_s16 + $0x48] sm:$0xff] }
 0xd5a   : > { %7536 = vmatprep.subr.bf16.mxu1 %v7535_v5 }
 0xd5d   : > { %7538 = vmatpush3.bf16.msra.mxu1 %v7535_v5  ;;  %v7579_v5 = vpack.c.bf16 %v4198_v51, %v4196_v49  ;;  %v4186_v49 = vld [vmem:[#allocation3 + $0x8] sm:$0xff] }
 0xd5e   : > { %7572 = vmatprep.subr.bf16.mxu1 %v7571_v2 }
 0xe13   : > { %v3839_v25 = vpop.f32.mrb[24].mxu1 }
 0xe14   : > { %v7217_v16 = vpop.f32.mrb[25].mxu1 }
 0xe15   : > { %v4195_v16 = vld [vmem:[%s10680_s16 + $0x40] sm:$0xff] }
 0xe18   : > { %v3915_v4 = vpop.f32.mrb[10].mxu0 }
 0xe19   : > { %v7957_v11 = vpack.i.bf16 %v3915_v4, %v3839_v25  ;;  %v7222_v50 = vpop.f32.mrb[11].mxu0  ;;  %v4092_v25 = vld [vmem:[%s10681_s14 + $0x28] sm:$0xff]  ;;  %v4197_v4 = vld [vmem:[%s10680_s16 + $0x50] sm:$0xff] }
 0xe1a   : > { %v7581_v50 = vpack.c.bf16 %v4197_v4, %v4195_v16 }
 0xe1b   : > { %7958 = vrot.lane.b32.xlu0 %v7957_v11, %s8563_s15  ;;  %v7547_v11 = vpack.c.bf16 %v4092_v25, %v4091_v55 }
 0xe1d   : > { %7548 = vmatprep.subr.bf16.mxu0 %v7547_v11 }
 0xe1e   : > { %7550 = vmatpush3.bf16.msra.mxu0 %v7547_v11 }
 0xe1f   : > { %7552 = vmatprep.subr.bf16.mxu0 %v7551_v27 }
 0xe22   : > { %7554 = vmatpush3.bf16.msra.mxu0 %v7551_v27 }
 0xe8d   : > { %v7959_v59 = vpop.permute.xlu0 %7958 }
 0xe8e   : > { %v7961_v9 = vunpack.i.h.bf16 %v7959_v59  ;;  %v7960_v14 = vunpack.i.l.bf16 %v7959_v59  ;;  %v4201_v59 = vld [vmem:[%s10680_s16 + $0x70] sm:$0xff] }
 0xe90   : > { %v3949_v28 = vsel %vm3948_vm11, %v3946_v48, %v7960_v14  ;;  %v3950_v29 = vsel %vm3948_vm11, %v3947_v22, %v7961_v9  ;;  %v7585_v9 = vpack.c.bf16 %v4201_v59, %v4199_v26  ;;  %v4204_v14 = vld [vmem:[%s10680_s16 + $0x88] sm:$0xff]  ;;  %v4095_v48 = vld [vmem:[%s10681_s14 + $0x40] sm:$0xff] }
 0xe91   : > { %7255 = vmatprep.mubr.f32.mxu1 %v3949_v28  ;;  %v7587_v22 = vpack.c.bf16 %v4206_v19, %v4204_v14  ;;  %v4096_v28 = vld [vmem:[%s10681_s14 + $0x48] sm:$0xff] }
 0xe92   : > { %7256 = vmatmul.mubr.f32.vlgmr.msra.gmra.mrb[26].mxu1 %v3950_v29  ;;  %v4203_v29 = vld [vmem:[%s10680_s16 + $0x80] sm:$0xff] }
 0xe93   : > { %4295 = vmatprep.mubr.f32.mxu1 %v8560_v6  ;;  %7574 = vmatpush1.bf16.msra.mxu1 %v7573_v47  ;;  %v7593_v47 = vpack.c.bf16 %v4209_v12, %v4207_v10  ;;  %v10146_v12 = vld [vmem:[#allocation6] sm:$0xff] }
 0xe94   : > { %7576 = vmatprep.subr.bf16.mxu1 %v7575_v54  ;;  %v7563_v54 = vpack.c.bf16 %v4100_v33, %v4099_v32  ;;  %v10149_v32 = vld [vmem:[#allocation6 + $0x8] sm:$0xff] }
 0xe97   : > { %7578 = vmatpush1.bf16.msra.mxu1 %v7577_v36  ;;  %v7597_v36 = vpack.c.bf16 %v4213_v38, %v4211_v1 }
 0xe98   : > { %7580 = vmatprep.subr.bf16.mxu1 %v7579_v5 }
 0xe9b   : > { %7582 = vmatpush1.bf16.msra.mxu1 %v7581_v50  ;;  %v6832_v50 = vld [vmem:[%s9233_s26 + $0x1] ss:$0 sm:$0xff] }
 0xe9c   : > { %7584 = vmatprep.subr.bf16.mxu1 %v7583_v20 }
 0xe9f   : > { %7586 = vmatpush1.bf16.msra.mxu1 %v7585_v9  ;;  %v4219_v9 = vld [vmem:[%s9258_s25] sm:$0x3] }
 0xea0   : > { %7588 = vmatprep.subr.bf16.mxu1 %v7587_v22  ;;  %v4224_v14 = vrot.slane %v4219_v9, %v9354_v34 }
 0xf65   : > { %v7257_v60 = vpop.f32.mrb[26].mxu1 }
 0xf66   : > { %v4046_v21 = vadd.f32 %v7257_v60, %v6831_v57  ;;  %v4040_v40 = vpop.f32.mrb[27].mxu1  ;;  %v7555_v60 = vpack.c.bf16 %v4096_v28, %v4095_v48 }
 0xf67   : > { %v4041_v35 = vadd.f32 %v6831_v57, %v4040_v40  ;;  %v4205_v57 = vld [vmem:[%s10680_s16 + $0x90] sm:$0xff]  ;;  %v4208_v40 = vld [vmem:[%s10680_s16 + $0xa8] sm:$0xff] }
 0xf68   : > { %v10035_v23 = vadd.f32 %v8063_v15, %v4046_v21  ;;  %v7589_v21 = vpack.c.bf16 %v4205_v57, %v4203_v29  ;;  %v4097_v15 = vld [vmem:[%s10681_s14 + $0x50] sm:$0xff]  ;;  %7556 = vmatprep.subr.bf16.mxu0 %v7555_v60 }
 0xf69   : > { %v10037_v52 = vadd.f32 %v8064_v24, %v4041_v35  ;;  %v4210_v35 = vld [vmem:[%s10680_s16 + $0xb8] sm:$0xff]  ;;  %v7559_v2 = vpack.c.bf16 %v4098_v58, %v4097_v15  ;;  %7558 = vmatpush3.bf16.msra.mxu0 %v7555_v60  ;;  %v6834_v60 = vld [vmem:[%s1207_s2] ss:$0 sm:$0xff]  ;;  %s10685_s2 = sld [smem:[#allocation42_spill]] }
 0xf6a   : > { %4055 = vadd.xlane.f32.xlu0 %v10035_v23  ;;  %v7591_v24 = vpack.c.bf16 %v4210_v35, %v4208_v40  ;;  %7590 = vmatpush1.bf16.msra.mxu1 %v7589_v21 }
 0xf6b   : > { %4053 = vadd.xlane.f32.xlu1 %v10037_v52  ;;  %7560 = vmatprep.subr.bf16.mxu0 %v7559_v2 }
 0xf6c   : > { %7592 = vmatprep.subr.bf16.mxu1 %v7591_v24 }
 0xf6d   : > { %7562 = vmatpush3.bf16.msra.mxu0 %v7559_v2 }
 0xf6e   : > { %7594 = vmatpush1.bf16.msra.mxu1 %v7593_v47  ;;  %7564 = vmatprep.subr.bf16.mxu0 %v7563_v54 }
 0xf6f   : > { %7596 = vmatprep.subr.bf16.mxu1 %v7595_v30 }
 0xf71   : > { %7566 = vmatpush3.bf16.msra.mxu0 %v7563_v54 }
 0xf72   : > { %7598 = vmatpush1.bf16.msra.mxu1 %v7597_v36 }
 0xff7   : > { %v4056_v3 = vpop.xlane.xlu0 %4055 }
 0xff8   : > { %v4054_v8 = vpop.xlane.xlu1 %4053  ;;  %v4058_v17 = vmul.f32 0.0078125, %v4056_v3  ;;  %v7599_v3 = vpack.c.bf16 %v4218_v0, %v4216_v53 }
 0xff9   : > { %v4057_v37 = vmul.f32 0.0078125, %v4054_v8  ;;  %v7567_v8 = vpack.c.bf16 %v4102_v63, %v4101_v31 }
 0xffa   : > { %v10057_v42 = vsub.f32 %v10035_v23, %v4058_v17  ;;  %v4215_v17 = vld [vmem:[%s10680_s16 + $0xe0] sm:$0xff]  ;;  %7600 = vmatprep.subr.bf16.mxu1 %v7599_v3 }
 0xffb   : > { %v10054_v41 = vsub.f32 %v10037_v52, %v4057_v37  ;;  %v4217_v37 = vld [vmem:[%s10680_s16 + $0xf0] sm:$0xff]  ;;  %7568 = vmatprep.subr.bf16.mxu0 %v7567_v8 }
 0xffc   : > { %v4062_v46 = vmul.f32 %v10057_v42, %v10057_v42  ;;  %7570 = vmatpush3.bf16.msra.mxu0 %v7567_v8 }
 0xffd   : > { %v4061_v62 = vmul.f32 %v10054_v41, %v10054_v41  ;;  %7293 = vmatprep.subr.mxu0 %v8560_v6 }
 0xfff   : > { %4063 = vadd.xlane.f32.xlu0 %v4061_v62  ;;  %v7601_v62 = vpack.c.bf16 %v4217_v37, %v4215_v17 }
0x1001   : > { %7602 = vmatpush1.bf16.msra.mxu1 %v7601_v62 }
0x1002   : > { %7338 = vmatprep.subr.mxu1 %v8560_v6 }
0x1003   : > { %4065 = vadd.xlane.f32.xlu0 %v4062_v46  ;;  %v4185_v46 = vld [vmem:[#allocation3] sm:$0xff] }
0x1004   : > { %4296 = vmatmul.mubr.f32.vlgmr.msra.gmra.mrb[28].mxu1 %v4185_v46 }
0x1005   : > { %4301 = vmatprep.mubr.f32.mxu1 %v8560_v6 }
0x1008   : > { %4302 = vmatmul.mubr.f32.gmra.mrb[30].mxu1 %v4186_v49 }
0x1009   : > { %7340 = vmatprep.mubr.msk.f32.mxu1 %vm8561_vm0, %v8560_v6 }
0x108c   : > { %v4064_v51 = vpop.xlane.xlu0 %4063 }
0x108d   : > { %v4067_v55 = vmul.f32 0.0078125, %v4064_v51 }
0x108f   : > { %v4069_v5 = vadd.f32 1e-05, %v4067_v55 }
0x1090   : > { %v4066_v25 = vpop.xlane.xlu0 %4065 }
0x1091   : > { %8013 = vrsqrt.f32 %v4069_v5  ;;  %v4068_v16 = vmul.f32 0.0078125, %v4066_v25 }
0x1093   : > { %v4070_v4 = vadd.f32 1e-05, %v4068_v16 }
0x1095   : > { %8015 = vrsqrt.f32 %v4070_v4 }
0x109b   : > { %v8014_v11 = vpop.eup %8013 }
0x109c   : > { %v4073_v13 = vmul.f32 %v8014_v11, %v10054_v41 }
0x109e   : > { %v4079_v56 = vmul.f32 %v6832_v50, %v4073_v13 }
0x109f   : > { %v8016_v20 = vpop.eup %8015 }
0x10a0   : > { %v4074_v7 = vmul.f32 %v8016_v20, %v10057_v42  ;;  %v4085_v26 = vadd.f32 %v6833_v61, %v4079_v56  ;;  %v4228_v42 = vrot.slane %v4219_v9, %v9358_v43 }
0x10a2   : > { %v4080_v59 = vmul.f32 %v6832_v50, %v4074_v7  ;;  %7290 = vmatprep.mubr.f32.mxu0 %v4085_v26 }
0x10a4   : > { %v4086_v27 = vadd.f32 %v6833_v61, %v4080_v59 }
0x10a6   : > { %7291 = vmatmul.mubr.f32.vlgmr.msra.gmra.mrb[12].mxu0 %v4086_v27 }
0x10a7   : > { %7295 = vmatprep.mubr.msk.f32.mxu0 %vm8561_vm0, %v8560_v6 }
0x10d7   : > { %v4297_v19 = vpop.f32.mrb[28].mxu1 }
0x10d8   : > { %v10112_v48 = vadd.f32 %v4297_v19, %v4224_v14  ;;  %v4299_v41 = vpop.f32.mrb[29].mxu1 }
0x10d9   : > { %v10138_v10 = vadd.f32 %v4299_v41, %v4228_v42 }
0x10da   : > { %7294 = vmatpush3.xpose.msk.msra.mxu0 %vm1694_vm1, %v10112_v48 }
0x10db   : > { %v4303_v22 = vpop.f32.mrb[30].mxu1  ;;  %7298 = vmatprep.subr.mxu0 %v8560_v6 }
0x10dc   : > { %v10118_v28 = vadd.f32 %v4303_v22, %v4224_v14  ;;  %v4305_v29 = vpop.f32.mrb[31].mxu1 }
0x10dd   : > { %v10120_v57 = vadd.f32 %v4305_v29, %v4228_v42 }
0x1179   : > { %v7292_v21 = vpop.f32.mrb[12].mxu0 }
0x117a   : > { %v4176_v40 = vpop.f32.mrb[13].mxu0  ;;  %v4182_v15 = vadd.f32 %v7292_v21, %v6834_v60 }
0x117b   : > { %v4177_v35 = vadd.f32 %v6834_v60, %v4176_v40 }
0x117c   : > { %v10135_v58 = vmul.f32 0.17677669, %v4182_v15 }
0x117d   : > { %v10127_v24 = vmul.f32 0.17677669, %v4177_v35 }
0x117f   : > { %7296 = vmatmul.mubr.msk.f32.vlgmr.msra.gmra.mrb[14].mxu0 %vm1694_vm1, %v10127_v24 }
0x1180   : > { %7299 = vmatpush3.xpose.msk.msra.mxu0 %vm1694_vm1, %v10118_v28  ;;  %7300 = vmatprep.mubr.msk.f32.mxu0 %vm8561_vm0, %v8560_v6 }
0x1181   : > { %7303 = vmatprep.subr.mxu0 %v8560_v6 }
0x1183   : > { %7301 = vmatmul.mubr.msk.f32.vlgmr.msra.gmra.mrb[16].mxu0 %vm1694_vm1, %v10135_v58 }
0x1184   : > { %7304 = vmatpush3.msra.mxu0 %v10138_v10  ;;  %7305 = vmatprep.mubr.msk.f32.mxu0 %vm8561_vm0, %v8560_v6 }
0x1185   : > { %7308 = vmatprep.subr.mxu0 %v8560_v6 }
0x1252   : > { %v4384_v2 = vpop.f32.mrb[14].mxu0 }
0x1253   : > { %v4385_v18 = vadd.f32 %v4384_v2, %v10146_v12  ;;  %v7297_v44 = vpop.f32.mrb[15].mxu0 }
0x1255   : > { %v4464_v33 = vsel %vm2000_vm9, %v4385_v18, -inf }
0x1256   : > { %4465 = vmax.xlane.f32.xlu1 %v4464_v33  ;;  %v4460_v47 = vpop.f32.mrb[16].mxu0 }
0x1257   : > { %v4461_v30 = vadd.f32 %v4460_v47, %v10149_v32  ;;  %v7302_v1 = vpop.f32.mrb[17].mxu0 }
0x1259   : > { %v4467_v38 = vsel %vm2000_vm9, %v4461_v30, -inf }
0x125a   : > { %4468 = vmax.xlane.f32.xlu0 %v4467_v38 }
0x12e3   : > { %v4466_v54 = vpop.xlane.xlu1 %4465 }
0x12e4   : > { %v4470_v53 = vsub.f32 %v4385_v18, %v4466_v54 }
0x12e6   : > { %v4472_v0 = vmul.f32 1.442695, %v4470_v53 }
0x12e7   : > { %v4469_v31 = vpop.xlane.xlu0 %4468 }
0x12e8   : > { %8017 = vpow2.f32 %v4472_v0  ;;  %v4471_v63 = vsub.f32 %v4461_v30, %v4469_v31 }
0x12ea   : > { %v4474_v36 = vmul.f32 1.442695, %v4471_v63 }
0x12ec   : > { %8019 = vpow2.f32 %v4474_v36 }
0x12f2   : > { %v8018_v3 = vpop.eup %8017 }
0x12f3   : > { %v4476_v8 = vsel %vm2000_vm9, %v8018_v3, 0.0 }
0x12f4   : > { %4477 = vadd.xlane.f32.xlu1 %v4476_v8 }
0x12f6   : > { %v8020_v17 = vpop.eup %8019 }
0x12f7   : > { %v4479_v37 = vsel %vm2000_vm9, %v8020_v17, 0.0 }
0x12f8   : > { %4480 = vadd.xlane.f32.xlu0 %v4479_v37 }
0x1305   : > { %4634 = vrot.lane.b32.xlu1 %v10112_v48, %s8563_s15 }
0x1309   : > { %4712 = vrot.lane.b32.xlu1 %v10118_v28, %s8563_s15 }
0x130d   : > { %4710 = vrot.lane.b32.xlu1 %v10135_v58, %s8563_s15 }
0x130e   : > { %4632 = vrot.lane.b32.xlu0 %v10127_v24, %s8563_s15 }
0x1381   : > { %v4478_v62 = vpop.xlane.xlu1 %4477 }
0x1382   : > { %8021 = vrcp.f32 %v4478_v62 }
0x1385   : > { %v4481_v46 = vpop.xlane.xlu0 %4480  ;;  %v4635_v5 = vpop.permute.xlu1 %4634 }
0x1386   : > { %8023 = vrcp.f32 %v4481_v46 }
0x1389   : > { %v4713_v16 = vpop.permute.xlu1 %4712  ;;  %v4633_v4 = vpop.permute.xlu0 %4632 }
0x138c   : > { %v8022_v49 = vpop.eup %8021 }
0x138d   : > { %v4484_v51 = vmul.f32 %v8022_v49, %v8018_v3  ;;  %v4711_v11 = vpop.permute.xlu1 %4710 }
0x138f   : > { %7306 = vmatmul.mubr.msk.f32.vlgmr.msra.gmra.mrb[18].mxu0 %vm2000_vm9, %v4484_v51 }
0x1390   : > { %v8024_v55 = vpop.eup %8023  ;;  %7309 = vmatpush3.msra.mxu0 %v10120_v57  ;;  %7310 = vmatprep.mubr.msk.f32.mxu0 %vm8561_vm0, %v8560_v6 }
0x1391   : > { %v4485_v25 = vmul.f32 %v8024_v55, %v8020_v17  ;;  %7313 = vmatprep.subr.mxu0 %v8560_v6 }
0x1393   : > { %7311 = vmatmul.mubr.msk.f32.vlgmr.msra.gmra.mrb[20].mxu0 %vm2000_vm9, %v4485_v25 }
0x1394   : > { %7315 = vmatprep.mubr.msk.f32.mxu0 %vm8561_vm0, %v8560_v6 }
0x1397   : > { %7314 = vmatpush3.xpose.msk.msra.mxu0 %vm1694_vm1, %v4635_v5 }
0x1398   : > { %7318 = vmatprep.subr.mxu0 %v8560_v6 }
0x139a   : > { %7316 = vmatmul.mubr.msk.f32.vlgmr.msra.gmra.mrb[22].mxu0 %vm1694_vm1, %v4633_v4 }
0x139b   : > { %7319 = vmatpush3.xpose.msk.msra.mxu0 %vm1694_vm1, %v4713_v16  ;;  %7320 = vmatprep.mubr.msk.f32.mxu0 %vm8561_vm0, %v8560_v6 }
0x139c   : > { %7323 = vmatprep.subr.mxu0 %v8560_v6 }
0x139e   : > { %7321 = vmatmul.mubr.msk.f32.vlgmr.msra.gmra.mrb[24].mxu0 %vm1694_vm1, %v4711_v11 }
0x139f   : > { %7325 = vmatprep.mubr.msk.f32.mxu0 %vm8561_vm0, %v8560_v6 }
0x1462   : > { %v10182_v50 = vpop.f32.mrb[18].mxu0 }
0x1463   : > { %v7307_v13 = vpop.f32.mrb[19].mxu0 }
0x1466   : > { %v10184_v61 = vpop.f32.mrb[20].mxu0 }
0x1467   : > { %v7312_v56 = vpop.f32.mrb[21].mxu0 }
0x146d   : > { %v4706_v20 = vpop.f32.mrb[22].mxu0 }
0x146e   : > { %v4707_v7 = vadd.f32 %v4706_v20, %v10146_v12  ;;  %v7317_v26 = vpop.f32.mrb[23].mxu0 }
0x1470   : > { %v4788_v59 = vsel %vm2000_vm9, %v4707_v7, -inf }
0x1471   : > { %4789 = vmax.xlane.f32.xlu1 %v4788_v59  ;;  %v4784_v27 = vpop.f32.mrb[24].mxu0 }
0x1472   : > { %v4785_v9 = vadd.f32 %v4784_v27, %v10149_v32  ;;  %v7322_v14 = vpop.f32.mrb[25].mxu0 }
0x1474   : > { %v4791_v19 = vsel %vm2000_vm9, %v4785_v9, -inf }
0x1475   : > { %4792 = vmax.xlane.f32.xlu0 %v4791_v19 }
0x1482   : > { %4811 = vrot.lane.b32.xlu1 %v10138_v10, %s8563_s15 }
0x1486   : > { %4966 = vrot.lane.b32.xlu1 %v10112_v48, %s8565_s19 }
0x148a   : > { %5044 = vrot.lane.b32.xlu1 %v10118_v28, %s8565_s19 }
0x148e   : > { %4964 = vrot.lane.b32.xlu1 %v10127_v24, %s8565_s19 }
0x14fe   : > { %v4790_v41 = vpop.xlane.xlu1 %4789 }
0x14ff   : > { %v4794_v42 = vsub.f32 %v4707_v7, %v4790_v41 }
0x1501   : > { %v4796_v22 = vmul.f32 1.442695, %v4794_v42 }
0x1502   : > { %v4812_v29 = vpop.permute.xlu1 %4811  ;;  %v4793_v60 = vpop.xlane.xlu0 %4792 }
0x1503   : > { %8025 = vpow2.f32 %v4796_v22  ;;  %v4795_v21 = vsub.f32 %v4785_v9, %v4793_v60  ;;  %7324 = vmatpush3.msra.mxu0 %v4812_v29 }
0x1504   : > { %7328 = vmatprep.subr.mxu0 %v8560_v6 }
0x1505   : > { %v4798_v40 = vmul.f32 1.442695, %v4795_v21 }
0x1506   : > { %v4967_v35 = vpop.permute.xlu1 %4966 }
0x1507   : > { %8027 = vpow2.f32 %v4798_v40 }
0x150a   : > { %v5045_v15 = vpop.permute.xlu1 %5044 }
0x150b   : > { %7339 = vmatpush3.xpose.msk.msra.mxu1 %vm1694_vm1, %v5045_v15 }
0x150c   : > { %7348 = vmatprep.subr.mxu1 %v8560_v6 }
0x150d   : > { %v8026_v2 = vpop.eup %8025 }
0x150e   : > { %v4800_v18 = vsel %vm2000_vm9, %v8026_v2, 0.0  ;;  %v4965_v63 = vpop.permute.xlu1 %4964 }
0x150f   : > { %4801 = vadd.xlane.f32.xlu0 %v4800_v18 }
0x1511   : > { %v8028_v44 = vpop.eup %8027 }
0x1512   : > { %v4803_v33 = vsel %vm2000_vm9, %v8028_v44, 0.0 }
0x1513   : > { %4804 = vadd.xlane.f32.xlu0 %v4803_v33 }
0x1529   : > { %4888 = vrot.lane.b32.xlu0 %v10120_v57, %s8563_s15 }
0x152d   : > { %5042 = vrot.lane.b32.xlu0 %v10135_v58, %s8565_s19 }
0x159c   : > { %v4802_v47 = vpop.xlane.xlu0 %4801 }
0x159d   : > { %8029 = vrcp.f32 %v4802_v47 }
0x15a0   : > { %v4805_v30 = vpop.xlane.xlu0 %4804 }
0x15a1   : > { %8031 = vrcp.f32 %v4805_v30 }
0x15a4   : > { %v4889_v1 = vpop.permute.xlu0 %4888 }
0x15a7   : > { %v8030_v38 = vpop.eup %8029 }
0x15a8   : > { %v4808_v54 = vmul.f32 %v8030_v38, %v8026_v2  ;;  %v5043_v53 = vpop.permute.xlu0 %5042 }
0x15a9   : > { %7341 = vmatmul.mubr.msk.f32.vlgmr.msra.gmra.mrb[32].mxu1 %vm1694_vm1, %v5043_v53 }
0x15aa   : > { %7326 = vmatmul.mubr.msk.f32.vlgmr.msra.gmra.mrb[26].mxu0 %vm2000_vm9, %v4808_v54  ;;  %7350 = vmatprep.mubr.msk.f32.mxu1 %vm8561_vm0, %v8560_v6 }
0x15ab   : > { %v8032_v0 = vpop.eup %8031  ;;  %7329 = vmatpush3.msra.mxu0 %v4889_v1  ;;  %7330 = vmatprep.mubr.msk.f32.mxu0 %vm8561_vm0, %v8560_v6 }
0x15ac   : > { %v4809_v31 = vmul.f32 %v8032_v0, %v8028_v44  ;;  %7333 = vmatprep.subr.mxu0 %v8560_v6 }
0x15ae   : > { %7331 = vmatmul.mubr.msk.f32.vlgmr.msra.gmra.mrb[28].mxu0 %vm2000_vm9, %v4809_v31 }
0x15af   : > { %7335 = vmatprep.mubr.msk.f32.mxu0 %vm8561_vm0, %v8560_v6 }
0x15b2   : > { %7334 = vmatpush3.xpose.msk.msra.mxu0 %vm1694_vm1, %v4967_v35 }
0x15b3   : > { %7343 = vmatprep.subr.mxu0 %v8560_v6 }
0x15b5   : > { %7336 = vmatmul.mubr.msk.f32.vlgmr.msra.gmra.mrb[30].mxu0 %vm1694_vm1, %v4965_v63 }
0x15b6   : > { %7345 = vmatprep.mubr.msk.f32.mxu0 %vm8561_vm0, %v8560_v6 }
0x167c   : > { %v5116_v36 = vpop.f32.mrb[32].mxu1 }
0x167d   : > { %v5117_v3 = vadd.f32 %v5116_v36, %v10149_v32  ;;  %v10223_v8 = vpop.f32.mrb[26].mxu0  ;;  %v7342_v17 = vpop.f32.mrb[33].mxu1 }
0x167e   : > { %v7327_v37 = vpop.f32.mrb[27].mxu0 }
0x167f   : > { %v5123_v62 = vsel %vm2000_vm9, %v5117_v3, -inf }
0x1680   : > { %5124 = vmax.xlane.f32.xlu0 %v5123_v62 }
0x1681   : > { %v10226_v46 = vpop.f32.mrb[28].mxu0 }
0x1682   : > { %v7962_v49 = vpack.i.bf16 %v10226_v46, %v10223_v8  ;;  %v7332_v51 = vpop.f32.mrb[29].mxu0 }
0x1688   : > { %v5038_v55 = vpop.f32.mrb[30].mxu0 }
0x1689   : > { %v5039_v5 = vadd.f32 %v5038_v55, %v10146_v12  ;;  %v7337_v25 = vpop.f32.mrb[31].mxu0 }
0x168a   : > { %v5654_v25 = vld [vmem:[%s10685_s2] sm:$0xff] }
0x168b   : > { %v5120_v16 = vsel %vm2000_vm9, %v5039_v5, -inf }
0x168c   : > { %5121 = vmax.xlane.f32.xlu1 %v5120_v16  ;;  %v5655_v16 = vld [vmem:[%s10685_s2 + $0x8] sm:$0xff] }
0x169d   : > { %5142 = vrot.lane.b32.xlu1 %v10138_v10, %s8565_s19 }
0x16a1   : > { %5296 = vrot.lane.b32.xlu1 %v10112_v48, %s8564_s20 }
0x16a5   : > { %5374 = vrot.lane.b32.xlu1 %v10118_v28, %s8564_s20 }
0x16a9   : > { %5294 = vrot.lane.b32.xlu1 %v10127_v24, %s8564_s20 }
0x170d   : > { %v5125_v4 = vpop.xlane.xlu0 %5124 }
0x170e   : > { %v5127_v11 = vsub.f32 %v5117_v3, %v5125_v4  ;;  %v5656_v4 = vld [vmem:[%s10685_s2 + $0x10] sm:$0xff] }
0x1710   : > { %v5130_v13 = vmul.f32 1.442695, %v5127_v11  ;;  %v7603_v11 = vpack.c.bf16 %v5655_v16, %v5654_v25  ;;  %v5794_v25 = vld [vmem:[%s10686_s12 + $0x20] sm:$0xff]  ;;  %v5792_v16 = vld [vmem:[%s10686_s12 + $0x10] sm:$0xff] }
0x1712   : > { %8033 = vpow2.f32 %v5130_v13  ;;  %v5657_v13 = vld [vmem:[%s10685_s2 + $0x18] sm:$0xff] }
0x1719   : > { %v5122_v56 = vpop.xlane.xlu1 %5121 }
0x171a   : > { %v5126_v20 = vsub.f32 %v5039_v5, %v5122_v56  ;;  %v7607_v56 = vpack.c.bf16 %v5657_v13, %v5656_v4  ;;  %v5796_v4 = vld [vmem:[%s10686_s12 + $0x30] sm:$0xff] }
0x171b   : > { %v7669_v13 = vpack.c.bf16 %v5796_v4, %v5792_v16  ;;  %v5828_v16 = vld [vmem:[%s10686_s12 + $0x130] sm:$0xff]  ;;  %v5831_v4 = vld [vmem:[%s10686_s12 + $0x148] sm:$0xff] }
0x171c   : > { %v8034_v7 = vpop.eup %8033  ;;  %v5128_v26 = vmul.f32 1.442695, %v5126_v20  ;;  %v5658_v20 = vld [vmem:[%s10685_s2 + $0x20] sm:$0xff] }
0x171d   : > { %v5143_v59 = vpop.permute.xlu1 %5142  ;;  %v5135_v27 = vsel %vm2000_vm9, %v8034_v7, 0.0 }
0x171e   : > { %8035 = vpow2.f32 %v5128_v26  ;;  %7344 = vmatpush3.msra.mxu0 %v5143_v59  ;;  %5136 = vadd.xlane.f32.xlu0 %v5135_v27  ;;  %v5660_v59 = vld [vmem:[%s10685_s2 + $0x30] sm:$0xff]  ;;  %v5661_v27 = vld [vmem:[%s10685_s2 + $0x38] sm:$0xff] }
0x171f   : > { %7353 = vmatprep.subr.mxu0 %v8560_v6 }
0x1721   : > { %v5297_v42 = vpop.permute.xlu1 %5296 }
0x1725   : > { %v5375_v29 = vpop.permute.xlu1 %5374 }
0x1728   : > { %v8036_v48 = vpop.eup %8035 }
0x1729   : > { %v5132_v28 = vsel %vm2000_vm9, %v8036_v48, 0.0  ;;  %v5295_v21 = vpop.permute.xlu1 %5294 }
0x172a   : > { %5133 = vadd.xlane.f32.xlu0 %v5132_v28  ;;  %v5662_v28 = vld [vmem:[%s10685_s2 + $0x40] sm:$0xff] }
0x1740   : > { %5218 = vrot.lane.b32.xlu0 %v10120_v57, %s8565_s19 }
0x1744   : > { %5372 = vrot.lane.b32.xlu0 %v10135_v58, %s8564_s20 }
0x17ab   : > { %v5137_v24 = vpop.xlane.xlu0 %5136 }
0x17ac   : > { %8037 = vrcp.f32 %v5137_v24  ;;  %v5663_v24 = vld [vmem:[%s10685_s2 + $0x48] sm:$0xff] }
0x17b6   : > { %v8038_v14 = vpop.eup %8037 }
0x17b7   : > { %v5134_v9 = vpop.xlane.xlu0 %5133  ;;  %v5141_v19 = vmul.f32 %v8038_v14, %v8034_v7  ;;  %v5659_v7 = vld [vmem:[%s10685_s2 + $0x28] sm:$0xff]  ;;  %v5664_v14 = vld [vmem:[%s10685_s2 + $0x50] sm:$0xff] }
0x17b8   : > { %8039 = vrcp.f32 %v5134_v9  ;;  %v7611_v26 = vpack.c.bf16 %v5659_v7, %v5658_v20  ;;  %v7619_v9 = vpack.c.bf16 %v5663_v24, %v5662_v28  ;;  %v5801_v20 = vld [vmem:[%s10686_s12 + $0x58] sm:$0xff]  ;;  %v5800_v28 = vld [vmem:[%s10686_s12 + $0x50] sm:$0xff] }
0x17b9   : > { %v5805_v7 = vld [vmem:[%s10686_s12 + $0x78] sm:$0xff] }
0x17bb   : > { %v5219_v41 = vpop.permute.xlu0 %5218 }
0x17bc   : > { %7349 = vmatpush3.msra.mxu1 %v5219_v41 }
0x17bd   : > { %7351 = vmatmul.mubr.msk.f32.vlgmr.msra.gmra.mrb[34].mxu1 %vm2000_vm9, %v5141_v19  ;;  %7358 = vmatprep.subr.mxu1 %v8560_v6  ;;  %v5665_v19 = vld [vmem:[%s10685_s2 + $0x58] sm:$0xff] }
0x17be   : > { %7360 = vmatprep.mubr.msk.f32.mxu1 %vm8561_vm0, %v8560_v6  ;;  %v7623_v41 = vpack.c.bf16 %v5665_v19, %v5664_v14  ;;  %v5807_v14 = vld [vmem:[%s10686_s12 + $0x88] sm:$0xff] }
0x17bf   : > { %v5373_v58 = vpop.permute.xlu0 %5372  ;;  %v5811_v19 = vld [vmem:[%s10686_s12 + $0xa8] sm:$0xff] }
0x17c2   : > { %v8040_v22 = vpop.eup %8039 }
0x17c3   : > { %v5140_v60 = vmul.f32 %v8040_v22, %v8036_v48  ;;  %7359 = vmatpush3.xpose.msk.msra.mxu1 %vm1694_vm1, %v5375_v29  ;;  %v7615_v48 = vpack.c.bf16 %v5661_v27, %v5660_v59  ;;  %v5667_v22 = vld [vmem:[%s10685_s2 + $0x68] sm:$0xff]  ;;  %v7671_v59 = vpack.c.bf16 %v5805_v7, %v5801_v20  ;;  %v5798_v27 = vld [vmem:[%s10686_s12 + $0x40] sm:$0xff]  ;;  %v5837_v20 = vld [vmem:[%s10686_s12 + $0x178] sm:$0xff] }
0x17c4   : > { %7368 = vmatprep.subr.mxu1 %v8560_v6 }
0x17c5   : > { %7346 = vmatmul.mubr.msk.f32.vlgmr.msra.gmra.mrb[32].mxu0 %vm2000_vm9, %v5140_v60  ;;  %v5668_v60 = vld [vmem:[%s10685_s2 + $0x70] sm:$0xff] }
0x17c6   : > { %7354 = vmatpush3.xpose.msk.msra.mxu0 %vm1694_vm1, %v5297_v42  ;;  %7361 = vmatmul.mubr.msk.f32.vlgmr.msra.gmra.mrb[36].mxu1 %vm1694_vm1, %v5373_v58  ;;  %v5666_v42 = vld [vmem:[%s10685_s2 + $0x60] sm:$0xff]  ;;  %v5669_v58 = vld [vmem:[%s10685_s2 + $0x78] sm:$0xff] }
0x17c7   : > { %7355 = vmatprep.mubr.msk.f32.mxu0 %vm8561_vm0, %v8560_v6  ;;  %7363 = vmatprep.subr.mxu0 %v8560_v6  ;;  %v7627_v29 = vpack.c.bf16 %v5667_v22, %v5666_v42  ;;  %v7643_v42 = vpack.c.bf16 %v5811_v19, %v5807_v14  ;;  %v5809_v22 = vld [vmem:[%s10686_s12 + $0x98] sm:$0xff]  ;;  %v5843_v14 = vld [vmem:[%s10686_s12 + $0x1a8] sm:$0xff] }
0x17c8   : > { %7370 = vmatprep.mubr.msk.f32.mxu1 %vm8561_vm0, %v8560_v6 }
0x17c9   : > { %7356 = vmatmul.mubr.msk.f32.vlgmr.msra.gmra.mrb[34].mxu0 %vm1694_vm1, %v5295_v21  ;;  %v7631_v21 = vpack.c.bf16 %v5669_v58, %v5668_v60  ;;  %v5806_v60 = vld [vmem:[%s10686_s12 + $0x80] sm:$0xff] }
0x17ca   : > { %7365 = vmatprep.mubr.msk.f32.mxu0 %vm8561_vm0, %v8560_v6 }
0x1890   : > { %v5290_v40 = vpop.f32.mrb[34].mxu1 }
0x1891   : > { %v7352_v35 = vpop.f32.mrb[35].mxu1 }
0x1898   : > { %v5214_v15 = vpop.f32.mrb[32].mxu0 }
0x1899   : > { %v7967_v2 = vpack.i.bf16 %v5290_v40, %v5214_v15  ;;  %v7347_v18 = vpop.f32.mrb[33].mxu0  ;;  %v5446_v44 = vpop.f32.mrb[36].mxu1 }
0x189a   : > { %v5447_v33 = vadd.f32 %v5446_v44, %v10149_v32  ;;  %v7362_v47 = vpop.f32.mrb[37].mxu1 }
0x189c   : > { %v5368_v30 = vpop.f32.mrb[34].mxu0  ;;  %v5453_v1 = vsel %vm2000_vm9, %v5447_v33, -inf }
0x189d   : > { %v5369_v38 = vadd.f32 %v5368_v30, %v10146_v12  ;;  %5454 = vmax.xlane.f32.xlu0 %v5453_v1  ;;  %v7357_v54 = vpop.f32.mrb[35].mxu0 }
0x189f   : > { %v5450_v53 = vsel %vm2000_vm9, %v5369_v38, -inf }
0x18a0   : > { %5451 = vmax.xlane.f32.xlu1 %v5450_v53 }
0x18b1   : > { %5472 = vrot.lane.b32.xlu1 %v10138_v10, %s8564_s20 }
0x18b5   : > { %7963 = vrot.lane.b32.xlu1 %v7962_v49, %s8564_s20 }
0x18b9   : > { %7968 = vrot.lane.b32.xlu1 %v7967_v2, %s8565_s19 }
0x192a   : > { %v5455_v32 = vpop.xlane.xlu0 %5454 }
0x192b   : > { %v5457_v0 = vsub.f32 %v5447_v33, %v5455_v32 }
0x192d   : > { %v5460_v31 = vmul.f32 1.442695, %v5457_v0  ;;  %v5452_v63 = vpop.xlane.xlu1 %5451 }
0x192e   : > { %v5456_v12 = vsub.f32 %v5369_v38, %v5452_v63 }
0x192f   : > { %8041 = vpow2.f32 %v5460_v31 }
0x1930   : > { %v5458_v36 = vmul.f32 1.442695, %v5456_v12 }
0x1931   : > { %v5473_v3 = vpop.permute.xlu1 %5472 }
0x1932   : > { %8043 = vpow2.f32 %v5458_v36  ;;  %7364 = vmatpush3.msra.mxu0 %v5473_v3 }
0x1933   : > { %7604 = vmatprep.subr.bf16.mxu0 %v7603_v11 }
0x1935   : > { %v7964_v44 = vpop.permute.xlu1 %7963 }
0x1936   : > { %v7966_v47 = vunpack.i.h.bf16 %v7964_v44  ;;  %v7965_v30 = vunpack.i.l.bf16 %v7964_v44 }
0x1938   : > { %v5649_v53 = vsel %vm1694_vm1, %v10184_v61, %v7966_v47  ;;  %v5648_v31 = vsel %vm1694_vm1, %v10182_v50, %v7965_v30  ;;  %v6859_v50 = vld [vmem:[%s1214_s0] ss:$0 sm:$0xff] }
0x1939   : > { %v8042_v17 = vpop.eup %8041  ;;  %v7969_v33 = vpop.permute.xlu1 %7968 }
0x193a   : > { %v5465_v10 = vsel %vm2000_vm9, %v8042_v17, 0.0  ;;  %v7971_v1 = vunpack.i.h.bf16 %v7969_v33  ;;  %v7970_v38 = vunpack.i.l.bf16 %v7969_v33 }
0x193b   : > { %5466 = vadd.xlane.f32.xlu0 %v5465_v10 }
0x193c   : > { %v8044_v37 = vpop.eup %8043  ;;  %v5650_v63 = vsel %vm3945_vm10, %v5648_v31, %v7970_v38  ;;  %v5651_v12 = vsel %vm3945_vm10, %v5649_v53, %v7971_v1  ;;  %v5815_v53 = vld [vmem:[%s10686_s12 + $0xc8] sm:$0xff] }
0x193d   : > { %v5462_v8 = vsel %vm2000_vm9, %v8044_v37, 0.0 }
0x193f   : > { %5463 = vadd.xlane.f32.xlu0 %v5462_v8 }
0x1955   : > { %5548 = vrot.lane.b32.xlu0 %v10120_v57, %s8564_s20 }
0x19c8   : > { %v5467_v62 = vpop.xlane.xlu0 %5466 }
0x19c9   : > { %8045 = vrcp.f32 %v5467_v62 }
0x19cc   : > { %v5464_v46 = vpop.xlane.xlu0 %5463 }
0x19cd   : > { %8047 = vrcp.f32 %v5464_v46  ;;  %v5791_v46 = vld [vmem:[%s10686_s12 + $0x8] sm:$0xff] }
0x19d0   : > { %v5549_v49 = vpop.permute.xlu0 %5548 }
0x19d1   : > { %7369 = vmatpush3.msra.mxu1 %v5549_v49  ;;  %v5795_v49 = vld [vmem:[%s10686_s12 + $0x28] sm:$0xff] }
0x19d3   : > { %v8046_v51 = vpop.eup %8045 }
0x19d4   : > { %v5471_v55 = vmul.f32 %v8046_v51, %v8042_v17  ;;  %v5793_v51 = vld [vmem:[%s10686_s12 + $0x18] sm:$0xff] }
0x19d6   : > { %7371 = vmatmul.mubr.msk.f32.vlgmr.msra.gmra.mrb[38].mxu1 %vm2000_vm9, %v5471_v55  ;;  %v7635_v55 = vpack.c.bf16 %v5795_v49, %v5791_v46  ;;  %v5827_v46 = vld [vmem:[%s10686_s12 + $0x128] sm:$0xff]  ;;  %v5825_v49 = vld [vmem:[%s10686_s12 + $0x118] sm:$0xff] }
0x19d7   : > { %v8048_v5 = vpop.eup %8047  ;;  %5940 = vmatprep.mubr.f32.mxu1 %v8560_v6 }
0x19d8   : > { %v5470_v57 = vmul.f32 %v8048_v5, %v8044_v37  ;;  %v5797_v5 = vld [vmem:[%s10686_s12 + $0x38] sm:$0xff]  ;;  %7636 = vmatprep.subr.bf16.mxu1 %v7635_v55 }
0x19d9   : > { %v5829_v55 = vld [vmem:[%s10686_s12 + $0x138] sm:$0xff] }
0x19da   : > { %7366 = vmatmul.mubr.msk.f32.vlgmr.msra.gmra.mrb[36].mxu0 %vm2000_vm9, %v5470_v57  ;;  %v5790_v57 = vld [vmem:[%s10686_s12] sm:$0xff] }
0x19db   : > { %7606 = vmatpush3.bf16.msra.mxu0 %v7603_v11  ;;  %v5799_v11 = vld [vmem:[%s10686_s12 + $0x48] sm:$0xff] }
0x19dc   : > { %7608 = vmatprep.subr.bf16.mxu0 %v7607_v56 }
0x19df   : > { %7610 = vmatpush3.bf16.msra.mxu0 %v7607_v56  ;;  %v5803_v56 = vld [vmem:[%s10686_s12 + $0x68] sm:$0xff] }
0x19e0   : > { %7612 = vmatprep.subr.bf16.mxu0 %v7611_v26 }
0x19e3   : > { %7614 = vmatpush3.bf16.msra.mxu0 %v7611_v26  ;;  %v7639_v26 = vpack.c.bf16 %v5803_v56, %v5799_v11  ;;  %v5833_v56 = vld [vmem:[%s10686_s12 + $0x158] sm:$0xff] }
0x19e4   : > { %7616 = vmatprep.subr.bf16.mxu0 %v7615_v48 }
0x19e7   : > { %7618 = vmatpush3.bf16.msra.mxu0 %v7615_v48  ;;  %v5802_v48 = vld [vmem:[%s10686_s12 + $0x60] sm:$0xff] }
0x19e8   : > { %7620 = vmatprep.subr.bf16.mxu0 %v7619_v9  ;;  %v7641_v24 = vpack.c.bf16 %v5802_v48, %v5798_v27  ;;  %v5834_v27 = vld [vmem:[%s10686_s12 + $0x160] sm:$0xff]  ;;  %v5832_v48 = vld [vmem:[%s10686_s12 + $0x150] sm:$0xff] }
0x19eb   : > { %7622 = vmatpush3.bf16.msra.mxu0 %v7619_v9  ;;  %v5804_v9 = vld [vmem:[%s10686_s12 + $0x70] sm:$0xff] }
0x19ec   : > { %7624 = vmatprep.subr.bf16.mxu0 %v7623_v41 }
0x19ef   : > { %7626 = vmatpush3.bf16.msra.mxu0 %v7623_v41  ;;  %v7673_v41 = vpack.c.bf16 %v5804_v9, %v5800_v28  ;;  %v5839_v9 = vld [vmem:[%s10686_s12 + $0x188] sm:$0xff] }
0x19f0   : > { %7628 = vmatprep.subr.bf16.mxu0 %v7627_v29 }
0x19f3   : > { %7630 = vmatpush3.bf16.msra.mxu0 %v7627_v29  ;;  %v5813_v29 = vld [vmem:[%s10686_s12 + $0xb8] sm:$0xff] }
0x19f4   : > { %7632 = vmatprep.subr.bf16.mxu0 %v7631_v21  ;;  %v7675_v58 = vpack.c.bf16 %v5813_v29, %v5809_v22  ;;  %v5845_v22 = vld [vmem:[%s10686_s12 + $0x1b8] sm:$0xff]  ;;  %v5838_v29 = vld [vmem:[%s10686_s12 + $0x180] sm:$0xff] }
0x19f7   : > { %7634 = vmatpush3.bf16.msra.mxu0 %v7631_v21  ;;  %v5810_v21 = vld [vmem:[%s10686_s12 + $0xa0] sm:$0xff] }
0x1aa9   : > { %v5620_v40 = vpop.f32.mrb[38].mxu1 }
0x1aaa   : > { %v7372_v35 = vpop.f32.mrb[39].mxu1 }
0x1aab   : > { %v5812_v35 = vld [vmem:[%s10686_s12 + $0xb0] sm:$0xff] }
0x1aad   : > { %v5544_v15 = vpop.f32.mrb[36].mxu0 }
0x1aae   : > { %v7972_v2 = vpack.i.bf16 %v5620_v40, %v5544_v15  ;;  %v7367_v18 = vpop.f32.mrb[37].mxu0  ;;  %v5808_v40 = vld [vmem:[%s10686_s12 + $0x90] sm:$0xff]  ;;  %v7645_v15 = vpack.c.bf16 %v5810_v21, %v5806_v60 }
0x1aaf   : > { %v5840_v21 = vld [vmem:[%s10686_s12 + $0x190] sm:$0xff] }
0x1ab0   : > { %7973 = vrot.lane.b32.xlu1 %v7972_v2, %s8563_s15  ;;  %v7677_v2 = vpack.c.bf16 %v5812_v35, %v5808_v40  ;;  %v5844_v40 = vld [vmem:[%s10686_s12 + $0x1b0] sm:$0xff] }
0x1b22   : > { %v7974_v54 = vpop.permute.xlu1 %7973 }
0x1b23   : > { %v7976_v32 = vunpack.i.h.bf16 %v7974_v54  ;;  %v7975_v0 = vunpack.i.l.bf16 %v7974_v54 }
0x1b25   : > { %v5652_v36 = vsel %vm3948_vm11, %v5650_v63, %v7975_v0  ;;  %v5653_v3 = vsel %vm3948_vm11, %v5651_v12, %v7976_v32  ;;  %v5819_v32 = vld [vmem:[%s10686_s12 + $0xe8] sm:$0xff]  ;;  %v5817_v0 = vld [vmem:[%s10686_s12 + $0xd8] sm:$0xff]  ;;  %v5814_v12 = vld [vmem:[%s10686_s12 + $0xc0] sm:$0xff] }
0x1b26   : > { %7405 = vmatprep.mubr.f32.mxu0 %v5652_v36  ;;  %v7647_v31 = vpack.c.bf16 %v5819_v32, %v5815_v53  ;;  %v5821_v63 = vld [vmem:[%s10686_s12 + $0xf8] sm:$0xff]  ;;  %v5818_v36 = vld [vmem:[%s10686_s12 + $0xe0] sm:$0xff]  ;;  %v5848_v32 = vld [vmem:[%s10686_s12 + $0x1d0] sm:$0xff] }
0x1b27   : > { %7406 = vmatmul.mubr.f32.vlgmr.msra.gmra.mrb[38].mxu0 %v5653_v3  ;;  %v7679_v3 = vpack.c.bf16 %v5821_v63, %v5817_v0  ;;  %v5852_v0 = vld [vmem:[%s10686_s12 + $0x1f0] sm:$0xff] }
0x1b28   : > { %6017 = vmatprep.mubr.f32.mxu0 %v8560_v6  ;;  %v7697_v63 = vpack.c.bf16 %v5852_v0, %v5848_v32 }
0x1bfa   : > { %v7407_v61 = vpop.f32.mrb[38].mxu0 }
0x1bfb   : > { %v5749_v17 = vadd.f32 %v7407_v61, %v6859_v50  ;;  %v5743_v10 = vpop.f32.mrb[39].mxu0  ;;  %v5816_v61 = vld [vmem:[%s10686_s12 + $0xd0] sm:$0xff] }
0x1bfc   : > { %v5744_v37 = vadd.f32 %v6859_v50, %v5743_v10  ;;  %v7649_v50 = vpack.c.bf16 %v5818_v36, %v5814_v12  ;;  %v6054_v12 = vld [vmem:[%s9272_s22 + $0x80] sm:$0xff]  ;;  %v6055_v36 = vld [vmem:[%s9272_s22 + $0x88] sm:$0xff] }
0x1bfd   : > { %v10314_v8 = vadd.f32 %v5749_v17, %v10035_v23  ;;  %v7667_v23 = vpack.c.bf16 %v5797_v5, %v5793_v51  ;;  %v5820_v17 = vld [vmem:[%s10686_s12 + $0xf0] sm:$0xff]  ;;  %v5822_v5 = vld [vmem:[%s10686_s12 + $0x100] sm:$0xff] }
0x1bfe   : > { %v10317_v62 = vadd.f32 %v5744_v37, %v10037_v52  ;;  %v7637_v52 = vpack.c.bf16 %v5794_v25, %v5790_v57  ;;  %v7681_v10 = vpack.c.bf16 %v5820_v17, %v5816_v61  ;;  %v5823_v37 = vld [vmem:[%s10686_s12 + $0x108] sm:$0xff]  ;;  %v5826_v57 = vld [vmem:[%s10686_s12 + $0x120] sm:$0xff]  ;;  %v7683_v25 = vpack.c.bf16 %v5829_v55, %v5825_v49 }
0x1bff   : > { %5758 = vadd.xlane.f32.xlu1 %v10314_v8  ;;  %7668 = vmatprep.subr.bf16.mxu0 %v7667_v23  ;;  %v7651_v51 = vpack.c.bf16 %v5827_v46, %v5823_v37  ;;  %v7653_v23 = vpack.c.bf16 %v5826_v57, %v5822_v5  ;;  %v6087_v61 = vld [vmem:[%s9272_s22 + $0x188] sm:$0xff] }
0x1c00   : > { %5756 = vadd.xlane.f32.xlu0 %v10317_v62  ;;  %7638 = vmatpush1.bf16.msra.mxu1 %v7637_v52  ;;  %v5824_v52 = vld [vmem:[%s10686_s12 + $0x110] sm:$0xff]  ;;  %v6860_v57 = vld [vmem:[%s9233_s26 + $0x2] ss:$0 sm:$0xff] }
0x1c01   : > { %7670 = vmatpush1.bf16.msra.mxu0 %v7669_v13  ;;  %7640 = vmatprep.subr.bf16.mxu1 %v7639_v26  ;;  %v7685_v11 = vpack.c.bf16 %v5828_v16, %v5824_v52  ;;  %v5835_v13 = vld [vmem:[%s10686_s12 + $0x168] sm:$0xff]  ;;  %v7687_v26 = vpack.c.bf16 %v5837_v20, %v5833_v56  ;;  %v6038_v52 = vld [vmem:[%s9272_s22] sm:$0xff]  ;;  %v6039_v16 = vld [vmem:[%s9272_s22 + $0x8] sm:$0xff] }
0x1c02   : > { %7672 = vmatprep.subr.bf16.mxu0 %v7671_v59  ;;  %v7655_v7 = vpack.c.bf16 %v5835_v13, %v5831_v4  ;;  %v5830_v59 = vld [vmem:[%s10686_s12 + $0x140] sm:$0xff]  ;;  %v6070_v4 = vld [vmem:[%s9272_s22 + $0x100] sm:$0xff]  ;;  %v6057_v20 = vld [vmem:[%s9272_s22 + $0x98] sm:$0xff] }
0x1c03   : > { %v7657_v28 = vpack.c.bf16 %v5834_v27, %v5830_v59  ;;  %v6056_v13 = vld [vmem:[%s9272_s22 + $0x90] sm:$0xff] }
0x1c04   : > { %7642 = vmatpush1.bf16.msra.mxu1 %v7641_v24  ;;  %v5836_v24 = vld [vmem:[%s10686_s12 + $0x170] sm:$0xff] }
0x1c05   : > { %7674 = vmatpush1.bf16.msra.mxu0 %v7673_v41  ;;  %7644 = vmatprep.subr.bf16.mxu1 %v7643_v42  ;;  %v7689_v19 = vpack.c.bf16 %v5836_v24, %v5832_v48  ;;  %v7659_v41 = vpack.c.bf16 %v5843_v14, %v5839_v9  ;;  %v5841_v42 = vld [vmem:[%s10686_s12 + $0x198] sm:$0xff]  ;;  %v7701_v48 = vpack.c.bf16 %v6039_v16, %v6038_v52  ;;  %v6040_v24 = vld [vmem:[%s9272_s22 + $0x10] sm:$0xff]  ;;  %v6041_v9 = vld [vmem:[%s9272_s22 + $0x18] sm:$0xff] }
0x1c06   : > { %7676 = vmatprep.subr.bf16.mxu0 %v7675_v58  ;;  %v7691_v60 = vpack.c.bf16 %v5845_v22, %v5841_v42  ;;  %v5842_v58 = vld [vmem:[%s10686_s12 + $0x1a0] sm:$0xff]  ;;  %v7703_v14 = vpack.c.bf16 %v6057_v20, %v6056_v13  ;;  %v6073_v42 = vld [vmem:[%s9272_s22 + $0x118] sm:$0xff]  ;;  %v6058_v22 = vld [vmem:[%s9272_s22 + $0xa0] sm:$0xff] }
0x1c07   : > { %v7661_v35 = vpack.c.bf16 %v5842_v58, %v5838_v29  ;;  %v6090_v58 = vld [vmem:[%s9272_s22 + $0x1a0] sm:$0xff]  ;;  %v6064_v52 = vld [vmem:[%s9272_s22 + $0xd0] sm:$0xff]  ;;  %v6065_v16 = vld [vmem:[%s9272_s22 + $0xd8] sm:$0xff] }
0x1c08   : > { %7646 = vmatpush1.bf16.msra.mxu1 %v7645_v15  ;;  %v5847_v15 = vld [vmem:[%s10686_s12 + $0x1c8] sm:$0xff] }
0x1c09   : > { %7678 = vmatpush1.bf16.msra.mxu0 %v7677_v2  ;;  %7648 = vmatprep.subr.bf16.mxu1 %v7647_v31  ;;  %v5851_v2 = vld [vmem:[%s10686_s12 + $0x1e8] sm:$0xff] }
0x1c0a   : > { %7680 = vmatprep.subr.bf16.mxu0 %v7679_v3  ;;  %v6086_v3 = vld [vmem:[%s9272_s22 + $0x180] sm:$0xff]  ;;  %v6048_v20 = vld [vmem:[%s9272_s22 + $0x50] sm:$0xff] }
0x1c0b   : > { %v7731_v17 = vpack.c.bf16 %v6087_v61, %v6086_v3  ;;  %v6076_v3 = vld [vmem:[%s9272_s22 + $0x130] sm:$0xff]  ;;  %v6062_v61 = vld [vmem:[%s9272_s22 + $0xc0] sm:$0xff] }
0x1c0c   : > { %7650 = vmatpush1.bf16.msra.mxu1 %v7649_v50  ;;  %v7699_v50 = vpack.c.bf16 %v6055_v36, %v6054_v12 }
0x1c0d   : > { %7682 = vmatpush1.bf16.msra.mxu0 %v7681_v10  ;;  %7652 = vmatprep.subr.bf16.mxu1 %v7651_v51 }
0x1c0e   : > { %7684 = vmatprep.subr.bf16.mxu0 %v7683_v25  ;;  %v6861_v25 = vld [vmem:[%s9239_s8 + $0x2] ss:$0 sm:$0xff] }
0x1c10   : > { %7654 = vmatpush1.bf16.msra.mxu1 %v7653_v23 }
0x1c11   : > { %7686 = vmatpush1.bf16.msra.mxu0 %v7685_v11  ;;  %7656 = vmatprep.subr.bf16.mxu1 %v7655_v7  ;;  %v6071_v11 = vld [vmem:[%s9272_s22 + $0x108] sm:$0xff]  ;;  %v6088_v7 = vld [vmem:[%s9272_s22 + $0x190] sm:$0xff] }
0x1c12   : > { %7688 = vmatprep.subr.bf16.mxu0 %v7687_v26  ;;  %v6089_v26 = vld [vmem:[%s9272_s22 + $0x198] sm:$0xff] }
0x1c14   : > { %7658 = vmatpush1.bf16.msra.mxu1 %v7657_v28  ;;  %v7733_v28 = vpack.c.bf16 %v6071_v11, %v6070_v4  ;;  %v6096_v4 = vld [vmem:[%s9272_s22 + $0x1d0] sm:$0xff]  ;;  %v6097_v11 = vld [vmem:[%s9272_s22 + $0x1d8] sm:$0xff] }
0x1c15   : > { %7690 = vmatpush1.bf16.msra.mxu0 %v7689_v19  ;;  %7660 = vmatprep.subr.bf16.mxu1 %v7659_v41  ;;  %v7735_v19 = vpack.c.bf16 %v6089_v26, %v6088_v7  ;;  %v6072_v41 = vld [vmem:[%s9272_s22 + $0x110] sm:$0xff]  ;;  %v6049_v7 = vld [vmem:[%s9272_s22 + $0x58] sm:$0xff]  ;;  %v7719_v26 = vpack.c.bf16 %v6065_v16, %v6064_v52 }
0x1c16   : > { %7692 = vmatprep.subr.bf16.mxu0 %v7691_v60  ;;  %v6059_v60 = vld [vmem:[%s9272_s22 + $0xa8] sm:$0xff] }
0x1c18   : > { %7662 = vmatpush1.bf16.msra.mxu1 %v7661_v35  ;;  %v7737_v35 = vpack.c.bf16 %v6073_v42, %v6072_v41 }
0x1c8c   : > { %v5759_v18 = vpop.xlane.xlu1 %5758 }
0x1c8d   : > { %v5757_v44 = vpop.xlane.xlu0 %5756  ;;  %v5761_v33 = vmul.f32 0.0078125, %v5759_v18  ;;  %v5849_v18 = vld [vmem:[%s10686_s12 + $0x1d8] sm:$0xff] }
0x1c8e   : > { %v5760_v47 = vmul.f32 0.0078125, %v5757_v44  ;;  %v7693_v44 = vpack.c.bf16 %v5844_v40, %v5840_v21  ;;  %v6091_v21 = vld [vmem:[%s9272_s22 + $0x1a8] sm:$0xff]  ;;  %v7705_v40 = vpack.c.bf16 %v6041_v9, %v6040_v24  ;;  %v6098_v24 = vld [vmem:[%s9272_s22 + $0x1e0] sm:$0xff] }
0x1c8f   : > { %v10349_v1 = vsub.f32 %v10314_v8, %v5761_v33  ;;  %v7663_v33 = vpack.c.bf16 %v5851_v2, %v5847_v15  ;;  %v6042_v15 = vld [vmem:[%s9272_s22 + $0x20] sm:$0xff]  ;;  %v6043_v2 = vld [vmem:[%s9272_s22 + $0x28] sm:$0xff] }
0x1c90   : > { %v10346_v30 = vsub.f32 %v10317_v62, %v5760_v47  ;;  %v5853_v47 = vld [vmem:[%s10686_s12 + $0x1f8] sm:$0xff]  ;;  %7694 = vmatpush1.bf16.msra.mxu0 %v7693_v44  ;;  %v7739_v44 = vpack.c.bf16 %v6091_v21, %v6090_v58  ;;  %v7709_v32 = vpack.c.bf16 %v6043_v2, %v6042_v15  ;;  %v6100_v15 = vld [vmem:[%s9272_s22 + $0x1f0] sm:$0xff] }
0x1c91   : > { %v5765_v54 = vmul.f32 %v10349_v1, %v10349_v1  ;;  %v7695_v53 = vpack.c.bf16 %v5853_v47, %v5849_v18  ;;  %7664 = vmatprep.subr.bf16.mxu1 %v7663_v33  ;;  %v7707_v18 = vpack.c.bf16 %v6059_v60, %v6058_v22  ;;  %v6074_v33 = vld [vmem:[%s9272_s22 + $0x120] sm:$0xff]  ;;  %v6075_v47 = vld [vmem:[%s9272_s22 + $0x128] sm:$0xff] }
0x1c92   : > { %v5764_v38 = vmul.f32 %v10346_v30, %v10346_v30  ;;  %v7741_v0 = vpack.c.bf16 %v6075_v47, %v6074_v33  ;;  %v6099_v9 = vld [vmem:[%s9272_s22 + $0x1e8] sm:$0xff]  ;;  %v6050_v22 = vld [vmem:[%s9272_s22 + $0x60] sm:$0xff]  ;;  %v6052_v33 = vld [vmem:[%s9272_s22 + $0x70] sm:$0xff] }
0x1c93   : > { %7696 = vmatprep.subr.bf16.mxu0 %v7695_v53  ;;  %v6093_v53 = vld [vmem:[%s9272_s22 + $0x1b8] sm:$0xff]  ;;  %v7755_v42 = vpack.c.bf16 %v6099_v9, %v6098_v24  ;;  %v6082_v60 = vld [vmem:[%s9272_s22 + $0x160] sm:$0xff]  ;;  %v6083_v21 = vld [vmem:[%s9272_s22 + $0x168] sm:$0xff] }
0x1c94   : > { %5766 = vadd.xlane.f32.xlu0 %v5764_v38  ;;  %v5846_v38 = vld [vmem:[%s10686_s12 + $0x1c0] sm:$0xff]  ;;  %7698 = vmatpush1.bf16.msra.mxu0 %v7697_v63  ;;  %v6045_v63 = vld [vmem:[%s9272_s22 + $0x38] sm:$0xff] }
0x1c95   : > { %7732 = vmatprep.subr.bf16.mxu0 %v7731_v17  ;;  %v6063_v17 = vld [vmem:[%s9272_s22 + $0xc8] sm:$0xff]  ;;  %v6053_v47 = vld [vmem:[%s9272_s22 + $0x78] sm:$0xff] }
0x1c98   : > { %5768 = vadd.xlane.f32.xlu0 %v5765_v54  ;;  %v5850_v54 = vld [vmem:[%s10686_s12 + $0x1e0] sm:$0xff] }
0x1c99   : > { %v7665_v31 = vpack.c.bf16 %v5850_v54, %v5846_v38  ;;  %v6060_v38 = vld [vmem:[%s9272_s22 + $0xb0] sm:$0xff] }
0x1c9a   : > { %v6092_v54 = vld [vmem:[%s9272_s22 + $0x1b0] sm:$0xff] }
0x1c9b   : > { %7666 = vmatpush1.bf16.msra.mxu1 %v7665_v31  ;;  %v6044_v31 = vld [vmem:[%s9272_s22 + $0x30] sm:$0xff]  ;;  %v7743_v36 = vpack.c.bf16 %v6093_v53, %v6092_v54  ;;  %v6085_v54 = vld [vmem:[%s9272_s22 + $0x178] sm:$0xff] }
0x1c9c   : > { %7700 = vmatprep.subr.bf16.mxu1 %v7699_v50  ;;  %v6077_v50 = vld [vmem:[%s9272_s22 + $0x138] sm:$0xff] }
0x1d21   : > { %v5767_v10 = vpop.xlane.xlu0 %5766 }
0x1d22   : > { %v5770_v37 = vmul.f32 0.0078125, %v5767_v10  ;;  %v6094_v10 = vld [vmem:[%s9272_s22 + $0x1c0] sm:$0xff] }
0x1d24   : > { %v5772_v46 = vadd.f32 1e-05, %v5770_v37  ;;  %v6095_v37 = vld [vmem:[%s9272_s22 + $0x1c8] sm:$0xff] }
0x1d25   : > { %v5769_v49 = vpop.xlane.xlu0 %5768 }
0x1d26   : > { %8049 = vrsqrt.f32 %v5772_v46  ;;  %v5771_v51 = vmul.f32 0.0078125, %v5769_v49  ;;  %v7713_v46 = vpack.c.bf16 %v6045_v63, %v6044_v31  ;;  %v7745_v49 = vpack.c.bf16 %v6077_v50, %v6076_v3 }
0x1d28   : > { %v5773_v55 = vadd.f32 1e-05, %v5771_v51  ;;  %v6046_v51 = vld [vmem:[%s9272_s22 + $0x40] sm:$0xff] }
0x1d2a   : > { %8051 = vrsqrt.f32 %v5773_v55  ;;  %v6047_v55 = vld [vmem:[%s9272_s22 + $0x48] sm:$0xff] }
0x1d2b   : > { %v7717_v13 = vpack.c.bf16 %v6047_v55, %v6046_v51 }
0x1d30   : > { %v8050_v5 = vpop.eup %8049 }
0x1d31   : > { %v5776_v23 = vmul.f32 %v8050_v5, %v10346_v30  ;;  %v7715_v5 = vpack.c.bf16 %v6063_v17, %v6062_v61 }
0x1d33   : > { %v5782_v56 = vmul.f32 %v6860_v57, %v5776_v23  ;;  %v6079_v23 = vld [vmem:[%s9272_s22 + $0x148] sm:$0xff] }
0x1d34   : > { %v8052_v59 = vpop.eup %8051 }
0x1d35   : > { %v5788_v27 = vadd.f32 %v6861_v25, %v5782_v56  ;;  %v5777_v30 = vmul.f32 %v8052_v59, %v10349_v1  ;;  %v7751_v59 = vpack.c.bf16 %v6097_v11, %v6096_v4 }
0x1d37   : > { %5941 = vmatmul.mubr.f32.vlgmr.msra.gmra.mrb[40].mxu1 %v5788_v27  ;;  %6018 = vmatmul.mubr.f32.vlgmr.msra.gmra.mrb[40].mxu0 %v5788_v27  ;;  %v5783_v29 = vmul.f32 %v6860_v57, %v5777_v30  ;;  %v7747_v57 = vpack.c.bf16 %v6095_v37, %v6094_v10  ;;  %v6080_v27 = vld [vmem:[%s9272_s22 + $0x150] sm:$0xff]  ;;  %v6081_v30 = vld [vmem:[%s9272_s22 + $0x158] sm:$0xff] }
0x1d38   : > { %5946 = vmatprep.mubr.f32.mxu1 %v8560_v6  ;;  %6023 = vmatprep.mubr.f32.mxu0 %v8560_v6  ;;  %v6061_v6 = vld [vmem:[%s9272_s22 + $0xb8] sm:$0xff] }
0x1d39   : > { %v5789_v1 = vadd.f32 %v6861_v25, %v5783_v29  ;;  %7702 = vmatpush3.bf16.msra.mxu1 %v7701_v48  ;;  %7734 = vmatpush3.bf16.msra.mxu0 %v7733_v28  ;;  %v7711_v12 = vpack.c.bf16 %v6061_v6, %v6060_v38  ;;  %v6078_v25 = vld [vmem:[%s9272_s22 + $0x140] sm:$0xff]  ;;  %v6067_v28 = vld [vmem:[%s9272_s22 + $0xe8] sm:$0xff]  ;;  %v6084_v38 = vld [vmem:[%s9272_s22 + $0x170] sm:$0xff]  ;;  %v7729_v6 = vpack.c.bf16 %v6053_v47, %v6052_v33 }
0x1d3a   : > { %7704 = vmatprep.subr.bf16.mxu1 %v7703_v14  ;;  %7736 = vmatprep.subr.bf16.mxu0 %v7735_v19  ;;  %v7749_v56 = vpack.c.bf16 %v6079_v23, %v6078_v25  ;;  %v6066_v48 = vld [vmem:[%s9272_s22 + $0xe0] sm:$0xff]  ;;  %v7721_v14 = vpack.c.bf16 %v6049_v7, %v6048_v20  ;;  %v7753_v19 = vpack.c.bf16 %v6081_v30, %v6080_v27  ;;  %v6051_v29 = vld [vmem:[%s9272_s22 + $0x68] sm:$0xff] }
0x1d3b   : > { %5947 = vmatmul.mubr.f32.gmra.mrb[42].mxu1 %v5789_v1  ;;  %6024 = vmatmul.mubr.f32.gmra.mrb[42].mxu0 %v5789_v1  ;;  %v7723_v41 = vpack.c.bf16 %v6067_v28, %v6066_v48  ;;  %v7725_v58 = vpack.c.bf16 %v6051_v29, %v6050_v22  ;;  %v7757_v1 = vpack.c.bf16 %v6083_v21, %v6082_v60 }
0x1d3c   : > { %v7761_v53 = vpack.c.bf16 %v6085_v54, %v6084_v38 }
0x1d3d   : > { %7706 = vmatpush3.bf16.msra.mxu1 %v7705_v40  ;;  %7738 = vmatpush3.bf16.msra.mxu0 %v7737_v35  ;;  %v6068_v40 = vld [vmem:[%s9272_s22 + $0xf0] sm:$0xff]  ;;  %v6069_v35 = vld [vmem:[%s9272_s22 + $0xf8] sm:$0xff] }
0x1d3e   : > { %7708 = vmatprep.subr.bf16.mxu1 %v7707_v18  ;;  %7740 = vmatprep.subr.bf16.mxu0 %v7739_v44  ;;  %v7727_v2 = vpack.c.bf16 %v6069_v35, %v6068_v40  ;;  %v6101_v18 = vld [vmem:[%s9272_s22 + $0x1f8] sm:$0xff] }
0x1d3f   : > { %v7759_v44 = vpack.c.bf16 %v6101_v18, %v6100_v15 }
0x1d41   : > { %7710 = vmatpush3.bf16.msra.mxu1 %v7709_v32  ;;  %7742 = vmatpush3.bf16.msra.mxu0 %v7741_v0  ;;  %v5854_v32 = vld [vmem:[%s1218_s24] sm:$0xf]  ;;  %v5870_v0 = vsub.s32 3, %v9351_v39 }
0x1d42   : > { %7712 = vmatprep.subr.bf16.mxu1 %v7711_v12  ;;  %7744 = vmatprep.subr.bf16.mxu0 %v7743_v36  ;;  %v5859_v31 = vrot.slane %v5854_v32, %v9354_v34  ;;  %v5867_v63 = vrot.slane %v5854_v32, %v1329_v45  ;;  %v5863_v12 = vrot.slane %v5854_v32, %v9358_v43 }
0x1d43   : > { %v5871_v36 = vrot.slane %v5854_v32, %v5870_v0 }
0x1d45   : > { %7714 = vmatpush3.bf16.msra.mxu1 %v7713_v46  ;;  %7746 = vmatpush3.bf16.msra.mxu0 %v7745_v49 }
0x1d46   : > { %7716 = vmatprep.subr.bf16.mxu1 %v7715_v5  ;;  %7748 = vmatprep.subr.bf16.mxu0 %v7747_v57 }
0x1d49   : > { %7718 = vmatpush3.bf16.msra.mxu1 %v7717_v13  ;;  %7750 = vmatpush3.bf16.msra.mxu0 %v7749_v56 }
0x1d4a   : > { %7720 = vmatprep.subr.bf16.mxu1 %v7719_v26  ;;  %7752 = vmatprep.subr.bf16.mxu0 %v7751_v59  ;;  %v6862_v26 = vld [vmem:[%s1221_s17] ss:$0 sm:$0xff]  ;;  %s10690_s17 = sld [smem:[#allocation35_spill]] }
0x1d4d   : > { %7722 = vmatpush3.bf16.msra.mxu1 %v7721_v14  ;;  %7754 = vmatpush3.bf16.msra.mxu0 %v7753_v19 }
0x1d4e   : > { %7724 = vmatprep.subr.bf16.mxu1 %v7723_v41  ;;  %7756 = vmatprep.subr.bf16.mxu0 %v7755_v42 }
0x1d50   : > { %p6863_p0 = scmp.ne.s32.totalorder %s10690_s17, 1 }
0x1d51   : > { %7726 = vmatpush3.bf16.msra.mxu1 %v7725_v58  ;;  %7758 = vmatpush3.bf16.msra.mxu0 %v7757_v1  ;;  %v6303_v1 = vld [vmem:[#allocation9] sm:$0xff] (!%p6863_p0)  ;;  %v6304_v40 = vld [vmem:[#allocation9 + $0x8] sm:$0xff] (!%p6863_p0)  ;;  %v6305_v35 = vld [vmem:[#allocation9 + $0x10] sm:$0xff] (!%p6863_p0) }
0x1d52   : > { %7728 = vmatprep.subr.bf16.mxu1 %v7727_v2  ;;  %7760 = vmatprep.subr.bf16.mxu0 %v7759_v44  ;;  %v7763_v15 = vpack.c.bf16 (!%p6863_p0), %v6304_v40, %v6303_v1  ;;  %v6306_v2 = vld [vmem:[#allocation9 + $0x18] sm:$0xff] (!%p6863_p0)  ;;  %v6308_v32 = vld [vmem:[#allocation9 + $0x28] sm:$0xff] (!%p6863_p0) }
0x1d53   : > { %v7767_v18 = vpack.c.bf16 (!%p6863_p0), %v6306_v2, %v6305_v35 }
0x1d55   : > { %7730 = vmatpush3.bf16.msra.mxu1 %v7729_v6  ;;  %7762 = vmatpush3.bf16.msra.mxu0 %v7761_v53  ;;  %v6307_v53 = vld [vmem:[#allocation9 + $0x20] sm:$0xff] (!%p6863_p0) }
0x1d56   : > { %7764 = vmatprep.subr.bf16.mxu0 (!%p6863_p0), %v7763_v15  ;;  %v7771_v0 = vpack.c.bf16 (!%p6863_p0), %v6308_v32, %v6307_v53 }
0x1e0a   : > { %v5942_v3 = vpop.f32.mrb[40].mxu1  ;;  %v6019_v50 = vpop.f32.mrb[40].mxu0 }
0x1e0b   : > { %v5943_v61 = vadd.f32 %v5942_v3, %v5859_v31  ;;  %v6020_v17 = vadd.f32 %v6019_v50, %v5867_v63  ;;  %v5944_v10 = vpop.f32.mrb[41].mxu1  ;;  %v6021_v37 = vpop.f32.mrb[41].mxu0  ;;  %v6312_v3 = vld [vmem:[#allocation9 + $0x48] sm:$0xff] (!%p6863_p0) }
0x1e0c   : > { %v5945_v46 = vadd.f32 %v5944_v10, %v5863_v12  ;;  %v6022_v49 = vadd.f32 %v6021_v37, %v5871_v36  ;;  %v6315_v10 = vld [vmem:[#allocation9 + $0x60] sm:$0xff] (!%p6863_p0) }
0x1e0d   : > { %v6030_v25 = vmax.f32 %v5943_v61, 0.0  ;;  %v6032_v34 = vmax.f32 %v6020_v17, 0.0  ;;  %v6313_v61 = vld [vmem:[#allocation9 + $0x50] sm:$0xff] (!%p6863_p0)  ;;  %v6314_v17 = vld [vmem:[#allocation9 + $0x58] sm:$0xff] (!%p6863_p0) }
0x1e0e   : > { %v6031_v51 = vmax.f32 %v5945_v46, 0.0  ;;  %v6033_v55 = vmax.f32 %v6022_v49, 0.0  ;;  %v5948_v5 = vpop.f32.mrb[42].mxu1  ;;  %v6025_v57 = vpop.f32.mrb[42].mxu0  ;;  %v7783_v37 = vpack.c.bf16 (!%p6863_p0), %v6314_v17, %v6313_v61  ;;  %v6316_v46 = vld [vmem:[#allocation9 + $0x68] sm:$0xff] (!%p6863_p0) }
0x1e0f   : > { %v5949_v23 = vadd.f32 %v5948_v5, %v5859_v31  ;;  %v6026_v39 = vadd.f32 %v6025_v57, %v5867_v63  ;;  %v5950_v45 = vpop.f32.mrb[43].mxu1  ;;  %v6027_v52 = vpop.f32.mrb[43].mxu0  ;;  %v6309_v31 = vld [vmem:[#allocation9 + $0x30] sm:$0xff] (!%p6863_p0)  ;;  %v6310_v63 = vld [vmem:[#allocation9 + $0x38] sm:$0xff] (!%p6863_p0)  ;;  %v7787_v49 = vpack.c.bf16 (!%p6863_p0), %v6316_v46, %v6315_v10 }
0x1e10   : > { %v5951_v43 = vadd.f32 %v5950_v45, %v5863_v12  ;;  %v6028_v16 = vadd.f32 %v6027_v52, %v5871_v36  ;;  %6173 = vmatprep.mubr.f32.mxu1 %v6031_v51  ;;  %6248 = vmatprep.mubr.f32.mxu0 %v6033_v55  ;;  %v7775_v12 = vpack.c.bf16 (!%p6863_p0), %v6310_v63, %v6309_v31  ;;  %v6311_v36 = vld [vmem:[#allocation9 + $0x40] sm:$0xff] (!%p6863_p0)  ;;  %v6317_v51 = vld [vmem:[#allocation9 + $0x70] sm:$0xff] (!%p6863_p0)  ;;  %v6318_v55 = vld [vmem:[#allocation9 + $0x78] sm:$0xff] (!%p6863_p0) }
0x1e11   : > { %6174 = vmatmul.mubr.f32.vlgmr.msra.gmra.mrb[44].mxu1 %v6030_v25  ;;  %6249 = vmatmul.mubr.f32.vlgmr.msra.gmra.mrb[44].mxu0 %v6032_v34  ;;  %v6034_v13 = vmax.f32 %v5949_v23, 0.0  ;;  %v6036_v56 = vmax.f32 %v6026_v39, 0.0  ;;  %v7779_v50 = vpack.c.bf16 (!%p6863_p0), %v6312_v3, %v6311_v36  ;;  %v7791_v5 = vpack.c.bf16 (!%p6863_p0), %v6318_v55, %v6317_v51 }
0x1e12   : > { %v6035_v4 = vmax.f32 %v5951_v43, 0.0  ;;  %v6037_v11 = vmax.f32 %v6028_v16, 0.0  ;;  %7766 = vmatpush3.bf16.msra.mxu0 (!%p6863_p0), %v7763_v15  ;;  %v6864_v43 = vld [vmem:[#allocation8] ss:$0 sm:$0xff] (!%p6863_p0) }
0x1e13   : > { %7768 = vmatprep.subr.bf16.mxu0 (!%p6863_p0), %v7767_v18 }
0x1e14   : > { %6178 = vmatprep.mubr.f32.mxu1 %v6035_v4  ;;  %6253 = vmatprep.mubr.f32.mxu0 %v6037_v11  ;;  %v6865_v4 = vld [vmem:[#allocation8 + $0x1] ss:$0 sm:$0xff] (!%p6863_p0) }
0x1e15   : > { %6179 = vmatmul.mubr.f32.gmra.mrb[46].mxu1 %v6034_v13  ;;  %6254 = vmatmul.mubr.f32.gmra.mrb[46].mxu0 %v6036_v56 }
0x1e16   : > { %7770 = vmatpush3.bf16.msra.mxu0 (!%p6863_p0), %v7767_v18 }
0x1e17   : > { %7772 = vmatprep.subr.bf16.mxu0 (!%p6863_p0), %v7771_v0 }
0x1e1a   : > { %7774 = vmatpush3.bf16.msra.mxu0 (!%p6863_p0), %v7771_v0 }
0x1e1b   : > { %7776 = vmatprep.subr.bf16.mxu0 (!%p6863_p0), %v7775_v12 }
0x1e1e   : > { %7778 = vmatpush3.bf16.msra.mxu0 (!%p6863_p0), %v7775_v12 }
0x1e1f   : > { %7780 = vmatprep.subr.bf16.mxu0 (!%p6863_p0), %v7779_v50 }
0x1e22   : > { %7782 = vmatpush3.bf16.msra.mxu0 (!%p6863_p0), %v7779_v50 }
0x1e23   : > { %7784 = vmatprep.subr.bf16.mxu0 (!%p6863_p0), %v7783_v37 }
0x1e26   : > { %7786 = vmatpush3.bf16.msra.mxu0 (!%p6863_p0), %v7783_v37 }
0x1e27   : > { %7788 = vmatprep.subr.bf16.mxu0 (!%p6863_p0), %v7787_v49 }
0x1e2a   : > { %7790 = vmatpush3.bf16.msra.mxu0 (!%p6863_p0), %v7787_v49 }
0x1e2b   : > { %7792 = vmatprep.subr.bf16.mxu0 (!%p6863_p0), %v7791_v5 }
0x1e2e   : > { %7794 = vmatpush3.bf16.msra.mxu0 (!%p6863_p0), %v7791_v5 }
0x1ee4   : > { %v7046_v20 = vpop.f32.mrb[44].mxu1  ;;  %v7084_v7 = vpop.f32.mrb[44].mxu0 }
0x1ee5   : > { %v7047_v59 = vpop.f32.mrb[45].mxu1  ;;  %v7085_v27 = vpop.f32.mrb[45].mxu0 }
0x1ee6   : > { %v7048_v30 = vadd.f32 %v7047_v59, %v7046_v20  ;;  %v7086_v48 = vadd.f32 %v7085_v27, %v7084_v7  ;;  %v6866_v59 = vld [vmem:[#allocation11] ss:$0 sm:$0xff] (!%p6863_p0) }
0x1ee8   : > { %v6176_v28 = vadd.f32 %v7048_v30, %v6862_v26  ;;  %v7049_v24 = vpop.f32.mrb[46].mxu1  ;;  %v7087_v9 = vpop.f32.mrb[46].mxu0 }
0x1ee9   : > { %v7050_v14 = vpop.f32.mrb[47].mxu1  ;;  %v7088_v19 = vpop.f32.mrb[47].mxu0 }
0x1eea   : > { %v6251_v41 = vadd.f32 %v7086_v48, %v6176_v28  ;;  %v7051_v42 = vadd.f32 %v7050_v14, %v7049_v24  ;;  %v7089_v22 = vadd.f32 %v7088_v19, %v7087_v9 }
0x1eec   : > { %v6259_v29 = vadd.f32 %v6251_v41, %v10317_v62  ;;  %v6181_v60 = vadd.f32 %v7051_v42, %v6862_v26  ;;  %6266 = sbr.rel (%p6863_p0) target bundleno = 8449 (0x2101), region = 176 }
0x1eee   : > { %6261 = vst [vmem:[#allocation2] sm:$0xff] %v6259_v29  ;;  %v6256_v58 = vadd.f32 %v7089_v22, %v6181_v60  ;;  %6269 = vadd.xlane.f32.xlu0 (!%p6863_p0), %v6259_v29 }
0x1ef0   : > { %v6260_v21 = vadd.f32 %v6256_v58, %v10314_v8 }
0x1ef2   : > { %6262 = vst [vmem:[#allocation2 + $0x8] sm:$0xff] %v6260_v21  ;;  %6271 = vadd.xlane.f32.xlu0 (!%p6863_p0), %v6260_v21 }
0x1f7b   : > { %v6270_v62 = vpop.xlane.xlu0 %6269 }
0x1f7c   : > { %v6273_v44 = vmul.f32 0.0078125, %v6270_v62 }
0x1f7e   : > { %v6275_v33 = vsub.f32 %v6259_v29, %v6273_v44 }
0x1f7f   : > { %v6272_v8 = vpop.xlane.xlu0 %6271 }
0x1f80   : > { %v6274_v47 = vmul.f32 0.0078125, %v6272_v8  ;;  %v6277_v38 = vmul.f32 %v6275_v33, %v6275_v33 }
0x1f82   : > { %v6276_v6 = vsub.f32 %v6260_v21, %v6274_v47  ;;  %6279 = vadd.xlane.f32.xlu1 %v6277_v38 }
0x1f84   : > { %v6278_v54 = vmul.f32 %v6276_v6, %v6276_v6 }
0x1f86   : > { %6281 = vadd.xlane.f32.xlu1 %v6278_v54 }
0x200f   : > { %v6280_v57 = vpop.xlane.xlu1 %6279 }
0x2010   : > { %v6283_v25 = vmul.f32 0.0078125, %v6280_v57 }
0x2012   : > { %v6285_v34 = vadd.f32 1e-05, %v6283_v25 }
0x2013   : > { %v6282_v23 = vpop.xlane.xlu1 %6281 }
0x2014   : > { %8065 = vrsqrt.f32 %v6285_v34  ;;  %v6284_v39 = vmul.f32 0.0078125, %v6282_v23 }
0x2016   : > { %v6286_v45 = vadd.f32 1e-05, %v6284_v39 }
0x2018   : > { %8067 = vrsqrt.f32 %v6286_v45 }
0x201e   : > { %v8066_v52 = vpop.eup %8065 }
0x201f   : > { %v6289_v16 = vmul.f32 %v8066_v52, %v6275_v33 }
0x2021   : > { %v6295_v11 = vmul.f32 %v6864_v43, %v6289_v16 }
0x2022   : > { %v8068_v13 = vpop.eup %8067 }
0x2023   : > { %v6290_v56 = vmul.f32 %v8068_v13, %v6276_v6  ;;  %v6301_v20 = vadd.f32 %v6865_v4, %v6295_v11 }
0x2025   : > { %v6296_v7 = vmul.f32 %v6864_v43, %v6290_v56  ;;  %7440 = vmatprep.mubr.f32.mxu0 %v6301_v20 }
0x2027   : > { %v6302_v26 = vadd.f32 %v6865_v4, %v6296_v7 }
0x2029   : > { %7441 = vmatmul.mubr.f32.vlgmr.msra.gmra.mrb[0].mxu0 %v6302_v26 }
0x20fc   : > { %v7442_v27 = vpop.f32.mrb[0].mxu0 }
0x20fd   : > { %v6398_v30 = vadd.f32 %v7442_v27, %v6866_v59  ;;  %v6392_v48 = vpop.f32.mrb[1].mxu0 }
0x20fe   : > { %v6393_v28 = vadd.f32 %v6866_v59, %v6392_v48 }
0x20ff   : > { %6402 = vst [vmem:[#allocation24 + $0x8] sm:$0xff] %v6398_v30 }
0x2100   : > { %6401 = vst [vmem:[#allocation24] sm:$0xff] %v6393_v28 }
0x2101 PF: > { %s10691_s10 = sld [smem:[#allocation35_spill]]  ;;  %s8566_s15 = smov [#allocation24]  }
0x2102   : > { %s6409_s20 = sshll.u32 %s8566_s15, 4  ;;  %s6410_s20 = int_to_ptr.vmem [resolvable:$true] %s6409_s20 }
0x2103   : > { %s8449_s19 = scalar_lea.vmem %s6410_s20, 256  ;;  %p8456_p3 = scmp.lt.s32.totalorder %s6410_s20, %s6410_s20 }
0x2104   : > { %p8450_p1 = scmp.ne.s32.totalorder %s6410_s20, %s8449_s19  ;;  %p8457_p2 = scmp.lt.s32.totalorder %s8449_s19, %s8449_s19 }
0x2106   : > { %p8458_p9 = por %p8457_p2, %p8456_p3 }
0x2107   : > { %p7891_p10 = scmp.eq.s32.totalorder %s10691_s10, 1 }
0x2109   : > { %p8451_p4 = pnand %p8450_p1, %p7891_p10 }
0x210b   : > { %p8452_p11 = pneg %p8451_p4 }
0x210d   : > { %p8459_p12 = pnand %p8458_p9, %p8452_p11 }
0x210f   : > { %8462 = shalt.err (!%p8459_p12)
}
0x2110   : > { %s10692_s27 = sld [smem:[#allocation68_spill]] }
0x2116   : > { %s10693_s11 = smov %s10692_s27  ;;  %s8463_s16 = scalar_lea.hbm %s10692_s27, 256 }
0x2117   : > { %p8464_p5 = scmp.ne.s32.totalorder %s10693_s11, %s8463_s16  ;;  %p8469_p7 = scmp.lt.u32.totalorder %s8463_s16, %s10693_s11 }
0x2119   : > { %p8465_p13 = pnand %p8464_p5, %p7891_p10 }
0x211b   : > { %p8466_p6 = pneg %p8465_p13 }
0x211d   : > { %p8471_p8 = pnand %p8469_p7, %p8466_p6 }
0x211f   : > { %8474 = shalt.err (!%p8471_p8)
}
0x2120   : > { %s8567_s5 = smov 128   ;;  %s8568_s25 = smov 8  }
0x2121   : > { %7836 = dma.vmem_to_hbm [thread:$0]  (%p7891_p10), %s6410_s20, 256, %s10693_s11, [#allocation5], %s8567_s5, %s8567_s5, %s8568_s25  }
0x2122   : > { %8520 = dma.done.wait (%p7891_p10), [#allocation5], 256  }
0x2123   : > { %8522 = vsyncadd (%p7891_p10), [#allocation5], 4294967040 }
0x2124 PF: > { %s10694_s28 = sld [smem:[#allocation38_spill]]  ;;  %s10695_s5 = sld [smem:[#allocation33_spill]] }
0x2125   : > { %s10696_s26 = sld [smem:[#allocation34_spill]]  ;;  %s10697_s27 = sld [smem:[#allocation39_spill]] }
0x212a   : > { %p47_p0 = scmp.ge.s32.totalorder %s10694_s28, 4  }
0x212c   :  { %49 = sbr.rel (!%p47_p0) target bundleno = 39 (0x27), region = 292 }
0x2133   :  { %6425 = vsyncpa [#allocation4], 1 }
0x2134   :  { %6427 = vsyncpa [#allocation4 + $0x1], 1 }
0x2135   :  { %6428 = vsyncpa [#allocation7], 1 }
0x2136   :  { %6429 = vsyncpa [#allocation10], 1 }
0x2137   :  { %6430 = vsyncpa [#allocation13], 1 }
0x2138   :  { %6432 = vsyncpa [#allocation13 + $0x1], 1 }
0x2139   :  { %6433 = vsyncpa [#allocation16], 1 }
0x213a   :  { %6435 = vsyncpa [#allocation16 + $0x1], 1 }
0x213b   :  { %6436 = vsyncpa [#allocation19], 1 }
0x213c   :  { %6438 = vsyncpa [#allocation19 + $0x1], 1 }
0x213d   :  { %6439 = vsyncpa [#allocation22], 1 }
0x213e   :  { %6441 = vsyncpa [#allocation22 + $0x1], 1 }
0x213f   :  { %6442 = vsyncpa [#allocation5], 1 }
0x2140   :  { %6444 = vsyncpa [#allocation5 + $0x1], 1 }

</bundles_post_ra>
